<compile_context>
chip_gen: v7x
topology: tpu7x:2x2x1
jax: 0.10.0
libtpu: 0.0.40
codegen_flags: <defaults>
</compile_context>

<pallas_src>
import jax
import jax.numpy as jnp
from jax import lax
from jax.experimental import pallas as pl
from jax.experimental.pallas import tpu as pltpu

BN_EPS = 1e-5


# ---------------------------------------------------------------------------
# Fused kernel: (Linear -> BatchNorm1d(batch stats) -> ReLU -> Linear) x 2 branches
# grid = (branch,)   branch 0 = pooled-image + name, branch 1 = caption
# ---------------------------------------------------------------------------
def _fused_kernel(pooled_ref, v_ref, a1_hbm_ref, w768_ref, gamma_ref, beta_ref,
                  wout_ref, bout_ref, o_ref, h_sc, a1_buf, a1_sem):
    br = pl.program_id(0)

    # Branch 0 also needs the (1024, 1024) pooled-image slice of fc1's first linear.
    # It stays in HBM and is copied manually only on branch 0, so the branch-1 core
    # (v7x megacore split) never spends HBM bandwidth on it.
    @pl.when(br == 0)
    def _():
        pltpu.make_async_copy(a1_hbm_ref, a1_buf, a1_sem).start()

    # Shared (B, 768) @ (768, 1024) first linear (name for branch 0, caption for branch 1).
    # First-linear bias intentionally omitted: it cancels exactly in batch-stat BatchNorm.
    h_sc[...] = jnp.dot(v_ref[...], w768_ref[...], preferred_element_type=jnp.float32)

    @pl.when(br == 0)
    def _():
        pltpu.make_async_copy(a1_hbm_ref, a1_buf, a1_sem).wait()
        h_sc[...] += jnp.dot(pooled_ref[...], a1_buf[...],
                             preferred_element_type=jnp.float32)

    # BatchNorm1d (training-mode batch stats, biased variance), centered two-pass form.
    h = h_sc[...]                                            # (B, 1024) f32
    mean = jnp.mean(h, axis=0, keepdims=True)
    xc = h - mean
    var = jnp.mean(xc * xc, axis=0, keepdims=True)
    hn = xc * lax.rsqrt(var + BN_EPS)
    hn = jnp.maximum(hn * gamma_ref[...] + beta_ref[...], 0.0)   # affine + ReLU

    # Second linear + bias, written straight to this branch's output block.
    o_ref[...] = jnp.dot(hn.astype(jnp.bfloat16), wout_ref[...],
                         preferred_element_type=jnp.float32) + bout_ref[...]


def basic_linear_fused(pooled, v, a1, w768, gamma, beta, wout, bout):
    B, C = pooled.shape                  # (B, 1024)
    D768 = v.shape[2]                    # 768
    Hdim = w768.shape[2]                 # 1024 hidden
    Dout = wout.shape[2]                 # dim_feature

    return pl.pallas_call(
        _fused_kernel,
        out_shape=jax.ShapeDtypeStruct((2, B, Dout), jnp.float32),
        grid_spec=pltpu.PrefetchScalarGridSpec(
            num_scalar_prefetch=0,
            grid=(2,),
            in_specs=[
                # pooled image features (bf16, tiny) -- constant index map, stays resident.
                pl.BlockSpec((B, C), lambda br: (0, 0)),
                # per-branch 768-dim input (name / caption), bf16.
                pl.BlockSpec((None, B, D768), lambda br: (br, 0, 0)),
                # pooled-image part of fc1's first linear: raw HBM ref, manual DMA on branch 0.
                pl.BlockSpec(memory_space=pl.ANY),
                # per-branch first-linear weights for the 768-dim input, bf16.
                pl.BlockSpec((None, D768, Hdim), lambda br: (br, 0, 0)),
                pl.BlockSpec((None, 1, Hdim), lambda br: (br, 0, 0)),     # BN gamma
                pl.BlockSpec((None, 1, Hdim), lambda br: (br, 0, 0)),     # BN beta
                pl.BlockSpec((None, Hdim, Dout), lambda br: (br, 0, 0)),  # second-linear W, bf16
                pl.BlockSpec((None, 1, Dout), lambda br: (br, 0, 0)),     # second-linear bias
            ],
            out_specs=pl.BlockSpec((None, B, Dout), lambda br: (br, 0, 0)),
            scratch_shapes=[
                pltpu.VMEM((B, Hdim), jnp.float32),       # first-linear result (pre-BN)
                pltpu.VMEM((C, Hdim), jnp.bfloat16),      # manual-DMA buffer for a1 (2 MiB)
                pltpu.SemaphoreType.DMA,                  # a1 copy completion
            ],
        ),
        compiler_params=pltpu.CompilerParams(
            dimension_semantics=("parallel",),            # v7x: one branch per TensorCore
            vmem_limit_bytes=32 << 20,                    # actual footprint ~6.5 MiB
        ),
    )(pooled, v, a1, w768, gamma, beta, wout, bout)


# ---------------------------------------------------------------------------
# Parameters (deterministic, synthetic).  Weight matrices stored in bfloat16,
# packed per-branch so a single kernel handles both branches.
# ---------------------------------------------------------------------------
def init_params(key, dim_feature):
    def linear(k, din, dout):
        k1, k2 = jax.random.split(k)
        bound = 1.0 / (din ** 0.5)
        w = jax.random.uniform(k1, (din, dout), jnp.float32, -bound, bound)  # (in, out): x @ W
        b = jax.random.uniform(k2, (dout,), jnp.float32, -bound, bound)
        return w, b

    keys = jax.random.split(key, 4)
    w1_in, b1_in = linear(keys[0], 1024 + 768, 1024)      # fc1 first linear
    w1_out, b1_out = linear(keys[1], 1024, dim_feature)   # fc1 second linear
    w2_in, b2_in = linear(keys[2], 768, 1024)             # fc2 first linear
    w2_out, b2_out = linear(keys[3], 1024, dim_feature)   # fc2 second linear

    return {
        # fc1 first-linear split: rows [0,1024) act on pooled image, rows [1024,1792) on name.
        "a1": w1_in[:1024].astype(jnp.bfloat16),                             # (1024, 1024)
        "w768": jnp.stack([w1_in[1024:], w2_in]).astype(jnp.bfloat16),       # (2, 768, 1024)
        # First-linear bias: kept ONLY for the reference -- it cancels exactly in batch-stat BN,
        # so the kernel neither loads nor adds it.
        "bh": jnp.stack([b1_in, b2_in])[:, None, :],                         # (2, 1, 1024) f32
        "gamma": jnp.ones((2, 1, 1024), jnp.float32),
        "beta": jnp.zeros((2, 1, 1024), jnp.float32),
        "wout": jnp.stack([w1_out, w2_out]).astype(jnp.bfloat16),            # (2, 1024, Dout)
        "bout": jnp.stack([b1_out, b2_out])[:, None, :],                     # (2, 1, Dout) f32
    }


@jax.jit
def basic_linear_forward(params, img_feature, caption_feature, name_feature):
    # adaptive_avg_pool2d -> (1,1) is a plain spatial mean; hoisted out of the kernel.
    pooled = jnp.mean(img_feature, axis=(2, 3)).astype(jnp.bfloat16)        # (B, 1024)
    v = jnp.stack([name_feature, caption_feature], axis=0).astype(jnp.bfloat16)  # (2, B, 768)
    out = basic_linear_fused(
        pooled, v,
        params["a1"], params["w768"],
        params["gamma"], params["beta"], params["wout"], params["bout"],
    )
    return out[0], out[1]


# ---------------------------------------------------------------------------
# Pure-JAX reference (f32 math on the same bf16-rounded weights, bias included)
# ---------------------------------------------------------------------------
def reference_forward(params, img_feature, caption_feature, name_feature):
    mm = lambda a, b: jnp.dot(a, b, precision=jax.lax.Precision.HIGHEST)

    pooled = jnp.mean(img_feature, axis=(2, 3))                # (B, 1024)
    a1 = params["a1"].astype(jnp.float32)
    w768 = params["w768"].astype(jnp.float32)
    wout = params["wout"].astype(jnp.float32)

    def branch(i, x768, extra):
        h = mm(x768, w768[i]) + params["bh"][i]                # bias present; cancels in BN
        if extra is not None:
            h = h + extra
        mean = jnp.mean(h, axis=0, keepdims=True)
        var = jnp.mean((h - mean) ** 2, axis=0, keepdims=True)
        h = (h - mean) / jnp.sqrt(var + BN_EPS) * params["gamma"][i] + params["beta"][i]
        h = jnp.maximum(h, 0.0)
        return mm(h, wout[i]) + params["bout"][i]

    out_img = branch(0, name_feature, mm(pooled, a1))
    out_cap = branch(1, caption_feature, None)
    return out_img, out_cap


if __name__ == "__main__":
    B = 8
    H = W = 4
    DIM_FEATURE = 256

    key = jax.random.PRNGKey(0)
    kp, k1, k2, k3 = jax.random.split(key, 4)

    params = init_params(kp, DIM_FEATURE)
    img_feature = jax.random.normal(k1, (B, 1024, H, W), jnp.float32)    # NCHW, like PyTorch
    caption_feature = jax.random.normal(k2, (B, 768), jnp.float32)
    name_feature = jax.random.normal(k3, (B, 768), jnp.float32)

    out_img, out_cap = basic_linear_forward(params, img_feature, caption_feature, name_feature)
    out_img, out_cap = jax.block_until_ready((out_img, out_cap))

    ref_img, ref_cap = reference_forward(params, img_feature, caption_feature, name_feature)
    assert out_img.shape == (B, DIM_FEATURE) and out_cap.shape == (B, DIM_FEATURE)
    # bf16 activations + MXU matmuls vs f32 reference -> 2e-2 tolerance.
    assert jnp.allclose(out_img, ref_img, atol=2e-2, rtol=2e-2), \
        float(jnp.max(jnp.abs(out_img - ref_img)))
    assert jnp.allclose(out_cap, ref_cap, atol=2e-2, rtol=2e-2), \
        float(jnp.max(jnp.abs(out_cap - ref_cap)))

    print("KERNEL_OK")
</pallas_src>

<mosaic_0001>
module attributes {stable_mosaic.version = 11 : i64} {
  func.func @_fused_kernel(%arg0: i32, %arg1: memref<8x1024xbf16, #tpu.memory_space<vmem>>, %arg2: memref<1x8x768xbf16, #tpu.memory_space<vmem>>, %arg3: memref<1024x1024xbf16, #tpu.memory_space<any>>, %arg4: memref<1x768x1024xbf16, #tpu.memory_space<vmem>>, %arg5: memref<1x1x1024xf32, #tpu.memory_space<vmem>>, %arg6: memref<1x1x1024xf32, #tpu.memory_space<vmem>>, %arg7: memref<1x1024x256xbf16, #tpu.memory_space<vmem>>, %arg8: memref<1x1x256xf32, #tpu.memory_space<vmem>>, %arg9: memref<1x8x256xf32, #tpu.memory_space<vmem>>, %arg10: memref<8x1024xf32, #tpu.memory_space<vmem>>, %arg11: memref<1024x1024xbf16, #tpu.memory_space<vmem>>, %arg12: memref<!tpu.dma_semaphore, #tpu.memory_space<semaphore_mem>>) attributes {dimension_semantics = [#tpu.dimension_semantics<parallel>], iteration_bounds = array<i64: 2>, scalar_prefetch = 0 : i64, scratch_operands = 3 : i64, tpu.core_type = #tpu.core_type<tc>, window_params = [{pipeline_mode = #tpu.pipeline_mode<synchronous>, transform_indices = @transform_0, window_bounds = array<i64: 8, 1024>}, {transform_indices = @transform_1, window_bounds = array<i64: 1, 8, 768>}, {}, {transform_indices = @transform_3, window_bounds = array<i64: 1, 768, 1024>}, {transform_indices = @transform_4, window_bounds = array<i64: 1, 1, 1024>}, {transform_indices = @transform_5, window_bounds = array<i64: 1, 1, 1024>}, {transform_indices = @transform_6, window_bounds = array<i64: 1, 1024, 256>}, {transform_indices = @transform_7, window_bounds = array<i64: 1, 1, 256>}, {transform_indices = @transform_8, window_bounds = array<i64: 1, 8, 256>}]} {
    %c0_i32 = arith.constant 0 : i32
    %0 = arith.cmpi eq, %arg0, %c0_i32 : i32
    %1 = arith.extui %0 : i1 to i32
    %c0_i32_0 = arith.constant 0 : i32
    %2 = arith.cmpi ne, %1, %c0_i32_0 : i32
    scf.if %2 {
      tpu.enqueue_dma source(%arg3 : memref<1024x1024xbf16, #tpu.memory_space<any>>) target(%arg11 : memref<1024x1024xbf16, #tpu.memory_space<vmem>>) target_semaphore(%arg12 : memref<!tpu.dma_semaphore, #tpu.memory_space<semaphore_mem>>)
    } else {
    }
    %c0 = arith.constant 0 : index
    %c0_1 = arith.constant 0 : index
    %c0_2 = arith.constant 0 : index
    %3 = vector.load %arg2[%c0, %c0_1, %c0_2] : memref<1x8x768xbf16, #tpu.memory_space<vmem>>, vector<1x8x768xbf16>
    %4 = vector.shape_cast %3 : vector<1x8x768xbf16> to vector<8x768xbf16>
    %c0_3 = arith.constant 0 : index
    %c0_4 = arith.constant 0 : index
    %c0_5 = arith.constant 0 : index
    %5 = vector.load %arg4[%c0_3, %c0_4, %c0_5] : memref<1x768x1024xbf16, #tpu.memory_space<vmem>>, vector<1x768x1024xbf16>
    %6 = vector.shape_cast %5 : vector<1x768x1024xbf16> to vector<768x1024xbf16>
    %cst = arith.constant dense<0.000000e+00> : vector<8x1024xf32>
    %7 = tpu.matmul %4, %6, %cst {dimension_numbers = #tpu.dot_dimension_numbers<[1], [0], [0], [1], [0, 0, 1, 1], [], []>} : vector<8x768xbf16>, vector<768x1024xbf16>, vector<8x1024xf32> -> vector<8x1024xf32>
    %c0_6 = arith.constant 0 : index
    %c0_7 = arith.constant 0 : index
    %8 = vector.load %arg10[%c0_6, %c0_7] : memref<8x1024xf32, #tpu.memory_space<vmem>>, vector<8x1024xf32>
    tpu.vector_store %arg10[%c0_6, %c0_7], %7 {strides = array<i32>} : memref<8x1024xf32, #tpu.memory_space<vmem>>, vector<8x1024xf32>,
    %c0_i32_8 = arith.constant 0 : i32
    %9 = arith.cmpi eq, %arg0, %c0_i32_8 : i32
    %10 = arith.extui %9 : i1 to i32
    %c0_i32_9 = arith.constant 0 : i32
    %11 = arith.cmpi ne, %10, %c0_i32_9 : i32
    scf.if %11 {
      tpu.wait_dma2 semaphore(%arg12 : memref<!tpu.dma_semaphore, #tpu.memory_space<semaphore_mem>>) src(%arg3 : memref<1024x1024xbf16, #tpu.memory_space<any>>) dst(%arg11 : memref<1024x1024xbf16, #tpu.memory_space<vmem>>)
      %c0_34 = arith.constant 0 : index
      %c0_35 = arith.constant 0 : index
      %50 = vector.load %arg10[%c0_34, %c0_35] : memref<8x1024xf32, #tpu.memory_space<vmem>>, vector<8x1024xf32>
      %c0_36 = arith.constant 0 : index
      %c0_37 = arith.constant 0 : index
      %51 = vector.load %arg1[%c0_36, %c0_37] : memref<8x1024xbf16, #tpu.memory_space<vmem>>, vector<8x1024xbf16>
      %c0_38 = arith.constant 0 : index
      %c0_39 = arith.constant 0 : index
      %52 = vector.load %arg11[%c0_38, %c0_39] : memref<1024x1024xbf16, #tpu.memory_space<vmem>>, vector<1024x1024xbf16>
      %cst_40 = arith.constant dense<0.000000e+00> : vector<8x1024xf32>
      %53 = tpu.matmul %51, %52, %cst_40 {dimension_numbers = #tpu.dot_dimension_numbers<[1], [0], [0], [1], [0, 0, 1, 1], [], []>} : vector<8x1024xbf16>, vector<1024x1024xbf16>, vector<8x1024xf32> -> vector<8x1024xf32>
      %54 = arith.addf %50, %53 : vector<8x1024xf32>
      %c0_41 = arith.constant 0 : index
      %c0_42 = arith.constant 0 : index
      %55 = vector.load %arg10[%c0_41, %c0_42] : memref<8x1024xf32, #tpu.memory_space<vmem>>, vector<8x1024xf32>
      tpu.vector_store %arg10[%c0_41, %c0_42], %54 {strides = array<i32>} : memref<8x1024xf32, #tpu.memory_space<vmem>>, vector<8x1024xf32>,
    } else {
    }
    %c0_10 = arith.constant 0 : index
    %c0_11 = arith.constant 0 : index
    %12 = vector.load %arg10[%c0_10, %c0_11] : memref<8x1024xf32, #tpu.memory_space<vmem>>, vector<8x1024xf32>
    %cst_12 = arith.constant dense<0.000000e+00> : vector<1024xf32>
    %13 = vector.multi_reduction <add>, %12, %cst_12 [0] : vector<8x1024xf32> to vector<1024xf32>
    %14 = vector.shape_cast %13 : vector<1024xf32> to vector<1x1024xf32>
    %cst_13 = arith.constant 8.000000e+00 : f32
    %15 = vector.broadcast %cst_13 : f32 to vector<1x1024xf32>
    %16 = arith.divf %14, %15 : vector<1x1024xf32>
    %17 = vector.broadcast %16 : vector<1x1024xf32> to vector<8x1024xf32>
    %18 = arith.subf %12, %17 : vector<8x1024xf32>
    %19 = arith.mulf %18, %18 : vector<8x1024xf32>
    %cst_14 = arith.constant dense<0.000000e+00> : vector<1024xf32>
    %20 = vector.multi_reduction <add>, %19, %cst_14 [0] : vector<8x1024xf32> to vector<1024xf32>
    %21 = vector.shape_cast %20 : vector<1024xf32> to vector<1x1024xf32>
    %cst_15 = arith.constant 8.000000e+00 : f32
    %22 = vector.broadcast %cst_15 : f32 to vector<1x1024xf32>
    %23 = arith.divf %21, %22 : vector<1x1024xf32>
    %cst_16 = arith.constant 9.99999974E-6 : f32
    %24 = vector.broadcast %cst_16 : f32 to vector<1x1024xf32>
    %25 = arith.addf %23, %24 : vector<1x1024xf32>
    %26 = math.rsqrt %25 : vector<1x1024xf32>
    %27 = vector.broadcast %26 : vector<1x1024xf32> to vector<8x1024xf32>
    %28 = arith.mulf %18, %27 : vector<8x1024xf32>
    %c0_17 = arith.constant 0 : index
    %c0_18 = arith.constant 0 : index
    %c0_19 = arith.constant 0 : index
    %29 = vector.load %arg5[%c0_17, %c0_18, %c0_19] : memref<1x1x1024xf32, #tpu.memory_space<vmem>>, vector<1x1x1024xf32>
    %30 = vector.shape_cast %29 : vector<1x1x1024xf32> to vector<1x1024xf32>
    %31 = vector.broadcast %30 : vector<1x1024xf32> to vector<8x1024xf32>
    %32 = arith.mulf %28, %31 : vector<8x1024xf32>
    %c0_20 = arith.constant 0 : index
    %c0_21 = arith.constant 0 : index
    %c0_22 = arith.constant 0 : index
    %33 = vector.load %arg6[%c0_20, %c0_21, %c0_22] : memref<1x1x1024xf32, #tpu.memory_space<vmem>>, vector<1x1x1024xf32>
    %34 = vector.shape_cast %33 : vector<1x1x1024xf32> to vector<1x1024xf32>
    %35 = vector.broadcast %34 : vector<1x1024xf32> to vector<8x1024xf32>
    %36 = arith.addf %32, %35 : vector<8x1024xf32>
    %cst_23 = arith.constant 0.000000e+00 : f32
    %37 = vector.broadcast %cst_23 : f32 to vector<8x1024xf32>
    %38 = arith.maximumf %36, %37 : vector<8x1024xf32>
    %39 = arith.truncf %38 : vector<8x1024xf32> to vector<8x1024xbf16>
    %c0_24 = arith.constant 0 : index
    %c0_25 = arith.constant 0 : index
    %c0_26 = arith.constant 0 : index
    %40 = vector.load %arg7[%c0_24, %c0_25, %c0_26] : memref<1x1024x256xbf16, #tpu.memory_space<vmem>>, vector<1x1024x256xbf16>
    %41 = vector.shape_cast %40 : vector<1x1024x256xbf16> to vector<1024x256xbf16>
    %cst_27 = arith.constant dense<0.000000e+00> : vector<8x256xf32>
    %42 = tpu.matmul %39, %41, %cst_27 {dimension_numbers = #tpu.dot_dimension_numbers<[1], [0], [0], [1], [0, 0, 1, 1], [], []>} : vector<8x1024xbf16>, vector<1024x256xbf16>, vector<8x256xf32> -> vector<8x256xf32>
    %c0_28 = arith.constant 0 : index
    %c0_29 = arith.constant 0 : index
    %c0_30 = arith.constant 0 : index
    %43 = vector.load %arg8[%c0_28, %c0_29, %c0_30] : memref<1x1x256xf32, #tpu.memory_space<vmem>>, vector<1x1x256xf32>
    %44 = vector.shape_cast %43 : vector<1x1x256xf32> to vector<1x256xf32>
    %45 = vector.broadcast %44 : vector<1x256xf32> to vector<8x256xf32>
    %46 = arith.addf %42, %45 : vector<8x256xf32>
    %c0_31 = arith.constant 0 : index
    %c0_32 = arith.constant 0 : index
    %c0_33 = arith.constant 0 : index
    %47 = vector.load %arg9[%c0_31, %c0_32, %c0_33] : memref<1x8x256xf32, #tpu.memory_space<vmem>>, vector<1x8x256xf32>
    %48 = vector.shape_cast %47 : vector<1x8x256xf32> to vector<8x256xf32>
    %49 = vector.shape_cast %46 : vector<8x256xf32> to vector<1x8x256xf32>
    tpu.vector_store %arg9[%c0_31, %c0_32, %c0_33], %49 {strides = array<i32>} : memref<1x8x256xf32, #tpu.memory_space<vmem>>, vector<1x8x256xf32>,
    return
  }
  func.func @transform_0(%arg0: i32) -> (i32, i32) {
    %c0_i32 = arith.constant 0 : i32
    %c0_i32_0 = arith.constant 0 : i32
    %c0_i32_1 = arith.constant 0 : i32
    return %c0_i32, %c0_i32_0 : i32, i32
  }
  func.func @transform_1(%arg0: i32) -> (i32, i32, i32) {
    %c0_i32 = arith.constant 0 : i32
    %c0_i32_0 = arith.constant 0 : i32
    %c0_i32_1 = arith.constant 0 : i32
    return %arg0, %c0_i32, %c0_i32_0 : i32, i32, i32
  }
  func.func @transform_3(%arg0: i32) -> (i32, i32, i32) {
    %c0_i32 = arith.constant 0 : i32
    %c0_i32_0 = arith.constant 0 : i32
    %c0_i32_1 = arith.constant 0 : i32
    return %arg0, %c0_i32, %c0_i32_0 : i32, i32, i32
  }
  func.func @transform_4(%arg0: i32) -> (i32, i32, i32) {
    %c0_i32 = arith.constant 0 : i32
    %c0_i32_0 = arith.constant 0 : i32
    %c0_i32_1 = arith.constant 0 : i32
    return %arg0, %c0_i32, %c0_i32_0 : i32, i32, i32
  }
  func.func @transform_5(%arg0: i32) -> (i32, i32, i32) {
    %c0_i32 = arith.constant 0 : i32
    %c0_i32_0 = arith.constant 0 : i32
    %c0_i32_1 = arith.constant 0 : i32
    return %arg0, %c0_i32, %c0_i32_0 : i32, i32, i32
  }
  func.func @transform_6(%arg0: i32) -> (i32, i32, i32) {
    %c0_i32 = arith.constant 0 : i32
    %c0_i32_0 = arith.constant 0 : i32
    %c0_i32_1 = arith.constant 0 : i32
    return %arg0, %c0_i32, %c0_i32_0 : i32, i32, i32
  }
  func.func @transform_7(%arg0: i32) -> (i32, i32, i32) {
    %c0_i32 = arith.constant 0 : i32
    %c0_i32_0 = arith.constant 0 : i32
    %c0_i32_1 = arith.constant 0 : i32
    return %arg0, %c0_i32, %c0_i32_0 : i32, i32, i32
  }
  func.func @transform_8(%arg0: i32) -> (i32, i32, i32) {
    %c0_i32 = arith.constant 0 : i32
    %c0_i32_0 = arith.constant 0 : i32
    %c0_i32_1 = arith.constant 0 : i32
    return %arg0, %c0_i32, %c0_i32_0 : i32, i32, i32
  }
}

</mosaic_0001>

<bundles_post_ra>
// kernel: basic_linear_forward.1
= control target key start
LH: loop header
LB: loop body
LE: loop exit
PB: predicated region body
PF: predicated region fallthrough
CT: control target
= control target key end

     0   :  { %s8247_s0 = inlined_call_operand.vmem [shape: bf16[8,1024], index: 0, kind: input, shape index: {}]   ;;  %s8248_s1 = inlined_call_operand.vmem [shape: bf16[2,8,768], index: 1, kind: input, shape index: {}]   ;;  %s8249_s2 = inlined_call_operand.hbm [shape: bf16[1024,1024], index: 2, kind: input, shape index: {}]   ;;  %s8250_s3 = inlined_call_operand.hbm [shape: bf16[2,768,1024], index: 3, kind: input, shape index: {}]   ;;  %s8251_s4 = inlined_call_operand.hbm [shape: f32[2,1,1024], index: 4, kind: input, shape index: {}]   ;;  %s8252_s5 = inlined_call_operand.hbm [shape: f32[2,1,1024], index: 5, kind: input, shape index: {}]   ;;  %s8253_s6 = inlined_call_operand.hbm [shape: bf16[2,1024,256], index: 6, kind: input, shape index: {}]   ;;  %s8254_s7 = inlined_call_operand.hbm [shape: f32[2,1,256], index: 7, kind: input, shape index: {}]   ;;  %s8255_s8 = inlined_call_operand.vmem [shape: f32[2,8,256], index: 8, kind: output, shape index: {}]  }
   0x1   :  { %8265 = sst [smem:[#allocation23_spill]] %s8250_s3 }
   0x2   :  { %8266 = sst [smem:[#allocation24_spill]] %s8251_s4 }
   0x3   :  { %8267 = sst [smem:[#allocation25_spill]] %s8253_s6 }
   0x4   :  { %13 = vsyncpa [#allocation6], 0 }
   0x5   :  { %15 = vsyncpa [#allocation6 + $0x1], 0 }
   0x6   :  { %16 = vsyncpa [#allocation8], 0 }
   0x7   :  { %18 = vsyncpa [#allocation8 + $0x1], 0 }
   0x8   :  { %19 = vsyncpa [#allocation11], 0 }
   0x9   :  { %21 = vsyncpa [#allocation11 + $0x1], 0  ;;  %s7138_s27 = smov 0   ;;  %s7140_s28 = smov 0  }
   0xa   :  { %s7142_s29 = smov 0   ;;  %s7144_s30 = smov 0  }
   0xb LB: > { %8268 = sst [smem:[#allocation20_spill]] %s7068_s29  ;;  %s7157_s9 = sadd.s32 4294967295, %s7072_s30   ;;  %s7072_s30 = sphi %s7144_s30, %s8295_s30   ;;  %s7068_s29 = sphi %s7142_s29, %s8297_s29   ;;  %s7064_s28 = sphi %s7140_s28, %s8299_s28   ;;  %s7060_s27 = sphi %s7138_s27, %s8298_s27  }
   0xc   : > { %s7160_s10 = sadd.s32 1, %s7072_s30   ;;  %s81_s12 = sadd.s32 1, %s7068_s29 }
   0xd   : > { %8269 = sst [smem:[#allocation21_spill]] %s7160_s10  ;;  %s78_s11 = ssub.s32 %s7072_s30, %s7160_s10 }
   0xe   : > { %p79_p0 = scmp.eq.s32.totalorder %s78_s11, 0  ;;  %p88_p1 = scmp.ne.s32.totalorder %s7068_s29, %s7064_s28 }
   0xf   : > { %p89_p2 = scmp.eq.s32.totalorder %s7072_s30, 0  ;;  %p94_p3 = scmp.ne.s32.totalorder %s7064_s28, %s7060_s27 }
  0x10   : > { %s7170_s13 = scalar_select %p79_p0, %s7068_s29, %s81_s12  }
  0x11   : > { %p90_p4 = por %p89_p2, %p88_p1  ;;  %p8257_p5 = scmp.eq.s32.totalorder %s7157_s9, 0 }
  0x12   : > { %8270 = sst [smem:[#allocation22_spill]] %s7170_s13  ;;  %p6608_p6 = scmp.lt.s32.totalorder %s7072_s30, 2 }
  0x13   : > { %p7176_p7 = por %p8257_p5, %p94_p3  ;;  %s7181_s15 = sand.u32 1, %s7068_s29  }
  0x14   : > { %p7183_p8 = pnand %p6608_p6, %p90_p4  ;;  %s8259_s17 = sand.u32 1, %s7072_s30  }
  0x15   : > { %s8271_s14 = scalar_select %p7176_p7, 1, 0 }
  0x16   : > { %s8272_s16 = scalar_select %p7183_p8, 1, 0 }
  0x17   : > { %s8256_s18 = sshll.u32 %s7181_s15, 3  ;;  %s6517_s19 = sshll.u32 %s7072_s30, 7 }
  0x18   : > { %s284_s20 = scalar_lea.vmem [#allocation7], %s8256_s18  ;;  %s8273_s4 = sld [smem:[#allocation24_spill]] }
  0x19   : > { %s292_s21 = sshll.u32 %s284_s20, 4  ;;  %s7203_s25 = scalar_lea.sflag [#allocation8], %s8259_s17  ;;  %s7199_s21 = int_to_ptr.vmem [resolvable:$true] %s292_s21 }
  0x1a   : > { %p7209_p10 = pneg %p7183_p8 }
  0x1e   : > { %s7197_s24 = scalar_lea.hbm %s8273_s4, %s6517_s19  ;;  %s6883_s20 = scalar_lea.hbm %s8273_s4, 256 }
  0x1f   : > { %s6878_s26 = scalar_lea.hbm %s7197_s24, 128  ;;  %p6884_p13 = scmp.lt.u32.totalorder %s7197_s24, %s8273_s4 }
  0x20   : > { %p6879_p9 = scmp.ne.s32.totalorder %s7197_s24, %s6878_s26  ;;  %p6885_p0 = scmp.lt.u32.totalorder %s6883_s20, %s6878_s26 }
  0x21   : > { %p6887_p2 = scmp.lt.u32.totalorder %s6878_s26, %s7197_s24 }
  0x22   : > { %p6881_p11 = pnand %p7209_p10, %p6879_p9  ;;  %p6886_p1 = por %p6885_p0, %p6884_p13 }
  0x24   : > { %p6882_p12 = pneg %p6881_p11  ;;  %p6888_p3 = por %p6887_p2, %p6886_p1 }
  0x26   : > { %p6889_p4 = pnand %p6888_p3, %p6882_p12 }
  0x28   : > { %6892 = shalt.err (!%p6889_p4)
}
  0x29   : > { %s6893_s18 = scalar_lea.vmem %s7199_s21, 128  ;;  %s7074_s11 = smov [#allocation7]  }
  0x2a   : > { %p6894_p6 = scmp.ne.s32.totalorder %s7199_s21, %s6893_s18  ;;  %s6898_s12 = sshll.u32 %s7074_s11, 4  ;;  %s6899_s12 = int_to_ptr.vmem [resolvable:$false] %s6898_s12 }
  0x2b   : > { %s6900_s22 = scalar_lea.vmem %s6899_s12, 256  ;;  %p6901_p5 = scmp.lt.s32.totalorder %s7199_s21, %s6899_s12 }
  0x2c   : > { %p6896_p9 = pnand %p6894_p6, %p7209_p10  ;;  %p6902_p7 = scmp.lt.s32.totalorder %s6900_s22, %s6893_s18 }
  0x2e   : > { %p6897_p11 = pneg %p6896_p9  ;;  %p6903_p13 = por %p6902_p7, %p6901_p5 }
  0x30   : > { %p6904_p0 = pnand %p6903_p13, %p6897_p11 }
  0x32   : > { %6907 = shalt.err (!%p6904_p0)
}
  0x33   : > { %6598 = dma.hbm_to_vmem [thread:$0]  (!%p7183_p8), %s7197_s24, 128, %s7199_s21, %s7203_s25  }
  0x34   : > { %s7238_s18 = scalar_lea.hbm %s8252_s5, %s6517_s19  ;;  %p5976_p5 = scmp.ge.s32.totalorder %s7072_s30, 1 }
  0x35   : > { %p356_p7 = scmp.lt.s32.totalorder %s7072_s30, 3  ;;  %s5970_s23 = sshll.u32 %s7181_s15, 10 }
  0x36   : > { %s6519_s11 = sshll.u32 %s7072_s30, 14  ;;  %s8276_s6 = sld [smem:[#allocation25_spill]] }
  0x37   : > { %p7244_p12 = pnand %p5976_p5, %p356_p7  ;;  %s322_s21 = scalar_lea.vmem [#allocation10], %s5970_s23 }
  0x38   : > { %s329_s19 = sshll.u32 %s322_s21, 4  ;;  %s8277_s24 = sand.u32 1, %s7072_s30   ;;  %s7253_s19 = int_to_ptr.vmem [resolvable:$true] %s329_s19 }
  0x39   : > { %s8275_s12 = scalar_select %p7244_p12, 1, 0 }
  0x3a   : > { %s7257_s26 = scalar_lea.sflag [#allocation11], %s8277_s24 }
  0x3c   : > { %s7251_s4 = scalar_lea.hbm %s8276_s6, %s6519_s11  ;;  %s6913_s11 = scalar_lea.hbm %s8276_s6, 32768 }
  0x3d   : > { %s6908_s20 = scalar_lea.hbm %s7251_s4, 16384  ;;  %p6914_p4 = scmp.lt.u32.totalorder %s7251_s4, %s8276_s6 }
  0x3e   : > { %p6909_p1 = scmp.ne.s32.totalorder %s7251_s4, %s6908_s20  ;;  %p6915_p6 = scmp.lt.u32.totalorder %s6913_s11, %s6908_s20 }
  0x3f   : > { %p6917_p11 = scmp.lt.u32.totalorder %s6908_s20, %s7251_s4 }
  0x40   : > { %p6911_p2 = pnand %p6909_p1, %p7209_p10  ;;  %p6916_p9 = por %p6915_p6, %p6914_p4 }
  0x42   : > { %p6912_p3 = pneg %p6911_p2  ;;  %p6918_p13 = por %p6917_p11, %p6916_p9 }
  0x44   : > { %p6919_p0 = pnand %p6918_p13, %p6912_p3 }
  0x46   : > { %6922 = shalt.err (!%p6919_p0)
}
  0x47   : > { %s6923_s23 = scalar_lea.vmem %s7253_s19, 16384  ;;  %s7075_s13 = smov [#allocation10]  }
  0x48   : > { %p6924_p5 = scmp.ne.s32.totalorder %s7253_s19, %s6923_s23  ;;  %s6928_s21 = sshll.u32 %s7075_s13, 4  ;;  %s6929_s21 = int_to_ptr.vmem [resolvable:$false] %s6928_s21 }
  0x49   : > { %s6930_s29 = scalar_lea.vmem %s6929_s21, 32768  ;;  %p6931_p2 = scmp.lt.s32.totalorder %s7253_s19, %s6929_s21 }
  0x4a   : > { %p6926_p7 = pnand %p6924_p5, %p7209_p10  ;;  %p6932_p12 = scmp.lt.s32.totalorder %s6930_s29, %s6923_s23 }
  0x4c   : > { %p6927_p1 = pneg %p6926_p7  ;;  %p6933_p4 = por %p6932_p12, %p6931_p2 }
  0x4e   : > { %p6934_p6 = pnand %p6933_p4, %p6927_p1 }
  0x50   : > { %6937 = shalt.err (!%p6934_p6)
}
  0x51   : > { %s7076_s24 = smov 128   ;;  %s7077_s20 = smov 8  }
  0x52   : > { %6604 = dma.hbm_to_vmem [thread:$0]  (!%p7183_p8), %s7251_s4, 16384, %s7253_s19, %s7257_s26, %s7076_s24, %s7076_s24, %s7077_s20  }
  0x53   : > { %s6566_s17 = smul.u32 3072, %s7181_s15  ;;  %s8278_s3 = sld [smem:[#allocation23_spill]] }
  0x54   : > { %s6567_s11 = smul.u32 49152, %s7072_s30  ;;  %s8279_s6 = sshll.u32 %s7181_s15, 3 }
  0x55   : > { %s263_s21 = scalar_lea.vmem [#allocation5], %s6566_s17  ;;  %s7292_s10 = scalar_lea.vmem [#allocation9], %s8279_s6 }
  0x56   : > { %s270_s29 = sshll.u32 %s263_s21, 4  ;;  %s311_s4 = sshll.u32 %s7292_s10, 4  ;;  %s7288_s29 = int_to_ptr.vmem [resolvable:$true] %s270_s29  ;;  %s312_s4 = int_to_ptr.vmem [resolvable:$true] %s311_s4 }
  0x57   : > { %s260_s19 = scalar_lea.sflag [#allocation6], %s7181_s15 }
  0x59   : > { %s7286_s13 = scalar_lea.hbm %s8278_s3, %s6567_s11  ;;  %s6943_s22 = scalar_lea.hbm %s8278_s3, 98304 }
  0x5a   : > { %s6938_s24 = scalar_lea.hbm %s7286_s13, 49152  ;;  %p6944_p11 = scmp.lt.u32.totalorder %s7286_s13, %s8278_s3 }
  0x5b   : > { %p6939_p12 = scmp.ne.s32.totalorder %s7286_s13, %s6938_s24  ;;  %p6945_p13 = scmp.lt.u32.totalorder %s6943_s22, %s6938_s24 }
  0x5c   : > { %p6947_p5 = scmp.lt.u32.totalorder %s6938_s24, %s7286_s13 }
  0x5d   : > { %p6941_p3 = pnand %p6939_p12, %p7209_p10  ;;  %p6946_p0 = por %p6945_p13, %p6944_p11 }
  0x5f   : > { %p6942_p9 = pneg %p6941_p3  ;;  %p6948_p7 = por %p6947_p5, %p6946_p0 }
  0x61   : > { %p6949_p1 = pnand %p6948_p7, %p6942_p9 }
  0x63   : > { %6952 = shalt.err (!%p6949_p1)
}
  0x64   : > { %s6953_s6 = scalar_lea.vmem %s7288_s29, 49152  ;;  %s7078_s21 = smov [#allocation5]  }
  0x65   : > { %p6954_p2 = scmp.ne.s32.totalorder %s7288_s29, %s6953_s6  ;;  %s6958_s20 = sshll.u32 %s7078_s21, 4  ;;  %s6959_s20 = int_to_ptr.vmem [resolvable:$false] %s6958_s20 }
  0x66   : > { %s6960_s11 = scalar_lea.vmem %s6959_s20, 98304  ;;  %p6961_p12 = scmp.lt.s32.totalorder %s7288_s29, %s6959_s20 }
  0x67   : > { %p6956_p4 = pnand %p6954_p2, %p7209_p10  ;;  %p6962_p3 = scmp.lt.s32.totalorder %s6960_s11, %s6953_s6 }
  0x69   : > { %p6957_p6 = pneg %p6956_p4  ;;  %p6963_p11 = por %p6962_p3, %p6961_p12 }
  0x6b   : > { %p6964_p13 = pnand %p6963_p11, %p6957_p6 }
  0x6d   : > { %6967 = shalt.err (!%p6964_p13)
}
  0x6e   : > { %s7079_s24 = smov 512   ;;  %s7080_s22 = smov 32  }
  0x6f   : > { %6595 = dma.hbm_to_vmem [thread:$0]  (!%p7183_p8), %s7286_s13, 49152, %s7288_s29, %s260_s19, %s7079_s24, %s7079_s24, %s7080_s22  }
  0x70   : > { %s5973_s23 = sshll.u32 %s7181_s15, 1  ;;  %s6968_s17 = scalar_lea.hbm %s7238_s18, 128 }
  0x71   : > { %p6969_p9 = scmp.ne.s32.totalorder %s7238_s18, %s6968_s17  ;;  %s6973_s20 = scalar_lea.hbm %s8252_s5, 256 }
  0x72   : > { %p6974_p7 = scmp.lt.u32.totalorder %s7238_s18, %s8252_s5  ;;  %p6975_p1 = scmp.lt.u32.totalorder %s6973_s20, %s6968_s17 }
  0x73   : > { %p6971_p0 = pnand %p6969_p9, %p7209_p10  ;;  %p6977_p4 = scmp.lt.u32.totalorder %s6968_s17, %s7238_s18 }
  0x74   : > { %p6976_p2 = por %p6975_p1, %p6974_p7 }
  0x75   : > { %p6972_p5 = pneg %p6971_p0 }
  0x76   : > { %p6978_p6 = por %p6977_p4, %p6976_p2 }
  0x78   : > { %p6979_p12 = pnand %p6978_p6, %p6972_p5 }
  0x7a   : > { %6982 = shalt.err (!%p6979_p12)
}
  0x7b   : > { %s6983_s10 = scalar_lea.vmem %s312_s4, 128  ;;  %s7081_s13 = smov [#allocation9]  }
  0x7c   : > { %p6984_p3 = scmp.ne.s32.totalorder %s312_s4, %s6983_s10  ;;  %s6988_s29 = sshll.u32 %s7081_s13, 4  ;;  %s6989_s29 = int_to_ptr.vmem [resolvable:$false] %s6988_s29 }
  0x7d   : > { %s6990_s19 = scalar_lea.vmem %s6989_s29, 256  ;;  %p6991_p9 = scmp.lt.s32.totalorder %s312_s4, %s6989_s29 }
  0x7e   : > { %p6986_p11 = pnand %p6984_p3, %p7209_p10  ;;  %p6992_p0 = scmp.lt.s32.totalorder %s6990_s19, %s6983_s10 }
  0x80   : > { %p6987_p13 = pneg %p6986_p11  ;;  %p6993_p8 = por %p6992_p0, %p6991_p9 }
  0x82   : > { %p6994_p1 = pnand %p6993_p8, %p6987_p13 }
  0x84   : > { %6997 = shalt.err (!%p6994_p1)
}
  0x85   : > { %p8280_p7 = scmp.ne.s32.totalorder %s8272_s16, 0  ;;  %s6520_s3 = sshll.u32 %s7072_s30, 5 }
  0x86   : > { %s7344_s17 = scalar_lea.hbm %s8254_s7, %s6520_s3  ;;  %s343_s6 = scalar_lea.vmem [#allocation12], %s5973_s23 }
  0x87   : > { %6601 = dma.hbm_to_vmem [thread:$0]  (!%p8280_p7), %s7238_s18, 128, %s312_s4, %s7203_s25  }
  0x88   : > { %s351_s21 = sshll.u32 %s343_s6, 4  ;;  %s6998_s20 = scalar_lea.hbm %s7344_s17, 32  ;;  %s352_s21 = int_to_ptr.vmem [resolvable:$true] %s351_s21 }
  0x89   : > { %p6999_p8 = scmp.ne.s32.totalorder %s7344_s17, %s6998_s20  ;;  %s7003_s18 = scalar_lea.hbm %s8254_s7, 64 }
  0x8a   : > { %p7004_p4 = scmp.lt.u32.totalorder %s7344_s17, %s8254_s7  ;;  %p7005_p6 = scmp.lt.u32.totalorder %s7003_s18, %s6998_s20 }
  0x8b   : > { %p7001_p5 = pnand %p6999_p8, %p7209_p10  ;;  %p7007_p3 = scmp.lt.u32.totalorder %s6998_s20, %s7344_s17 }
  0x8c   : > { %p7006_p12 = por %p7005_p6, %p7004_p4 }
  0x8d   : > { %p7002_p2 = pneg %p7001_p5 }
  0x8e   : > { %p7008_p11 = por %p7007_p3, %p7006_p12 }
  0x90   : > { %p7009_p13 = pnand %p7008_p11, %p7002_p2 }
  0x92   : > { %7012 = shalt.err (!%p7009_p13)
}
  0x93   : > { %s7013_s15 = scalar_lea.vmem %s352_s21, 32  ;;  %s7082_s23 = smov [#allocation12]  }
  0x94   : > { %p7014_p9 = scmp.ne.s32.totalorder %s352_s21, %s7013_s15  ;;  %s7018_s10 = sshll.u32 %s7082_s23, 4  ;;  %s7019_s10 = int_to_ptr.vmem [resolvable:$false] %s7018_s10 }
  0x95   : > { %s7020_s13 = scalar_lea.vmem %s7019_s10, 64  ;;  %p7021_p8 = scmp.lt.s32.totalorder %s352_s21, %s7019_s10 }
  0x96   : > { %p7016_p0 = pnand %p7014_p9, %p7209_p10  ;;  %p7022_p5 = scmp.lt.s32.totalorder %s7020_s13, %s7013_s15 }
  0x98   : > { %p7017_p1 = pneg %p7016_p0  ;;  %p7023_p7 = por %p7022_p5, %p7021_p8 }
  0x9a   : > { %p7024_p4 = pnand %p7023_p7, %p7017_p1 }
  0x9c   : > { %7027 = shalt.err (!%p7024_p4)
}
  0x9d   : > { %p8281_p6 = scmp.ne.s32.totalorder %s8272_s16, 0  ;;  %p8282_p2 = scmp.ne.s32.totalorder %s8275_s12, 0 }
  0x9e   : > { %s362_s27 = sand.u32 (!%p8282_p2), 1, %s7064_s28   ;;  %p8283_p10 = scmp.ne.s32.totalorder (!%p8282_p2), %s8271_s14, 0 }
  0x9f   : > { %6607 = dma.hbm_to_vmem [thread:$0]  (!%p8281_p6), %s7344_s17, 32, %s352_s21, %s7257_s26  }
  0xa0   : > { %360 = sbr.rel (%p8282_p2) target bundleno = 1908 (0x774), region = 48  ;;  %s363_s19 = scalar_lea.sflag (!%p8282_p2), [#allocation6], %s362_s27 }
  0xa1   : > { %s6568_s29 = smul.u32 (!%p8282_p2), 3072, %s362_s27 }
  0xa3   : > { %s7369_s3 = scalar_lea.vmem (!%p8282_p2), [#allocation5], %s6568_s29 }
  0xa7   : > { %7045 = dma.done.wait (%p8283_p10), %s363_s19, 49152  }
  0xa8   : > { %7047 = vsyncadd (%p8283_p10), %s363_s19, 4294918144  ;;  %s371_s16 = sand.u32 1, %s7157_s9   ;;  %s5977_s24 = sshll.u32 %s362_s27, 3 }
  0xa9   : > { %s372_s26 = scalar_lea.sflag [#allocation8], %s371_s16  ;;  %s7376_s22 = scalar_lea.vmem [#allocation7], %s5977_s24 }
  0xaa   : > { %7049 = dma.done.wait (%p8283_p10), %s372_s26, 256  }
  0xab   : > { %7051 = vsyncadd (%p8283_p10), %s372_s26, 4294967040  ;;  %s5979_s12 = sshll.u32 %s362_s27, 10  ;;  %s7382_s17 = scalar_lea.vmem [#allocation9], %s5977_s24 }
  0xac   : > { %s390_s6 = scalar_lea.sflag [#allocation11], %s371_s16  ;;  %s7384_s21 = scalar_lea.vmem [#allocation10], %s5979_s12 }
  0xad   : > { %7053 = dma.done.wait (%p8283_p10), %s390_s6, 16416  }
  0xae   : > { %7055 = vsyncadd (%p8283_p10), %s390_s6, 4294950880  ;;  %s5980_s20 = sshll.u32 %s362_s27, 1  ;;  %p458_p7 = scmp.lt.s32.totalorder %s7157_s9, 1 }
  0xaf   : > { %p5984_p12 = scmp.ne.s32.totalorder %s7157_s9, 0  ;;  %s7403_s14 = scalar_lea.vmem [#allocation12], %s5980_s20 }
  0xb0   : > { %s459_s25 = scalar_select %p458_p7, %s7157_s9, 1 }
  0xb2   : > { %s6569_s30 = smul.u32 24, %s459_s25  ;;  %s6521_s18 = sshll.u32 %s459_s25, 4 }
  0xb3   : > { %s7396_s15 = scalar_lea.vmem %s8255_s8, %s6521_s18 }
  0xb4   : > { %s7401_s13 = scalar_lea.vmem %s8248_s1, %s6569_s30 }
  0xb5   : > { %p8284_p3 = scmp.eq.s32.totalorder %s7157_s9, 0  ;;  %s7083_s19 = smov [#allocation3]  }
  0xb6   : > { %s484_s16 = sshll.u32 %s7083_s19, 4  ;;  %s7084_s24 = smov 1024   ;;  %s485_s16 = int_to_ptr.vmem [resolvable:$true] %s484_s16 }
  0xb7   : > { %s6581_s27 = scalar_select %p8284_p3, [#allocation0], [#allocation15] }
  0xb8   : > { %p8285_p11 = pmov %p8284_p3  ;;  %p8286_p13 = pmov %p8284_p3 }
  0xb9   : > { %s476_s29 = sld [smem:[%s6581_s27]]   ;;  %s7085_s26 = smov 8  }
  0xba   : > { %6582 = sst [smem:[#allocation14]] (%p8285_p11), %s7084_s24  ;;  %p8287_p9 = pmov %p8284_p3 }
  0xbb   : > { %6583 = sst [smem:[#allocation14 + $0x1]] (%p8286_p13), %s7084_s24  ;;  %s7086_s12 = smov 64  }
  0xbc   : > { %6584 = sst [smem:[#allocation14 + $0x2]] (%p8287_p9), %s7085_s26  ;;  %p8288_p0 = pmov %p8284_p3 }
  0xbd   : > { %s7087_s6 = smov 128   ;;  %s7088_s25 = smov 2  }
  0xbe   : > { %6585 = sst [smem:[#allocation14 + $0x3]] (%p8288_p0), %s7086_s12  ;;  %p8289_p1 = pmov %p8288_p0 }
  0xbf   : > { %s5985_s20 = sshll.u32 %s476_s29, 26  ;;  %p8290_p8 = pmov %p8288_p0 }
  0xc0   : > { %6586 = sst [smem:[#allocation14 + $0x4]] (%p8289_p1), %s7087_s6  ;;  %s5986_s30 = sadd.s32 134217728, %s5985_s20 }
  0xc1   : > { %6587 = sst [smem:[#allocation14 + $0x5]] (%p8290_p8), %s7088_s25  ;;  %s7089_s18 = smov 512  }
  0xc2   : > { %p8291_p5 = pmov %p8288_p0  ;;  %p8292_p4 = pmov %p8288_p0 }
  0xc3   : > { %s7090_s4 = smov 4   ;;  %p8293_p6 = pmov %p8288_p0 }
  0xc4   : > { %6588 = sst [smem:[#allocation14 + $0x6]] (%p8291_p5), %s7089_s18  ;;  %s7091_s11 = smov [#allocation4]  }
  0xc5   : > { %6589 = sst [smem:[#allocation14 + $0x7]] (%p8292_p4), %s7086_s12  ;;  %s7092_s23 = smov [#allocation13]  }
  0xc6   : > { %6590 = sst [smem:[#allocation14 + $0x8]] (%p8293_p6), %s7090_s4  ;;  %p8294_p2 = pmov %p8288_p0 }
  0xc8   : > { %6591 = dma.general (%p8294_p2), %s8249_s2, 65536, %s485_s16, %s7091_s11, %s7092_s23, [#allocation14], %s5986_s30, 0  }
  0xc9   : > { %v510_v0 = vld [vmem:[%s7369_s3] sm:$0xff]  ;;  %v511_v2 = vld [vmem:[%s7369_s3 + $0x8] sm:$0xff] }
  0xca   : > { %v514_v1 = vld [vmem:[%s7369_s3 + $0x20] sm:$0xff]  ;;  %v515_v4 = vld [vmem:[%s7369_s3 + $0x28] sm:$0xff] }
  0xcb   : > { %v5994_v3 = vcombine.high %v510_v0, %v514_v1  ;;  %v5993_v5 = vcombine.low %v510_v0, %v514_v1  ;;  %v518_v6 = vld [vmem:[%s7369_s3 + $0x40] sm:$0xff]  ;;  %v5996_v8 = vcombine.high %v511_v2, %v515_v4  ;;  %v5995_v9 = vcombine.low %v511_v2, %v515_v4  ;;  %v519_v11 = vld [vmem:[%s7369_s3 + $0x48] sm:$0xff] }
  0xcc   : > { %v522_v7 = vld [vmem:[%s7369_s3 + $0x60] sm:$0xff]  ;;  %v523_v12 = vld [vmem:[%s7369_s3 + $0x68] sm:$0xff] }
  0xcd   : > { %v6002_v10 = vcombine.high %v518_v6, %v522_v7  ;;  %v526_v13 = vld [vmem:[%s7369_s3 + $0x80] sm:$0xff]  ;;  %2835 = vmatprep.subr.bf16.mxu0 %v5994_v3  ;;  %v6004_v14 = vcombine.high %v519_v11, %v523_v12  ;;  %v527_v16 = vld [vmem:[%s7369_s3 + $0x88] sm:$0xff]  ;;  %2958 = vmatprep.subr.bf16.mxu1 %v5996_v8  ;;  %v6001_v18 = vcombine.low %v518_v6, %v522_v7 }
  0xce   : > { %v530_v15 = vld [vmem:[%s7369_s3 + $0xa0] sm:$0xff]  ;;  %v531_v17 = vld [vmem:[%s7369_s3 + $0xa8] sm:$0xff]  ;;  %2836 = vmatpush1.bf16.msra.mxu0 %v5993_v5  ;;  %2959 = vmatpush1.bf16.msra.mxu1 %v5995_v9  ;;  %v6003_v19 = vcombine.low %v519_v11, %v523_v12 }
  0xcf   : > { %2837 = vmatprep.subr.bf16.mxu0 %v6002_v10  ;;  %v6010_v20 = vcombine.high %v526_v13, %v530_v15  ;;  %2960 = vmatprep.subr.bf16.mxu1 %v6004_v14  ;;  %v6012_v21 = vcombine.high %v527_v16, %v531_v17  ;;  %v534_v22 = vld [vmem:[%s7369_s3 + $0xc0] sm:$0xff]  ;;  %v535_v24 = vld [vmem:[%s7369_s3 + $0xc8] sm:$0xff]  ;;  %v6009_v26 = vcombine.low %v526_v13, %v530_v15 }
  0xd0   : > { %v538_v23 = vld [vmem:[%s7369_s3 + $0xe0] sm:$0xff]  ;;  %v539_v25 = vld [vmem:[%s7369_s3 + $0xe8] sm:$0xff]  ;;  %v6011_v27 = vcombine.low %v527_v16, %v531_v17 }
  0xd1   : > { %v6018_v28 = vcombine.high %v534_v22, %v538_v23  ;;  %v6020_v29 = vcombine.high %v535_v24, %v539_v25  ;;  %v542_v30 = vld [vmem:[%s7369_s3 + $0x100] sm:$0xff]  ;;  %v543_v32 = vld [vmem:[%s7369_s3 + $0x108] sm:$0xff]  ;;  %v6017_v34 = vcombine.low %v534_v22, %v538_v23  ;;  %v6019_v35 = vcombine.low %v535_v24, %v539_v25 }
  0xd2   : > { %2838 = vmatpush1.bf16.msra.mxu0 %v6001_v18  ;;  %2961 = vmatpush1.bf16.msra.mxu1 %v6003_v19  ;;  %v546_v31 = vld [vmem:[%s7369_s3 + $0x120] sm:$0xff]  ;;  %v547_v33 = vld [vmem:[%s7369_s3 + $0x128] sm:$0xff] }
  0xd3   : > { %2839 = vmatprep.subr.bf16.mxu0 %v6010_v20  ;;  %2962 = vmatprep.subr.bf16.mxu1 %v6012_v21  ;;  %v6026_v36 = vcombine.high %v542_v30, %v546_v31  ;;  %v6028_v37 = vcombine.high %v543_v32, %v547_v33  ;;  %v550_v38 = vld [vmem:[%s7369_s3 + $0x140] sm:$0xff]  ;;  %v551_v40 = vld [vmem:[%s7369_s3 + $0x148] sm:$0xff]  ;;  %v6025_v42 = vcombine.low %v542_v30, %v546_v31 }
  0xd4   : > { %v554_v39 = vld [vmem:[%s7369_s3 + $0x160] sm:$0xff]  ;;  %v555_v41 = vld [vmem:[%s7369_s3 + $0x168] sm:$0xff]  ;;  %v6027_v43 = vcombine.low %v543_v32, %v547_v33 }
  0xd5   : > { %v6034_v44 = vcombine.high %v550_v38, %v554_v39  ;;  %v6036_v45 = vcombine.high %v551_v40, %v555_v41  ;;  %v558_v46 = vld [vmem:[%s7369_s3 + $0x180] sm:$0xff]  ;;  %v559_v48 = vld [vmem:[%s7369_s3 + $0x188] sm:$0xff]  ;;  %v6033_v50 = vcombine.low %v550_v38, %v554_v39  ;;  %v6035_v51 = vcombine.low %v551_v40, %v555_v41 }
  0xd6   : > { %2840 = vmatpush1.bf16.msra.mxu0 %v6009_v26  ;;  %2963 = vmatpush1.bf16.msra.mxu1 %v6011_v27  ;;  %v562_v47 = vld [vmem:[%s7369_s3 + $0x1a0] sm:$0xff]  ;;  %v563_v49 = vld [vmem:[%s7369_s3 + $0x1a8] sm:$0xff] }
  0xd7   : > { %2841 = vmatprep.subr.bf16.mxu0 %v6018_v28  ;;  %2964 = vmatprep.subr.bf16.mxu1 %v6020_v29  ;;  %v6042_v52 = vcombine.high %v558_v46, %v562_v47  ;;  %v7459_v53 = vld [vmem:[%s7401_s13] sm:$0xff]  ;;  %v6044_v54 = vcombine.high %v559_v48, %v563_v49  ;;  %v567_v58 = vld [vmem:[%s7369_s3 + $0x1c8] sm:$0xff]  ;;  %v6041_v60 = vcombine.low %v558_v46, %v562_v47 }
  0xd8   : > { %v566_v55 = vld [vmem:[%s7369_s3 + $0x1c0] sm:$0xff]  ;;  %v7465_v57 = vcombine.high %v7459_v53, %v7459_v53  ;;  %v571_v59 = vld [vmem:[%s7369_s3 + $0x1e8] sm:$0xff]  ;;  %v6043_v61 = vcombine.low %v559_v48, %v563_v49 }
  0xd9   : > { %v570_v56 = vld [vmem:[%s7369_s3 + $0x1e0] sm:$0xff]  ;;  %v6052_v63 = vcombine.high %v567_v58, %v571_v59  ;;  %v575_v2 = vld [vmem:[%s7369_s3 + $0x208] sm:$0xff]  ;;  %v6051_v5 = vcombine.low %v567_v58, %v571_v59 }
  0xda   : > { %2842 = vmatpush1.bf16.msra.mxu0 %v6017_v34  ;;  %2965 = vmatpush1.bf16.msra.mxu1 %v6019_v35  ;;  %v6050_v62 = vcombine.high %v566_v55, %v570_v56  ;;  %v574_v0 = vld [vmem:[%s7369_s3 + $0x200] sm:$0xff]  ;;  %v579_v3 = vld [vmem:[%s7369_s3 + $0x228] sm:$0xff]  ;;  %v6049_v4 = vcombine.low %v566_v55, %v570_v56 }
  0xdb   : > { %2843 = vmatprep.subr.bf16.mxu0 %v6026_v36  ;;  %2966 = vmatprep.subr.bf16.mxu1 %v6028_v37  ;;  %v578_v1 = vld [vmem:[%s7369_s3 + $0x220] sm:$0xff]  ;;  %v6060_v7 = vcombine.high %v575_v2, %v579_v3  ;;  %v583_v10 = vld [vmem:[%s7369_s3 + $0x248] sm:$0xff]  ;;  %v6059_v13 = vcombine.low %v575_v2, %v579_v3 }
  0xdc   : > { %2867 = vmatprep.mubr.bf16.mxu0 %v7465_v57  ;;  %2990 = vmatprep.mubr.bf16.mxu1 %v7465_v57  ;;  %v6058_v6 = vcombine.high %v574_v0, %v578_v1  ;;  %v582_v8 = vld [vmem:[%s7369_s3 + $0x240] sm:$0xff]  ;;  %v587_v11 = vld [vmem:[%s7369_s3 + $0x268] sm:$0xff]  ;;  %v6057_v12 = vcombine.low %v574_v0, %v578_v1 }
  0xdd   : > { %v586_v9 = vld [vmem:[%s7369_s3 + $0x260] sm:$0xff]  ;;  %v6068_v15 = vcombine.high %v583_v10, %v587_v11  ;;  %v591_v18 = vld [vmem:[%s7369_s3 + $0x288] sm:$0xff]  ;;  %v6067_v21 = vcombine.low %v583_v10, %v587_v11 }
  0xde   : > { %2844 = vmatpush1.bf16.msra.mxu0 %v6025_v42  ;;  %2967 = vmatpush1.bf16.msra.mxu1 %v6027_v43  ;;  %v6066_v14 = vcombine.high %v582_v8, %v586_v9  ;;  %v590_v16 = vld [vmem:[%s7369_s3 + $0x280] sm:$0xff]  ;;  %v595_v19 = vld [vmem:[%s7369_s3 + $0x2a8] sm:$0xff]  ;;  %v6065_v20 = vcombine.low %v582_v8, %v586_v9 }
  0xdf   : > { %2845 = vmatprep.subr.bf16.mxu0 %v6034_v44  ;;  %2968 = vmatprep.subr.bf16.mxu1 %v6036_v45  ;;  %v594_v17 = vld [vmem:[%s7369_s3 + $0x2a0] sm:$0xff]  ;;  %v6076_v23 = vcombine.high %v591_v18, %v595_v19  ;;  %v599_v26 = vld [vmem:[%s7369_s3 + $0x2c8] sm:$0xff]  ;;  %v6075_v29 = vcombine.low %v591_v18, %v595_v19 }
  0xe0   : > { %v6074_v22 = vcombine.high %v590_v16, %v594_v17  ;;  %v598_v24 = vld [vmem:[%s7369_s3 + $0x2c0] sm:$0xff]  ;;  %v603_v27 = vld [vmem:[%s7369_s3 + $0x2e8] sm:$0xff]  ;;  %v6073_v28 = vcombine.low %v590_v16, %v594_v17 }
  0xe1   : > { %v602_v25 = vld [vmem:[%s7369_s3 + $0x2e0] sm:$0xff]  ;;  %v6084_v31 = vcombine.high %v599_v26, %v603_v27  ;;  %v607_v34 = vld [vmem:[%s7369_s3 + $0x308] sm:$0xff]  ;;  %v6083_v37 = vcombine.low %v599_v26, %v603_v27 }
  0xe2   : > { %2846 = vmatpush1.bf16.msra.mxu0 %v6033_v50  ;;  %2969 = vmatpush1.bf16.msra.mxu1 %v6035_v51  ;;  %v6082_v30 = vcombine.high %v598_v24, %v602_v25  ;;  %v606_v32 = vld [vmem:[%s7369_s3 + $0x300] sm:$0xff]  ;;  %v611_v35 = vld [vmem:[%s7369_s3 + $0x328] sm:$0xff]  ;;  %v6081_v36 = vcombine.low %v598_v24, %v602_v25 }
  0xe3   : > { %2847 = vmatprep.subr.bf16.mxu0 %v6042_v52  ;;  %2970 = vmatprep.subr.bf16.mxu1 %v6044_v54  ;;  %v610_v33 = vld [vmem:[%s7369_s3 + $0x320] sm:$0xff]  ;;  %v6092_v39 = vcombine.high %v607_v34, %v611_v35  ;;  %v615_v42 = vld [vmem:[%s7369_s3 + $0x348] sm:$0xff]  ;;  %v6091_v45 = vcombine.low %v607_v34, %v611_v35 }
  0xe4   : > { %v6090_v38 = vcombine.high %v606_v32, %v610_v33  ;;  %v614_v40 = vld [vmem:[%s7369_s3 + $0x340] sm:$0xff]  ;;  %v619_v43 = vld [vmem:[%s7369_s3 + $0x368] sm:$0xff]  ;;  %v6089_v44 = vcombine.low %v606_v32, %v610_v33 }
  0xe5   : > { %v618_v41 = vld [vmem:[%s7369_s3 + $0x360] sm:$0xff]  ;;  %v6100_v47 = vcombine.high %v615_v42, %v619_v43  ;;  %v623_v50 = vld [vmem:[%s7369_s3 + $0x388] sm:$0xff]  ;;  %v6099_v54 = vcombine.low %v615_v42, %v619_v43 }
  0xe6   : > { %2848 = vmatpush1.bf16.msra.mxu0 %v6041_v60  ;;  %2971 = vmatpush1.bf16.msra.mxu1 %v6043_v61  ;;  %v6098_v46 = vcombine.high %v614_v40, %v618_v41  ;;  %v622_v48 = vld [vmem:[%s7369_s3 + $0x380] sm:$0xff]  ;;  %v627_v51 = vld [vmem:[%s7369_s3 + $0x3a8] sm:$0xff]  ;;  %v6097_v52 = vcombine.low %v614_v40, %v618_v41 }
  0xe7   : > { %2849 = vmatprep.subr.bf16.mxu0 %v6050_v62  ;;  %2972 = vmatprep.subr.bf16.mxu1 %v6052_v63  ;;  %v626_v49 = vld [vmem:[%s7369_s3 + $0x3a0] sm:$0xff]  ;;  %v6108_v56 = vcombine.high %v623_v50, %v627_v51  ;;  %v631_v60 = vld [vmem:[%s7369_s3 + $0x3c8] sm:$0xff]  ;;  %v6107_v63 = vcombine.low %v623_v50, %v627_v51 }
  0xe8   : > { %v6106_v55 = vcombine.high %v622_v48, %v626_v49  ;;  %v630_v58 = vld [vmem:[%s7369_s3 + $0x3c0] sm:$0xff]  ;;  %v635_v61 = vld [vmem:[%s7369_s3 + $0x3e8] sm:$0xff]  ;;  %v6105_v62 = vcombine.low %v622_v48, %v626_v49 }
  0xe9   : > { %v634_v59 = vld [vmem:[%s7369_s3 + $0x3e0] sm:$0xff]  ;;  %v6116_v1 = vcombine.high %v631_v60, %v635_v61 }
  0xea   : > { %2850 = vmatpush1.bf16.msra.mxu0 %v6049_v4  ;;  %2973 = vmatpush1.bf16.msra.mxu1 %v6051_v5  ;;  %v6114_v0 = vcombine.high %v630_v58, %v634_v59  ;;  %v638_v2 = vld [vmem:[%s7369_s3 + $0x400] sm:$0xff]  ;;  %v639_v4 = vld [vmem:[%s7369_s3 + $0x408] sm:$0xff] }
  0xeb   : > { %2851 = vmatprep.subr.bf16.mxu0 %v6058_v6  ;;  %2974 = vmatprep.subr.bf16.mxu1 %v6060_v7  ;;  %v642_v3 = vld [vmem:[%s7369_s3 + $0x420] sm:$0xff]  ;;  %v643_v5 = vld [vmem:[%s7369_s3 + $0x428] sm:$0xff]  ;;  %v6113_v6 = vcombine.low %v630_v58, %v634_v59  ;;  %v6115_v7 = vcombine.low %v631_v60, %v635_v61 }
  0xec   : > { %v6122_v8 = vcombine.high %v638_v2, %v642_v3  ;;  %v6124_v9 = vcombine.high %v639_v4, %v643_v5  ;;  %v646_v10 = vld [vmem:[%s7369_s3 + $0x440] sm:$0xff]  ;;  %v6121_v16 = vcombine.low %v638_v2, %v642_v3  ;;  %v6123_v17 = vcombine.low %v639_v4, %v643_v5 }
  0xed   : > { %v650_v11 = vld [vmem:[%s7369_s3 + $0x460] sm:$0xff] }
  0xee   : > { %2852 = vmatpush1.bf16.msra.mxu0 %v6057_v12  ;;  %2975 = vmatpush1.bf16.msra.mxu1 %v6059_v13  ;;  %v7511_v12 = vcombine.low %v7459_v53, %v7459_v53  ;;  %v647_v13 = vld [vmem:[%s7369_s3 + $0x448] sm:$0xff]  ;;  %v6130_v18 = vcombine.high %v646_v10, %v650_v11  ;;  %v6129_v24 = vcombine.low %v646_v10, %v650_v11 }
  0xef   : > { %2853 = vmatprep.subr.bf16.mxu0 %v6066_v14  ;;  %2976 = vmatprep.subr.bf16.mxu1 %v6068_v15  ;;  %v651_v14 = vld [vmem:[%s7369_s3 + $0x468] sm:$0xff] }
  0xf0   : > { %v7516_v15 = vld [vmem:[%s7401_s13 + $0x8] sm:$0xff]  ;;  %v6132_v19 = vcombine.high %v647_v13, %v651_v14  ;;  %v6131_v25 = vcombine.low %v647_v13, %v651_v14 }
  0xf1   : > { %v7522_v53 = vcombine.high %v7516_v15, %v7516_v15 }
  0xf2   : > { %2854 = vmatpush1.bf16.msra.mxu0 %v6065_v20  ;;  %2977 = vmatpush1.bf16.msra.mxu1 %v6067_v21  ;;  %v654_v20 = vld [vmem:[%s7369_s3 + $0x480] sm:$0xff] }
  0xf3   : > { %2855 = vmatprep.subr.bf16.mxu0 %v6074_v22  ;;  %2978 = vmatprep.subr.bf16.mxu1 %v6076_v23  ;;  %v658_v21 = vld [vmem:[%s7369_s3 + $0x4a0] sm:$0xff]  ;;  %v655_v22 = vld [vmem:[%s7369_s3 + $0x488] sm:$0xff] }
  0xf4   : > { %v659_v23 = vld [vmem:[%s7369_s3 + $0x4a8] sm:$0xff]  ;;  %v6138_v26 = vcombine.high %v654_v20, %v658_v21  ;;  %v6137_v32 = vcombine.low %v654_v20, %v658_v21 }
  0xf5   : > { %v6140_v27 = vcombine.high %v655_v22, %v659_v23  ;;  %v6139_v33 = vcombine.low %v655_v22, %v659_v23 }
  0xf6   : > { %2856 = vmatpush1.bf16.msra.mxu0 %v6073_v28  ;;  %2979 = vmatpush1.bf16.msra.mxu1 %v6075_v29  ;;  %v662_v28 = vld [vmem:[%s7369_s3 + $0x4c0] sm:$0xff] }
  0xf7   : > { %2857 = vmatprep.subr.bf16.mxu0 %v6082_v30  ;;  %2980 = vmatprep.subr.bf16.mxu1 %v6084_v31  ;;  %v666_v29 = vld [vmem:[%s7369_s3 + $0x4e0] sm:$0xff]  ;;  %v663_v30 = vld [vmem:[%s7369_s3 + $0x4c8] sm:$0xff] }
  0xf8   : > { %v667_v31 = vld [vmem:[%s7369_s3 + $0x4e8] sm:$0xff]  ;;  %v6146_v34 = vcombine.high %v662_v28, %v666_v29  ;;  %v6145_v40 = vcombine.low %v662_v28, %v666_v29 }
  0xf9   : > { %v6148_v35 = vcombine.high %v663_v30, %v667_v31  ;;  %v6147_v41 = vcombine.low %v663_v30, %v667_v31 }
  0xfa   : > { %2858 = vmatpush1.bf16.msra.mxu0 %v6081_v36  ;;  %2981 = vmatpush1.bf16.msra.mxu1 %v6083_v37  ;;  %v670_v36 = vld [vmem:[%s7369_s3 + $0x500] sm:$0xff] }
  0xfb   : > { %2859 = vmatprep.subr.bf16.mxu0 %v6090_v38  ;;  %2982 = vmatprep.subr.bf16.mxu1 %v6092_v39  ;;  %v674_v37 = vld [vmem:[%s7369_s3 + $0x520] sm:$0xff]  ;;  %v671_v38 = vld [vmem:[%s7369_s3 + $0x508] sm:$0xff] }
  0xfc   : > { %v675_v39 = vld [vmem:[%s7369_s3 + $0x528] sm:$0xff]  ;;  %v6154_v42 = vcombine.high %v670_v36, %v674_v37  ;;  %v6153_v48 = vcombine.low %v670_v36, %v674_v37 }
  0xfd   : > { %v6156_v43 = vcombine.high %v671_v38, %v675_v39  ;;  %v6155_v49 = vcombine.low %v671_v38, %v675_v39 }
  0xfe   : > { %2860 = vmatpush1.bf16.msra.mxu0 %v6089_v44  ;;  %2983 = vmatpush1.bf16.msra.mxu1 %v6091_v45  ;;  %v678_v44 = vld [vmem:[%s7369_s3 + $0x540] sm:$0xff] }
  0xff   : > { %2861 = vmatprep.subr.bf16.mxu0 %v6098_v46  ;;  %2984 = vmatprep.subr.bf16.mxu1 %v6100_v47  ;;  %v682_v45 = vld [vmem:[%s7369_s3 + $0x560] sm:$0xff]  ;;  %v679_v46 = vld [vmem:[%s7369_s3 + $0x548] sm:$0xff] }
 0x100   : > { %v683_v47 = vld [vmem:[%s7369_s3 + $0x568] sm:$0xff]  ;;  %v6162_v50 = vcombine.high %v678_v44, %v682_v45  ;;  %v6161_v58 = vcombine.low %v678_v44, %v682_v45 }
 0x101   : > { %v6164_v51 = vcombine.high %v679_v46, %v683_v47  ;;  %v6163_v59 = vcombine.low %v679_v46, %v683_v47 }
 0x102   : > { %2862 = vmatpush1.bf16.msra.mxu0 %v6097_v52  ;;  %2985 = vmatpush1.bf16.msra.mxu1 %v6099_v54  ;;  %v686_v52 = vld [vmem:[%s7369_s3 + $0x580] sm:$0xff] }
 0x103   : > { %2863 = vmatprep.subr.bf16.mxu0 %v6106_v55  ;;  %2986 = vmatprep.subr.bf16.mxu1 %v6108_v56  ;;  %v690_v54 = vld [vmem:[%s7369_s3 + $0x5a0] sm:$0xff]  ;;  %v687_v55 = vld [vmem:[%s7369_s3 + $0x588] sm:$0xff] }
 0x104   : > { %v691_v56 = vld [vmem:[%s7369_s3 + $0x5a8] sm:$0xff]  ;;  %v6170_v60 = vcombine.high %v686_v52, %v690_v54  ;;  %v6169_v2 = vcombine.low %v686_v52, %v690_v54 }
 0x105   : > { %v6172_v61 = vcombine.high %v687_v55, %v691_v56  ;;  %v6171_v3 = vcombine.low %v687_v55, %v691_v56 }
 0x106   : > { %2864 = vmatpush1.bf16.msra.mxu0 %v6105_v62  ;;  %2987 = vmatpush1.bf16.msra.mxu1 %v6107_v63  ;;  %v694_v62 = vld [vmem:[%s7369_s3 + $0x5c0] sm:$0xff] }
 0x107   : > { %2865 = vmatprep.subr.bf16.mxu0 %v6114_v0  ;;  %2988 = vmatprep.subr.bf16.mxu1 %v6116_v1  ;;  %v698_v63 = vld [vmem:[%s7369_s3 + $0x5e0] sm:$0xff]  ;;  %v695_v0 = vld [vmem:[%s7369_s3 + $0x5c8] sm:$0xff] }
 0x108   : > { %v699_v1 = vld [vmem:[%s7369_s3 + $0x5e8] sm:$0xff]  ;;  %v6178_v4 = vcombine.high %v694_v62, %v698_v63  ;;  %v6177_v10 = vcombine.low %v694_v62, %v698_v63 }
 0x109   : > { %v6180_v5 = vcombine.high %v695_v0, %v699_v1  ;;  %v6179_v11 = vcombine.low %v695_v0, %v699_v1 }
 0x10a   : > { %2866 = vmatpush1.bf16.msra.mxu0 %v6113_v6  ;;  %2989 = vmatpush1.bf16.msra.mxu1 %v6115_v7  ;;  %v702_v6 = vld [vmem:[%s7369_s3 + $0x600] sm:$0xff] }
 0x10b   : > { %2876 = vmatprep.subr.bf16.mxu0 %v6122_v8  ;;  %2999 = vmatprep.subr.bf16.mxu1 %v6124_v9  ;;  %v706_v7 = vld [vmem:[%s7369_s3 + $0x620] sm:$0xff]  ;;  %v703_v8 = vld [vmem:[%s7369_s3 + $0x608] sm:$0xff] }
 0x10c   : > { %v707_v9 = vld [vmem:[%s7369_s3 + $0x628] sm:$0xff]  ;;  %v6186_v13 = vcombine.high %v702_v6, %v706_v7  ;;  %v6185_v20 = vcombine.low %v702_v6, %v706_v7 }
 0x10d   : > { %2868 = vmatmul.mubr.bf16.vlgmr.msra.gmra.mrb[0].mxu0 %v7511_v12  ;;  %2991 = vmatmul.mubr.bf16.vlgmr.msra.gmra.mrb[0].mxu1 %v7511_v12  ;;  %v6188_v14 = vcombine.high %v703_v8, %v707_v9  ;;  %v6187_v21 = vcombine.low %v703_v8, %v707_v9 }
 0x10e   : > { %2877 = vmatpush1.bf16.msra.mxu0 %v6121_v16  ;;  %3000 = vmatpush1.bf16.msra.mxu1 %v6123_v17  ;;  %v710_v16 = vld [vmem:[%s7369_s3 + $0x640] sm:$0xff] }
 0x10f   : > { %2878 = vmatprep.subr.bf16.mxu0 %v6130_v18  ;;  %3001 = vmatprep.subr.bf16.mxu1 %v6132_v19  ;;  %v714_v17 = vld [vmem:[%s7369_s3 + $0x660] sm:$0xff]  ;;  %v711_v18 = vld [vmem:[%s7369_s3 + $0x648] sm:$0xff] }
 0x110   : > { %2908 = vmatprep.mubr.bf16.mxu0 %v7522_v53  ;;  %3031 = vmatprep.mubr.bf16.mxu1 %v7522_v53  ;;  %v715_v19 = vld [vmem:[%s7369_s3 + $0x668] sm:$0xff]  ;;  %v6194_v22 = vcombine.high %v710_v16, %v714_v17  ;;  %v6193_v28 = vcombine.low %v710_v16, %v714_v17 }
 0x111   : > { %v6196_v23 = vcombine.high %v711_v18, %v715_v19  ;;  %v6195_v29 = vcombine.low %v711_v18, %v715_v19 }
 0x112   : > { %2879 = vmatpush1.bf16.msra.mxu0 %v6129_v24  ;;  %3002 = vmatpush1.bf16.msra.mxu1 %v6131_v25  ;;  %v718_v24 = vld [vmem:[%s7369_s3 + $0x680] sm:$0xff] }
 0x113   : > { %2880 = vmatprep.subr.bf16.mxu0 %v6138_v26  ;;  %3003 = vmatprep.subr.bf16.mxu1 %v6140_v27  ;;  %v722_v25 = vld [vmem:[%s7369_s3 + $0x6a0] sm:$0xff]  ;;  %v719_v26 = vld [vmem:[%s7369_s3 + $0x688] sm:$0xff] }
 0x114   : > { %v723_v27 = vld [vmem:[%s7369_s3 + $0x6a8] sm:$0xff]  ;;  %v6202_v30 = vcombine.high %v718_v24, %v722_v25  ;;  %v6201_v36 = vcombine.low %v718_v24, %v722_v25  ;;  %v7595_v25 = vld [vmem:[%s7401_s13 + $0x10] sm:$0xff] }
 0x115   : > { %v6204_v31 = vcombine.high %v719_v26, %v723_v27  ;;  %v6203_v37 = vcombine.low %v719_v26, %v723_v27  ;;  %v779_v24 = vld [vmem:[%s7369_s3 + $0x868] sm:$0xff] }
 0x116   : > { %2881 = vmatpush1.bf16.msra.mxu0 %v6137_v32  ;;  %3004 = vmatpush1.bf16.msra.mxu1 %v6139_v33  ;;  %v726_v32 = vld [vmem:[%s7369_s3 + $0x6c0] sm:$0xff] }
 0x117   : > { %2882 = vmatprep.subr.bf16.mxu0 %v6146_v34  ;;  %3005 = vmatprep.subr.bf16.mxu1 %v6148_v35  ;;  %v730_v33 = vld [vmem:[%s7369_s3 + $0x6e0] sm:$0xff]  ;;  %v727_v34 = vld [vmem:[%s7369_s3 + $0x6c8] sm:$0xff] }
 0x118   : > { %v731_v35 = vld [vmem:[%s7369_s3 + $0x6e8] sm:$0xff]  ;;  %v6210_v38 = vcombine.high %v726_v32, %v730_v33  ;;  %v6209_v44 = vcombine.low %v726_v32, %v730_v33 }
 0x119   : > { %v6212_v39 = vcombine.high %v727_v34, %v731_v35  ;;  %v6211_v45 = vcombine.low %v727_v34, %v731_v35  ;;  %v783_v32 = vld [vmem:[%s7369_s3 + $0x888] sm:$0xff] }
 0x11a   : > { %2883 = vmatpush1.bf16.msra.mxu0 %v6145_v40  ;;  %3006 = vmatpush1.bf16.msra.mxu1 %v6147_v41  ;;  %v734_v40 = vld [vmem:[%s7369_s3 + $0x700] sm:$0xff]  ;;  %v787_v33 = vld [vmem:[%s7369_s3 + $0x8a8] sm:$0xff] }
 0x11b   : > { %2884 = vmatprep.subr.bf16.mxu0 %v6154_v42  ;;  %3007 = vmatprep.subr.bf16.mxu1 %v6156_v43  ;;  %v738_v41 = vld [vmem:[%s7369_s3 + $0x720] sm:$0xff]  ;;  %v735_v42 = vld [vmem:[%s7369_s3 + $0x708] sm:$0xff] }
 0x11c   : > { %v739_v43 = vld [vmem:[%s7369_s3 + $0x728] sm:$0xff]  ;;  %v6218_v46 = vcombine.high %v734_v40, %v738_v41  ;;  %v6217_v52 = vcombine.low %v734_v40, %v738_v41 }
 0x11d   : > { %v6220_v47 = vcombine.high %v735_v42, %v739_v43  ;;  %v6219_v54 = vcombine.low %v735_v42, %v739_v43  ;;  %v791_v40 = vld [vmem:[%s7369_s3 + $0x8c8] sm:$0xff]  ;;  %v6267_v43 = vcombine.low %v783_v32, %v787_v33 }
 0x11e   : > { %2885 = vmatpush1.bf16.msra.mxu0 %v6153_v48  ;;  %3008 = vmatpush1.bf16.msra.mxu1 %v6155_v49  ;;  %v742_v48 = vld [vmem:[%s7369_s3 + $0x740] sm:$0xff]  ;;  %v795_v41 = vld [vmem:[%s7369_s3 + $0x8e8] sm:$0xff] }
 0x11f   : > { %2886 = vmatprep.subr.bf16.mxu0 %v6162_v50  ;;  %3009 = vmatprep.subr.bf16.mxu1 %v6164_v51  ;;  %v746_v49 = vld [vmem:[%s7369_s3 + $0x760] sm:$0xff]  ;;  %v743_v50 = vld [vmem:[%s7369_s3 + $0x748] sm:$0xff] }
 0x120   : > { %v747_v51 = vld [vmem:[%s7369_s3 + $0x768] sm:$0xff]  ;;  %v6226_v55 = vcombine.high %v742_v48, %v746_v49  ;;  %v6225_v62 = vcombine.low %v742_v48, %v746_v49 }
 0x121   : > { %v6228_v56 = vcombine.high %v743_v50, %v747_v51  ;;  %v6227_v63 = vcombine.low %v743_v50, %v747_v51  ;;  %v799_v48 = vld [vmem:[%s7369_s3 + $0x908] sm:$0xff]  ;;  %v6275_v51 = vcombine.low %v791_v40, %v795_v41 }
 0x122   : > { %2887 = vmatpush1.bf16.msra.mxu0 %v6161_v58  ;;  %3010 = vmatpush1.bf16.msra.mxu1 %v6163_v59  ;;  %v750_v58 = vld [vmem:[%s7369_s3 + $0x780] sm:$0xff]  ;;  %v803_v49 = vld [vmem:[%s7369_s3 + $0x928] sm:$0xff] }
 0x123   : > { %2888 = vmatprep.subr.bf16.mxu0 %v6170_v60  ;;  %3011 = vmatprep.subr.bf16.mxu1 %v6172_v61  ;;  %v754_v59 = vld [vmem:[%s7369_s3 + $0x7a0] sm:$0xff]  ;;  %v751_v60 = vld [vmem:[%s7369_s3 + $0x788] sm:$0xff] }
 0x124   : > { %v755_v61 = vld [vmem:[%s7369_s3 + $0x7a8] sm:$0xff]  ;;  %v6234_v0 = vcombine.high %v750_v58, %v754_v59  ;;  %v6233_v6 = vcombine.low %v750_v58, %v754_v59 }
 0x125   : > { %v6236_v1 = vcombine.high %v751_v60, %v755_v61  ;;  %v6235_v7 = vcombine.low %v751_v60, %v755_v61  ;;  %v807_v58 = vld [vmem:[%s7369_s3 + $0x948] sm:$0xff]  ;;  %v6283_v61 = vcombine.low %v799_v48, %v803_v49 }
 0x126   : > { %2889 = vmatpush1.bf16.msra.mxu0 %v6169_v2  ;;  %3012 = vmatpush1.bf16.msra.mxu1 %v6171_v3  ;;  %v758_v2 = vld [vmem:[%s7369_s3 + $0x7c0] sm:$0xff]  ;;  %v811_v59 = vld [vmem:[%s7369_s3 + $0x968] sm:$0xff] }
 0x127   : > { %2890 = vmatprep.subr.bf16.mxu0 %v6178_v4  ;;  %3013 = vmatprep.subr.bf16.mxu1 %v6180_v5  ;;  %v762_v3 = vld [vmem:[%s7369_s3 + $0x7e0] sm:$0xff]  ;;  %v759_v4 = vld [vmem:[%s7369_s3 + $0x7c8] sm:$0xff] }
 0x128   : > { %v763_v5 = vld [vmem:[%s7369_s3 + $0x7e8] sm:$0xff]  ;;  %v6242_v8 = vcombine.high %v758_v2, %v762_v3  ;;  %v6241_v16 = vcombine.low %v758_v2, %v762_v3 }
 0x129   : > { %v6244_v9 = vcombine.high %v759_v4, %v763_v5  ;;  %v6243_v17 = vcombine.low %v759_v4, %v763_v5  ;;  %v815_v2 = vld [vmem:[%s7369_s3 + $0x988] sm:$0xff]  ;;  %v6291_v5 = vcombine.low %v807_v58, %v811_v59 }
 0x12a   : > { %2891 = vmatpush1.bf16.msra.mxu0 %v6177_v10  ;;  %3014 = vmatpush1.bf16.msra.mxu1 %v6179_v11  ;;  %v766_v10 = vld [vmem:[%s7369_s3 + $0x800] sm:$0xff]  ;;  %v819_v3 = vld [vmem:[%s7369_s3 + $0x9a8] sm:$0xff] }
 0x12b   : > { %2892 = vmatprep.subr.bf16.mxu0 %v6186_v13  ;;  %3015 = vmatprep.subr.bf16.mxu1 %v6188_v14  ;;  %v770_v11 = vld [vmem:[%s7369_s3 + $0x820] sm:$0xff]  ;;  %v767_v13 = vld [vmem:[%s7369_s3 + $0x808] sm:$0xff] }
 0x12c   : > { %v771_v14 = vld [vmem:[%s7369_s3 + $0x828] sm:$0xff]  ;;  %v6250_v18 = vcombine.high %v766_v10, %v770_v11  ;;  %v6249_v26 = vcombine.low %v766_v10, %v770_v11 }
 0x12d   : > { %v6252_v19 = vcombine.high %v767_v13, %v771_v14  ;;  %v6251_v27 = vcombine.low %v767_v13, %v771_v14  ;;  %v823_v10 = vld [vmem:[%s7369_s3 + $0x9c8] sm:$0xff]  ;;  %v6299_v14 = vcombine.low %v815_v2, %v819_v3 }
 0x12e   : > { %2893 = vmatpush1.bf16.msra.mxu0 %v6185_v20  ;;  %3016 = vmatpush1.bf16.msra.mxu1 %v6187_v21  ;;  %v774_v20 = vld [vmem:[%s7369_s3 + $0x840] sm:$0xff]  ;;  %v827_v11 = vld [vmem:[%s7369_s3 + $0x9e8] sm:$0xff] }
 0x12f   : > { %2894 = vmatprep.subr.bf16.mxu0 %v6194_v22  ;;  %3017 = vmatprep.subr.bf16.mxu1 %v6196_v23  ;;  %v778_v21 = vld [vmem:[%s7369_s3 + $0x860] sm:$0xff]  ;;  %v7590_v22 = vcombine.low %v7516_v15, %v7516_v15  ;;  %v775_v23 = vld [vmem:[%s7369_s3 + $0x848] sm:$0xff]  ;;  %v7601_v15 = vcombine.high %v7595_v25, %v7595_v25 }
 0x130   : > { %v6257_v34 = vcombine.low %v774_v20, %v778_v21  ;;  %v6259_v35 = vcombine.low %v775_v23, %v779_v24 }
 0x132   : > { %2895 = vmatpush1.bf16.msra.mxu0 %v6193_v28  ;;  %3018 = vmatpush1.bf16.msra.mxu1 %v6195_v29  ;;  %v6258_v28 = vcombine.high %v774_v20, %v778_v21  ;;  %v6260_v29 = vcombine.high %v775_v23, %v779_v24  ;;  %v831_v20 = vld [vmem:[%s7369_s3 + $0xa08] sm:$0xff]  ;;  %v6307_v24 = vcombine.low %v823_v10, %v827_v11 }
 0x133   : > { %2896 = vmatprep.subr.bf16.mxu0 %v6202_v30  ;;  %3019 = vmatprep.subr.bf16.mxu1 %v6204_v31  ;;  %v782_v30 = vld [vmem:[%s7369_s3 + $0x880] sm:$0xff]  ;;  %v835_v21 = vld [vmem:[%s7369_s3 + $0xa28] sm:$0xff] }
 0x134   : > { %v786_v31 = vld [vmem:[%s7369_s3 + $0x8a0] sm:$0xff] }
 0x135   : > { %v6265_v42 = vcombine.low %v782_v30, %v786_v31 }
 0x136   : > { %2897 = vmatpush1.bf16.msra.mxu0 %v6201_v36  ;;  %3020 = vmatpush1.bf16.msra.mxu1 %v6203_v37  ;;  %v6266_v36 = vcombine.high %v782_v30, %v786_v31  ;;  %v6268_v37 = vcombine.high %v783_v32, %v787_v33  ;;  %v839_v30 = vld [vmem:[%s7369_s3 + $0xa48] sm:$0xff]  ;;  %v6315_v33 = vcombine.low %v831_v20, %v835_v21 }
 0x137   : > { %2898 = vmatprep.subr.bf16.mxu0 %v6210_v38  ;;  %3021 = vmatprep.subr.bf16.mxu1 %v6212_v39  ;;  %v790_v38 = vld [vmem:[%s7369_s3 + $0x8c0] sm:$0xff]  ;;  %v843_v31 = vld [vmem:[%s7369_s3 + $0xa68] sm:$0xff] }
 0x138   : > { %v794_v39 = vld [vmem:[%s7369_s3 + $0x8e0] sm:$0xff] }
 0x139   : > { %v6273_v50 = vcombine.low %v790_v38, %v794_v39 }
 0x13a   : > { %2899 = vmatpush1.bf16.msra.mxu0 %v6209_v44  ;;  %3022 = vmatpush1.bf16.msra.mxu1 %v6211_v45  ;;  %v6274_v44 = vcombine.high %v790_v38, %v794_v39  ;;  %v6276_v45 = vcombine.high %v791_v40, %v795_v41  ;;  %v847_v38 = vld [vmem:[%s7369_s3 + $0xa88] sm:$0xff]  ;;  %v6323_v41 = vcombine.low %v839_v30, %v843_v31 }
 0x13b   : > { %2900 = vmatprep.subr.bf16.mxu0 %v6218_v46  ;;  %3023 = vmatprep.subr.bf16.mxu1 %v6220_v47  ;;  %v798_v46 = vld [vmem:[%s7369_s3 + $0x900] sm:$0xff]  ;;  %v851_v39 = vld [vmem:[%s7369_s3 + $0xaa8] sm:$0xff] }
 0x13c   : > { %v802_v47 = vld [vmem:[%s7369_s3 + $0x920] sm:$0xff] }
 0x13d   : > { %v6281_v60 = vcombine.low %v798_v46, %v802_v47 }
 0x13e   : > { %2901 = vmatpush1.bf16.msra.mxu0 %v6217_v52  ;;  %3024 = vmatpush1.bf16.msra.mxu1 %v6219_v54  ;;  %v6282_v52 = vcombine.high %v798_v46, %v802_v47  ;;  %v6284_v54 = vcombine.high %v799_v48, %v803_v49  ;;  %v855_v46 = vld [vmem:[%s7369_s3 + $0xac8] sm:$0xff]  ;;  %v6331_v49 = vcombine.low %v847_v38, %v851_v39 }
 0x13f   : > { %2902 = vmatprep.subr.bf16.mxu0 %v6226_v55  ;;  %3025 = vmatprep.subr.bf16.mxu1 %v6228_v56  ;;  %v806_v55 = vld [vmem:[%s7369_s3 + $0x940] sm:$0xff]  ;;  %v859_v47 = vld [vmem:[%s7369_s3 + $0xae8] sm:$0xff] }
 0x140   : > { %v810_v56 = vld [vmem:[%s7369_s3 + $0x960] sm:$0xff] }
 0x141   : > { %v6289_v4 = vcombine.low %v806_v55, %v810_v56 }
 0x142   : > { %2903 = vmatpush1.bf16.msra.mxu0 %v6225_v62  ;;  %3026 = vmatpush1.bf16.msra.mxu1 %v6227_v63  ;;  %v6290_v62 = vcombine.high %v806_v55, %v810_v56  ;;  %v6292_v63 = vcombine.high %v807_v58, %v811_v59  ;;  %v863_v55 = vld [vmem:[%s7369_s3 + $0xb08] sm:$0xff]  ;;  %v6339_v59 = vcombine.low %v855_v46, %v859_v47 }
 0x143   : > { %2904 = vmatprep.subr.bf16.mxu0 %v6234_v0  ;;  %3027 = vmatprep.subr.bf16.mxu1 %v6236_v1  ;;  %v814_v0 = vld [vmem:[%s7369_s3 + $0x980] sm:$0xff]  ;;  %v867_v56 = vld [vmem:[%s7369_s3 + $0xb28] sm:$0xff] }
 0x144   : > { %v818_v1 = vld [vmem:[%s7369_s3 + $0x9a0] sm:$0xff] }
 0x145   : > { %v6297_v13 = vcombine.low %v814_v0, %v818_v1 }
 0x146   : > { %2905 = vmatpush1.bf16.msra.mxu0 %v6233_v6  ;;  %3028 = vmatpush1.bf16.msra.mxu1 %v6235_v7  ;;  %v6298_v6 = vcombine.high %v814_v0, %v818_v1  ;;  %v6300_v7 = vcombine.high %v815_v2, %v819_v3  ;;  %v871_v0 = vld [vmem:[%s7369_s3 + $0xb48] sm:$0xff]  ;;  %v6347_v3 = vcombine.low %v863_v55, %v867_v56 }
 0x147   : > { %2906 = vmatprep.subr.bf16.mxu0 %v6242_v8  ;;  %3029 = vmatprep.subr.bf16.mxu1 %v6244_v9  ;;  %v822_v8 = vld [vmem:[%s7369_s3 + $0x9c0] sm:$0xff]  ;;  %v875_v1 = vld [vmem:[%s7369_s3 + $0xb68] sm:$0xff] }
 0x148   : > { %v826_v9 = vld [vmem:[%s7369_s3 + $0x9e0] sm:$0xff] }
 0x149   : > { %v6305_v23 = vcombine.low %v822_v8, %v826_v9 }
 0x14a   : > { %2907 = vmatpush1.bf16.msra.mxu0 %v6241_v16  ;;  %3030 = vmatpush1.bf16.msra.mxu1 %v6243_v17  ;;  %v6306_v16 = vcombine.high %v822_v8, %v826_v9  ;;  %v6308_v17 = vcombine.high %v823_v10, %v827_v11  ;;  %v879_v8 = vld [vmem:[%s7369_s3 + $0xb88] sm:$0xff]  ;;  %v6355_v11 = vcombine.low %v871_v0, %v875_v1 }
 0x14b   : > { %2917 = vmatprep.subr.bf16.mxu0 %v6250_v18  ;;  %3040 = vmatprep.subr.bf16.mxu1 %v6252_v19  ;;  %v830_v18 = vld [vmem:[%s7369_s3 + $0xa00] sm:$0xff]  ;;  %v883_v9 = vld [vmem:[%s7369_s3 + $0xba8] sm:$0xff] }
 0x14c   : > { %v834_v19 = vld [vmem:[%s7369_s3 + $0xa20] sm:$0xff] }
 0x14d   : > { %2909 = vmatmul.mubr.bf16.vlgmr.msra.gmra.mrb[0].mxu0 %v7590_v22  ;;  %3032 = vmatmul.mubr.bf16.vlgmr.msra.gmra.mrb[0].mxu1 %v7590_v22  ;;  %v6313_v32 = vcombine.low %v830_v18, %v834_v19 }
 0x14e   : > { %2918 = vmatpush1.bf16.msra.mxu0 %v6249_v26  ;;  %3041 = vmatpush1.bf16.msra.mxu1 %v6251_v27  ;;  %v6314_v26 = vcombine.high %v830_v18, %v834_v19  ;;  %v6316_v27 = vcombine.high %v831_v20, %v835_v21  ;;  %v887_v18 = vld [vmem:[%s7369_s3 + $0xbc8] sm:$0xff]  ;;  %v6363_v21 = vcombine.low %v879_v8, %v883_v9 }
 0x14f   : > { %2919 = vmatprep.subr.bf16.mxu0 %v6258_v28  ;;  %3042 = vmatprep.subr.bf16.mxu1 %v6260_v29  ;;  %v838_v28 = vld [vmem:[%s7369_s3 + $0xa40] sm:$0xff]  ;;  %v891_v19 = vld [vmem:[%s7369_s3 + $0xbe8] sm:$0xff] }
 0x150   : > { %2949 = vmatprep.mubr.bf16.mxu0 %v7601_v15  ;;  %3072 = vmatprep.mubr.bf16.mxu1 %v7601_v15  ;;  %v842_v29 = vld [vmem:[%s7369_s3 + $0xa60] sm:$0xff] }
 0x151   : > { %v6321_v40 = vcombine.low %v838_v28, %v842_v29 }
 0x152   : > { %2920 = vmatpush1.bf16.msra.mxu0 %v6257_v34  ;;  %3043 = vmatpush1.bf16.msra.mxu1 %v6259_v35  ;;  %v6322_v34 = vcombine.high %v838_v28, %v842_v29  ;;  %v6324_v35 = vcombine.high %v839_v30, %v843_v31  ;;  %v513_v28 = vld [vmem:[%s7369_s3 + $0x18] sm:$0xff]  ;;  %v6371_v31 = vcombine.low %v887_v18, %v891_v19 }
 0x153   : > { %2921 = vmatprep.subr.bf16.mxu0 %v6266_v36  ;;  %3044 = vmatprep.subr.bf16.mxu1 %v6268_v37  ;;  %v846_v36 = vld [vmem:[%s7369_s3 + $0xa80] sm:$0xff]  ;;  %v517_v29 = vld [vmem:[%s7369_s3 + $0x38] sm:$0xff] }
 0x154   : > { %v850_v37 = vld [vmem:[%s7369_s3 + $0xaa0] sm:$0xff] }
 0x155   : > { %v6329_v48 = vcombine.low %v846_v36, %v850_v37 }
 0x156   : > { %2922 = vmatpush1.bf16.msra.mxu0 %v6265_v42  ;;  %3045 = vmatpush1.bf16.msra.mxu1 %v6267_v43  ;;  %v6330_v42 = vcombine.high %v846_v36, %v850_v37  ;;  %v6332_v43 = vcombine.high %v847_v38, %v851_v39  ;;  %v7669_v36 = vcombine.low %v7595_v25, %v7595_v25  ;;  %v521_v37 = vld [vmem:[%s7369_s3 + $0x58] sm:$0xff] }
 0x157   : > { %2923 = vmatprep.subr.bf16.mxu0 %v6274_v44  ;;  %3046 = vmatprep.subr.bf16.mxu1 %v6276_v45  ;;  %v854_v44 = vld [vmem:[%s7369_s3 + $0xac0] sm:$0xff]  ;;  %v525_v38 = vld [vmem:[%s7369_s3 + $0x78] sm:$0xff] }
 0x158   : > { %v858_v45 = vld [vmem:[%s7369_s3 + $0xae0] sm:$0xff]  ;;  %v529_v25 = vld [vmem:[%s7369_s3 + $0x98] sm:$0xff] }
 0x159   : > { %v6337_v58 = vcombine.low %v854_v44, %v858_v45 }
 0x15a   : > { %2924 = vmatpush1.bf16.msra.mxu0 %v6273_v50  ;;  %3047 = vmatpush1.bf16.msra.mxu1 %v6275_v51  ;;  %v6338_v50 = vcombine.high %v854_v44, %v858_v45  ;;  %v6340_v51 = vcombine.high %v855_v46, %v859_v47  ;;  %v532_v44 = vld [vmem:[%s7369_s3 + $0xb0] sm:$0xff]  ;;  %v533_v45 = vld [vmem:[%s7369_s3 + $0xb8] sm:$0xff]  ;;  %v6007_v47 = vcombine.low %v521_v37, %v525_v38 }
 0x15b   : > { %2925 = vmatprep.subr.bf16.mxu0 %v6282_v52  ;;  %3048 = vmatprep.subr.bf16.mxu1 %v6284_v54  ;;  %v862_v52 = vld [vmem:[%s7369_s3 + $0xb00] sm:$0xff] }
 0x15c   : > { %v866_v54 = vld [vmem:[%s7369_s3 + $0xb20] sm:$0xff] }
 0x15d   : > { %v6345_v2 = vcombine.low %v862_v52, %v866_v54 }
 0x15e   : > { %2926 = vmatpush1.bf16.msra.mxu0 %v6281_v60  ;;  %3049 = vmatpush1.bf16.msra.mxu1 %v6283_v61  ;;  %v6346_v60 = vcombine.high %v862_v52, %v866_v54  ;;  %v6348_v61 = vcombine.high %v863_v55, %v867_v56  ;;  %v537_v52 = vld [vmem:[%s7369_s3 + $0xd8] sm:$0xff]  ;;  %v6015_v56 = vcombine.low %v529_v25, %v533_v45 }
 0x15f   : > { %2927 = vmatprep.subr.bf16.mxu0 %v6290_v62  ;;  %3050 = vmatprep.subr.bf16.mxu1 %v6292_v63  ;;  %v870_v62 = vld [vmem:[%s7369_s3 + $0xb40] sm:$0xff]  ;;  %v541_v54 = vld [vmem:[%s7369_s3 + $0xf8] sm:$0xff] }
 0x160   : > { %v874_v63 = vld [vmem:[%s7369_s3 + $0xb60] sm:$0xff] }
 0x161   : > { %v6353_v10 = vcombine.low %v870_v62, %v874_v63 }
 0x162   : > { %2928 = vmatpush1.bf16.msra.mxu0 %v6289_v4  ;;  %3051 = vmatpush1.bf16.msra.mxu1 %v6291_v5  ;;  %v6354_v4 = vcombine.high %v870_v62, %v874_v63  ;;  %v6356_v5 = vcombine.high %v871_v0, %v875_v1  ;;  %v545_v62 = vld [vmem:[%s7369_s3 + $0x118] sm:$0xff] }
 0x163   : > { %2929 = vmatprep.subr.bf16.mxu0 %v6298_v6  ;;  %3052 = vmatprep.subr.bf16.mxu1 %v6300_v7  ;;  %v878_v6 = vld [vmem:[%s7369_s3 + $0xb80] sm:$0xff]  ;;  %v549_v63 = vld [vmem:[%s7369_s3 + $0x138] sm:$0xff] }
 0x164   : > { %v882_v7 = vld [vmem:[%s7369_s3 + $0xba0] sm:$0xff] }
 0x165   : > { %v6361_v20 = vcombine.low %v878_v6, %v882_v7 }
 0x166   : > { %2930 = vmatpush1.bf16.msra.mxu0 %v6297_v13  ;;  %3053 = vmatpush1.bf16.msra.mxu1 %v6299_v14  ;;  %v6362_v13 = vcombine.high %v878_v6, %v882_v7  ;;  %v6364_v14 = vcombine.high %v879_v8, %v883_v9  ;;  %v557_v6 = vld [vmem:[%s7369_s3 + $0x178] sm:$0xff]  ;;  %v6031_v8 = vcombine.low %v545_v62, %v549_v63 }
 0x167   : > { %2931 = vmatprep.subr.bf16.mxu0 %v6306_v16  ;;  %3054 = vmatprep.subr.bf16.mxu1 %v6308_v17  ;;  %v886_v16 = vld [vmem:[%s7369_s3 + $0xbc0] sm:$0xff] }
 0x168   : > { %v890_v17 = vld [vmem:[%s7369_s3 + $0xbe0] sm:$0xff] }
 0x169   : > { %v6369_v30 = vcombine.low %v886_v16, %v890_v17 }
 0x16a   : > { %2932 = vmatpush1.bf16.msra.mxu0 %v6305_v23  ;;  %3055 = vmatpush1.bf16.msra.mxu1 %v6307_v24  ;;  %v6370_v23 = vcombine.high %v886_v16, %v890_v17  ;;  %v6372_v24 = vcombine.high %v887_v18, %v891_v19  ;;  %v565_v16 = vld [vmem:[%s7369_s3 + $0x1b8] sm:$0xff] }
 0x16b   : > { %2933 = vmatprep.subr.bf16.mxu0 %v6314_v26  ;;  %3056 = vmatprep.subr.bf16.mxu1 %v6316_v27  ;;  %v512_v26 = vld [vmem:[%s7369_s3 + $0x10] sm:$0xff] }
 0x16c   : > { %v516_v27 = vld [vmem:[%s7369_s3 + $0x30] sm:$0xff] }
 0x16d   : > { %v5997_v39 = vcombine.low %v512_v26, %v516_v27 }
 0x16e   : > { %2934 = vmatpush1.bf16.msra.mxu0 %v6313_v32  ;;  %3057 = vmatpush1.bf16.msra.mxu1 %v6315_v33  ;;  %v5998_v32 = vcombine.high %v512_v26, %v516_v27  ;;  %v6000_v33 = vcombine.high %v513_v28, %v517_v29  ;;  %v573_v26 = vld [vmem:[%s7369_s3 + $0x1f8] sm:$0xff] }
 0x16f   : > { %2935 = vmatprep.subr.bf16.mxu0 %v6322_v34  ;;  %3058 = vmatprep.subr.bf16.mxu1 %v6324_v35  ;;  %v520_v34 = vld [vmem:[%s7369_s3 + $0x50] sm:$0xff] }
 0x170   : > { %v524_v35 = vld [vmem:[%s7369_s3 + $0x70] sm:$0xff] }
 0x171   : > { %v6005_v46 = vcombine.low %v520_v34, %v524_v35 }
 0x172   : > { %2936 = vmatpush1.bf16.msra.mxu0 %v6321_v40  ;;  %3059 = vmatpush1.bf16.msra.mxu1 %v6323_v41  ;;  %v5999_v40 = vcombine.low %v513_v28, %v517_v29  ;;  %v6006_v41 = vcombine.high %v520_v34, %v524_v35  ;;  %v581_v34 = vld [vmem:[%s7369_s3 + $0x238] sm:$0xff] }
 0x173   : > { %2937 = vmatprep.subr.bf16.mxu0 %v6330_v42  ;;  %3060 = vmatprep.subr.bf16.mxu1 %v6332_v43  ;;  %v6008_v42 = vcombine.high %v521_v37, %v525_v38  ;;  %v528_v43 = vld [vmem:[%s7369_s3 + $0x90] sm:$0xff] }
 0x174   : > { %v6013_v55 = vcombine.low %v528_v43, %v532_v44 }
 0x176   : > { %2938 = vmatpush1.bf16.msra.mxu0 %v6329_v48  ;;  %3061 = vmatpush1.bf16.msra.mxu1 %v6331_v49  ;;  %v6014_v48 = vcombine.high %v528_v43, %v532_v44  ;;  %v6016_v49 = vcombine.high %v529_v25, %v533_v45  ;;  %v589_v43 = vld [vmem:[%s7369_s3 + $0x278] sm:$0xff] }
 0x177   : > { %2939 = vmatprep.subr.bf16.mxu0 %v6338_v50  ;;  %3062 = vmatprep.subr.bf16.mxu1 %v6340_v51  ;;  %v536_v50 = vld [vmem:[%s7369_s3 + $0xd0] sm:$0xff] }
 0x178   : > { %v540_v51 = vld [vmem:[%s7369_s3 + $0xf0] sm:$0xff] }
 0x179   : > { %v6021_v0 = vcombine.low %v536_v50, %v540_v51 }
 0x17a   : > { %2940 = vmatpush1.bf16.msra.mxu0 %v6337_v58  ;;  %3063 = vmatpush1.bf16.msra.mxu1 %v6339_v59  ;;  %v6022_v58 = vcombine.high %v536_v50, %v540_v51  ;;  %v6024_v59 = vcombine.high %v537_v52, %v541_v54  ;;  %v597_v50 = vld [vmem:[%s7369_s3 + $0x2b8] sm:$0xff] }
 0x17b   : > { %2941 = vmatprep.subr.bf16.mxu0 %v6346_v60  ;;  %3064 = vmatprep.subr.bf16.mxu1 %v6348_v61  ;;  %v544_v60 = vld [vmem:[%s7369_s3 + $0x110] sm:$0xff] }
 0x17c   : > { %v548_v61 = vld [vmem:[%s7369_s3 + $0x130] sm:$0xff] }
 0x17d   : > { %v6030_v1 = vcombine.high %v544_v60, %v548_v61  ;;  %v6029_v7 = vcombine.low %v544_v60, %v548_v61  ;;  %v605_v60 = vld [vmem:[%s7369_s3 + $0x2f8] sm:$0xff] }
 0x17e   : > { %2942 = vmatpush1.bf16.msra.mxu0 %v6345_v2  ;;  %3065 = vmatpush1.bf16.msra.mxu1 %v6347_v3  ;;  %v6032_v2 = vcombine.high %v545_v62, %v549_v63  ;;  %v552_v3 = vld [vmem:[%s7369_s3 + $0x150] sm:$0xff] }
 0x17f   : > { %2943 = vmatprep.subr.bf16.mxu0 %v6354_v4  ;;  %3066 = vmatprep.subr.bf16.mxu1 %v6356_v5  ;;  %v556_v4 = vld [vmem:[%s7369_s3 + $0x170] sm:$0xff]  ;;  %v553_v5 = vld [vmem:[%s7369_s3 + $0x158] sm:$0xff] }
 0x180   : > { %v6038_v9 = vcombine.high %v552_v3, %v556_v4  ;;  %v6037_v17 = vcombine.low %v552_v3, %v556_v4  ;;  %v6039_v18 = vcombine.low %v553_v5, %v557_v6  ;;  %v613_v3 = vld [vmem:[%s7369_s3 + $0x338] sm:$0xff] }
 0x182   : > { %2944 = vmatpush1.bf16.msra.mxu0 %v6353_v10  ;;  %3067 = vmatpush1.bf16.msra.mxu1 %v6355_v11  ;;  %v6040_v10 = vcombine.high %v553_v5, %v557_v6  ;;  %v560_v11 = vld [vmem:[%s7369_s3 + $0x190] sm:$0xff] }
 0x183   : > { %2945 = vmatprep.subr.bf16.mxu0 %v6362_v13  ;;  %3068 = vmatprep.subr.bf16.mxu1 %v6364_v14  ;;  %v564_v13 = vld [vmem:[%s7369_s3 + $0x1b0] sm:$0xff]  ;;  %v561_v14 = vld [vmem:[%s7369_s3 + $0x198] sm:$0xff] }
 0x184   : > { %v6046_v19 = vcombine.high %v560_v11, %v564_v13  ;;  %v6045_v27 = vcombine.low %v560_v11, %v564_v13  ;;  %v6047_v28 = vcombine.low %v561_v14, %v565_v16  ;;  %v621_v11 = vld [vmem:[%s7369_s3 + $0x378] sm:$0xff] }
 0x186   : > { %2946 = vmatpush1.bf16.msra.mxu0 %v6361_v20  ;;  %3069 = vmatpush1.bf16.msra.mxu1 %v6363_v21  ;;  %v6048_v20 = vcombine.high %v561_v14, %v565_v16  ;;  %v568_v21 = vld [vmem:[%s7369_s3 + $0x1d0] sm:$0xff] }
 0x187   : > { %2947 = vmatprep.subr.bf16.mxu0 %v6370_v23  ;;  %3070 = vmatprep.subr.bf16.mxu1 %v6372_v24  ;;  %v572_v23 = vld [vmem:[%s7369_s3 + $0x1f0] sm:$0xff]  ;;  %v569_v24 = vld [vmem:[%s7369_s3 + $0x1d8] sm:$0xff] }
 0x188   : > { %v6054_v29 = vcombine.high %v568_v21, %v572_v23  ;;  %v6053_v35 = vcombine.low %v568_v21, %v572_v23  ;;  %v6055_v37 = vcombine.low %v569_v24, %v573_v26  ;;  %v629_v21 = vld [vmem:[%s7369_s3 + $0x3b8] sm:$0xff] }
 0x18a   : > { %2948 = vmatpush1.bf16.msra.mxu0 %v6369_v30  ;;  %3071 = vmatpush1.bf16.msra.mxu1 %v6371_v31  ;;  %v6056_v30 = vcombine.high %v569_v24, %v573_v26  ;;  %v576_v31 = vld [vmem:[%s7369_s3 + $0x210] sm:$0xff] }
 0x18b   : > { %3081 = vmatprep.subr.bf16.mxu0 %v5998_v32  ;;  %3204 = vmatprep.subr.bf16.mxu1 %v6000_v33  ;;  %v580_v32 = vld [vmem:[%s7369_s3 + $0x230] sm:$0xff]  ;;  %v577_v33 = vld [vmem:[%s7369_s3 + $0x218] sm:$0xff] }
 0x18c   : > { %v6062_v38 = vcombine.high %v576_v31, %v580_v32  ;;  %v6061_v44 = vcombine.low %v576_v31, %v580_v32  ;;  %v6063_v25 = vcombine.low %v577_v33, %v581_v34  ;;  %v637_v31 = vld [vmem:[%s7369_s3 + $0x3f8] sm:$0xff] }
 0x18d   : > { %2950 = vmatmul.mubr.bf16.vlgmr.msra.gmra.mrb[0].mxu0 %v7669_v36  ;;  %3073 = vmatmul.mubr.bf16.vlgmr.msra.gmra.mrb[0].mxu1 %v7669_v36 }
 0x18e   : > { %3082 = vmatpush1.bf16.msra.mxu0 %v5997_v39  ;;  %3205 = vmatpush1.bf16.msra.mxu1 %v5999_v40  ;;  %v6064_v39 = vcombine.high %v577_v33, %v581_v34  ;;  %v584_v40 = vld [vmem:[%s7369_s3 + $0x250] sm:$0xff] }
 0x18f   : > { %3083 = vmatprep.subr.bf16.mxu0 %v6006_v41  ;;  %3206 = vmatprep.subr.bf16.mxu1 %v6008_v42  ;;  %v588_v41 = vld [vmem:[%s7369_s3 + $0x270] sm:$0xff]  ;;  %v585_v42 = vld [vmem:[%s7369_s3 + $0x258] sm:$0xff] }
 0x190   : > { %3113 = vmatprep.mubr.bf16.mxu0 %v7465_v57  ;;  %3236 = vmatprep.mubr.bf16.mxu1 %v7465_v57  ;;  %v6023_v57 = vcombine.low %v537_v52, %v541_v54  ;;  %v6070_v45 = vcombine.high %v584_v40, %v588_v41  ;;  %v6069_v51 = vcombine.low %v584_v40, %v588_v41  ;;  %v645_v40 = vld [vmem:[%s7369_s3 + $0x438] sm:$0xff] }
 0x191   : > { %v6071_v52 = vcombine.low %v585_v42, %v589_v43 }
 0x192   : > { %3084 = vmatpush1.bf16.msra.mxu0 %v6005_v46  ;;  %3207 = vmatpush1.bf16.msra.mxu1 %v6007_v47  ;;  %v6072_v46 = vcombine.high %v585_v42, %v589_v43  ;;  %v592_v47 = vld [vmem:[%s7369_s3 + $0x290] sm:$0xff] }
 0x193   : > { %3085 = vmatprep.subr.bf16.mxu0 %v6014_v48  ;;  %3208 = vmatprep.subr.bf16.mxu1 %v6016_v49  ;;  %v596_v48 = vld [vmem:[%s7369_s3 + $0x2b0] sm:$0xff]  ;;  %v593_v49 = vld [vmem:[%s7369_s3 + $0x298] sm:$0xff] }
 0x194   : > { %v6078_v54 = vcombine.high %v592_v47, %v596_v48  ;;  %v6077_v61 = vcombine.low %v592_v47, %v596_v48  ;;  %v6079_v62 = vcombine.low %v593_v49, %v597_v50  ;;  %v653_v47 = vld [vmem:[%s7369_s3 + $0x478] sm:$0xff] }
 0x196   : > { %3086 = vmatpush1.bf16.msra.mxu0 %v6013_v55  ;;  %3209 = vmatpush1.bf16.msra.mxu1 %v6015_v56  ;;  %v6080_v55 = vcombine.high %v593_v49, %v597_v50  ;;  %v600_v56 = vld [vmem:[%s7369_s3 + $0x2d0] sm:$0xff] }
 0x197   : > { %3087 = vmatprep.subr.bf16.mxu0 %v6022_v58  ;;  %3210 = vmatprep.subr.bf16.mxu1 %v6024_v59  ;;  %v604_v58 = vld [vmem:[%s7369_s3 + $0x2f0] sm:$0xff]  ;;  %v601_v59 = vld [vmem:[%s7369_s3 + $0x2d8] sm:$0xff] }
 0x198   : > { %v6086_v63 = vcombine.high %v600_v56, %v604_v58  ;;  %v6085_v4 = vcombine.low %v600_v56, %v604_v58  ;;  %v6087_v5 = vcombine.low %v601_v59, %v605_v60  ;;  %v661_v56 = vld [vmem:[%s7369_s3 + $0x4b8] sm:$0xff] }
 0x19a   : > { %3088 = vmatpush1.bf16.msra.mxu0 %v6021_v0  ;;  %3211 = vmatpush1.bf16.msra.mxu1 %v6023_v57  ;;  %v6088_v0 = vcombine.high %v601_v59, %v605_v60  ;;  %v608_v57 = vld [vmem:[%s7369_s3 + $0x310] sm:$0xff] }
 0x19b   : > { %3089 = vmatprep.subr.bf16.mxu0 %v6030_v1  ;;  %3212 = vmatprep.subr.bf16.mxu1 %v6032_v2  ;;  %v612_v1 = vld [vmem:[%s7369_s3 + $0x330] sm:$0xff]  ;;  %v609_v2 = vld [vmem:[%s7369_s3 + $0x318] sm:$0xff] }
 0x19c   : > { %v6094_v6 = vcombine.high %v608_v57, %v612_v1  ;;  %v6093_v13 = vcombine.low %v608_v57, %v612_v1  ;;  %v6095_v14 = vcombine.low %v609_v2, %v613_v3  ;;  %v669_v57 = vld [vmem:[%s7369_s3 + $0x4f8] sm:$0xff] }
 0x19e   : > { %3090 = vmatpush1.bf16.msra.mxu0 %v6029_v7  ;;  %3213 = vmatpush1.bf16.msra.mxu1 %v6031_v8  ;;  %v6096_v7 = vcombine.high %v609_v2, %v613_v3  ;;  %v616_v8 = vld [vmem:[%s7369_s3 + $0x350] sm:$0xff] }
 0x19f   : > { %3091 = vmatprep.subr.bf16.mxu0 %v6038_v9  ;;  %3214 = vmatprep.subr.bf16.mxu1 %v6040_v10  ;;  %v620_v9 = vld [vmem:[%s7369_s3 + $0x370] sm:$0xff]  ;;  %v617_v10 = vld [vmem:[%s7369_s3 + $0x358] sm:$0xff] }
 0x1a0   : > { %v6102_v16 = vcombine.high %v616_v8, %v620_v9  ;;  %v6101_v23 = vcombine.low %v616_v8, %v620_v9  ;;  %v6103_v24 = vcombine.low %v617_v10, %v621_v11 }
 0x1a2   : > { %3092 = vmatpush1.bf16.msra.mxu0 %v6037_v17  ;;  %3215 = vmatpush1.bf16.msra.mxu1 %v6039_v18  ;;  %v6104_v17 = vcombine.high %v617_v10, %v621_v11  ;;  %v624_v18 = vld [vmem:[%s7369_s3 + $0x390] sm:$0xff] }
 0x1a3   : > { %3093 = vmatprep.subr.bf16.mxu0 %v6046_v19  ;;  %3216 = vmatprep.subr.bf16.mxu1 %v6048_v20  ;;  %v628_v19 = vld [vmem:[%s7369_s3 + $0x3b0] sm:$0xff]  ;;  %v625_v20 = vld [vmem:[%s7369_s3 + $0x398] sm:$0xff] }
 0x1a4   : > { %v6110_v26 = vcombine.high %v624_v18, %v628_v19  ;;  %v6109_v32 = vcombine.low %v624_v18, %v628_v19  ;;  %v6111_v33 = vcombine.low %v625_v20, %v629_v21  ;;  %v680_v11 = vld [vmem:[%s7369_s3 + $0x550] sm:$0xff] }
 0x1a6   : > { %3094 = vmatpush1.bf16.msra.mxu0 %v6045_v27  ;;  %3217 = vmatpush1.bf16.msra.mxu1 %v6047_v28  ;;  %v6112_v27 = vcombine.high %v625_v20, %v629_v21  ;;  %v632_v28 = vld [vmem:[%s7369_s3 + $0x3d0] sm:$0xff] }
 0x1a7   : > { %3095 = vmatprep.subr.bf16.mxu0 %v6054_v29  ;;  %3218 = vmatprep.subr.bf16.mxu1 %v6056_v30  ;;  %v636_v29 = vld [vmem:[%s7369_s3 + $0x3f0] sm:$0xff]  ;;  %v633_v30 = vld [vmem:[%s7369_s3 + $0x3d8] sm:$0xff] }
 0x1a8   : > { %v6118_v34 = vcombine.high %v632_v28, %v636_v29  ;;  %v6117_v41 = vcombine.low %v632_v28, %v636_v29  ;;  %v6119_v42 = vcombine.low %v633_v30, %v637_v31  ;;  %v688_v21 = vld [vmem:[%s7369_s3 + $0x590] sm:$0xff] }
 0x1aa   : > { %3096 = vmatpush1.bf16.msra.mxu0 %v6053_v35  ;;  %3219 = vmatpush1.bf16.msra.mxu1 %v6055_v37  ;;  %v6120_v35 = vcombine.high %v633_v30, %v637_v31  ;;  %v640_v37 = vld [vmem:[%s7369_s3 + $0x410] sm:$0xff] }
 0x1ab   : > { %3097 = vmatprep.subr.bf16.mxu0 %v6062_v38  ;;  %3220 = vmatprep.subr.bf16.mxu1 %v6064_v39  ;;  %v644_v38 = vld [vmem:[%s7369_s3 + $0x430] sm:$0xff]  ;;  %v641_v39 = vld [vmem:[%s7369_s3 + $0x418] sm:$0xff] }
 0x1ac   : > { %v6126_v43 = vcombine.high %v640_v37, %v644_v38  ;;  %v6125_v48 = vcombine.low %v640_v37, %v644_v38  ;;  %v6127_v49 = vcombine.low %v641_v39, %v645_v40  ;;  %v696_v31 = vld [vmem:[%s7369_s3 + $0x5d0] sm:$0xff] }
 0x1ae   : > { %3098 = vmatpush1.bf16.msra.mxu0 %v6061_v44  ;;  %3221 = vmatpush1.bf16.msra.mxu1 %v6063_v25  ;;  %v6128_v44 = vcombine.high %v641_v39, %v645_v40  ;;  %v648_v25 = vld [vmem:[%s7369_s3 + $0x450] sm:$0xff] }
 0x1af   : > { %3099 = vmatprep.subr.bf16.mxu0 %v6070_v45  ;;  %3222 = vmatprep.subr.bf16.mxu1 %v6072_v46  ;;  %v652_v45 = vld [vmem:[%s7369_s3 + $0x470] sm:$0xff]  ;;  %v649_v46 = vld [vmem:[%s7369_s3 + $0x458] sm:$0xff] }
 0x1b0   : > { %v6134_v50 = vcombine.high %v648_v25, %v652_v45  ;;  %v6133_v58 = vcombine.low %v648_v25, %v652_v45  ;;  %v6135_v59 = vcombine.low %v649_v46, %v653_v47  ;;  %v704_v40 = vld [vmem:[%s7369_s3 + $0x610] sm:$0xff] }
 0x1b2   : > { %3100 = vmatpush1.bf16.msra.mxu0 %v6069_v51  ;;  %3223 = vmatpush1.bf16.msra.mxu1 %v6071_v52  ;;  %v6136_v51 = vcombine.high %v649_v46, %v653_v47  ;;  %v656_v52 = vld [vmem:[%s7369_s3 + $0x490] sm:$0xff] }
 0x1b3   : > { %3101 = vmatprep.subr.bf16.mxu0 %v6078_v54  ;;  %3224 = vmatprep.subr.bf16.mxu1 %v6080_v55  ;;  %v660_v54 = vld [vmem:[%s7369_s3 + $0x4b0] sm:$0xff]  ;;  %v657_v55 = vld [vmem:[%s7369_s3 + $0x498] sm:$0xff] }
 0x1b4   : > { %v6142_v60 = vcombine.high %v656_v52, %v660_v54  ;;  %v6143_v1 = vcombine.low %v657_v55, %v661_v56  ;;  %v712_v47 = vld [vmem:[%s7369_s3 + $0x650] sm:$0xff] }
 0x1b6   : > { %3102 = vmatpush1.bf16.msra.mxu0 %v6077_v61  ;;  %3225 = vmatpush1.bf16.msra.mxu1 %v6079_v62  ;;  %v6144_v61 = vcombine.high %v657_v55, %v661_v56  ;;  %v664_v62 = vld [vmem:[%s7369_s3 + $0x4d0] sm:$0xff] }
 0x1b7   : > { %3103 = vmatprep.subr.bf16.mxu0 %v6086_v63  ;;  %3226 = vmatprep.subr.bf16.mxu1 %v6088_v0  ;;  %v668_v63 = vld [vmem:[%s7369_s3 + $0x4f0] sm:$0xff]  ;;  %v665_v0 = vld [vmem:[%s7369_s3 + $0x4d8] sm:$0xff] }
 0x1b8   : > { %v6150_v2 = vcombine.high %v664_v62, %v668_v63  ;;  %v6152_v3 = vcombine.high %v665_v0, %v669_v57  ;;  %v6149_v8 = vcombine.low %v664_v62, %v668_v63  ;;  %v720_v56 = vld [vmem:[%s7369_s3 + $0x690] sm:$0xff] }
 0x1ba   : > { %3104 = vmatpush1.bf16.msra.mxu0 %v6085_v4  ;;  %3227 = vmatpush1.bf16.msra.mxu1 %v6087_v5  ;;  %v672_v4 = vld [vmem:[%s7369_s3 + $0x510] sm:$0xff] }
 0x1bb   : > { %3105 = vmatprep.subr.bf16.mxu0 %v6094_v6  ;;  %3228 = vmatprep.subr.bf16.mxu1 %v6096_v7  ;;  %v676_v5 = vld [vmem:[%s7369_s3 + $0x530] sm:$0xff]  ;;  %v673_v6 = vld [vmem:[%s7369_s3 + $0x518] sm:$0xff] }
 0x1bc   : > { %v677_v7 = vld [vmem:[%s7369_s3 + $0x538] sm:$0xff]  ;;  %v6158_v9 = vcombine.high %v672_v4, %v676_v5 }
 0x1bd   : > { %v6160_v10 = vcombine.high %v673_v6, %v677_v7  ;;  %v6159_v18 = vcombine.low %v673_v6, %v677_v7  ;;  %v736_v7 = vld [vmem:[%s7369_s3 + $0x710] sm:$0xff] }
 0x1be   : > { %3106 = vmatpush1.bf16.msra.mxu0 %v6093_v13  ;;  %3229 = vmatpush1.bf16.msra.mxu1 %v6095_v14  ;;  %v684_v13 = vld [vmem:[%s7369_s3 + $0x570] sm:$0xff]  ;;  %v681_v14 = vld [vmem:[%s7369_s3 + $0x558] sm:$0xff] }
 0x1bf   : > { %3107 = vmatprep.subr.bf16.mxu0 %v6102_v16  ;;  %3230 = vmatprep.subr.bf16.mxu1 %v6104_v17  ;;  %v685_v16 = vld [vmem:[%s7369_s3 + $0x578] sm:$0xff]  ;;  %v6157_v17 = vcombine.low %v672_v4, %v676_v5  ;;  %v6166_v19 = vcombine.high %v680_v11, %v684_v13 }
 0x1c0   : > { %v6168_v20 = vcombine.high %v681_v14, %v685_v16  ;;  %v6167_v28 = vcombine.low %v681_v14, %v685_v16  ;;  %v744_v16 = vld [vmem:[%s7369_s3 + $0x750] sm:$0xff] }
 0x1c2   : > { %3108 = vmatpush1.bf16.msra.mxu0 %v6101_v23  ;;  %3231 = vmatpush1.bf16.msra.mxu1 %v6103_v24  ;;  %v692_v23 = vld [vmem:[%s7369_s3 + $0x5b0] sm:$0xff]  ;;  %v689_v24 = vld [vmem:[%s7369_s3 + $0x598] sm:$0xff] }
 0x1c3   : > { %3109 = vmatprep.subr.bf16.mxu0 %v6110_v26  ;;  %3232 = vmatprep.subr.bf16.mxu1 %v6112_v27  ;;  %v693_v26 = vld [vmem:[%s7369_s3 + $0x5b8] sm:$0xff]  ;;  %v6165_v27 = vcombine.low %v680_v11, %v684_v13  ;;  %v6174_v29 = vcombine.high %v688_v21, %v692_v23 }
 0x1c4   : > { %v6176_v30 = vcombine.high %v689_v24, %v693_v26  ;;  %v6175_v37 = vcombine.low %v689_v24, %v693_v26  ;;  %v752_v26 = vld [vmem:[%s7369_s3 + $0x790] sm:$0xff] }
 0x1c6   : > { %3110 = vmatpush1.bf16.msra.mxu0 %v6109_v32  ;;  %3233 = vmatpush1.bf16.msra.mxu1 %v6111_v33  ;;  %v700_v32 = vld [vmem:[%s7369_s3 + $0x5f0] sm:$0xff]  ;;  %v697_v33 = vld [vmem:[%s7369_s3 + $0x5d8] sm:$0xff] }
 0x1c7   : > { %3111 = vmatprep.subr.bf16.mxu0 %v6118_v34  ;;  %3234 = vmatprep.subr.bf16.mxu1 %v6120_v35  ;;  %v701_v34 = vld [vmem:[%s7369_s3 + $0x5f8] sm:$0xff]  ;;  %v6173_v35 = vcombine.low %v688_v21, %v692_v23  ;;  %v6182_v38 = vcombine.high %v696_v31, %v700_v32 }
 0x1c8   : > { %v6184_v39 = vcombine.high %v697_v33, %v701_v34  ;;  %v6183_v25 = vcombine.low %v697_v33, %v701_v34  ;;  %v760_v34 = vld [vmem:[%s7369_s3 + $0x7d0] sm:$0xff] }
 0x1ca   : > { %3112 = vmatpush1.bf16.msra.mxu0 %v6117_v41  ;;  %3235 = vmatpush1.bf16.msra.mxu1 %v6119_v42  ;;  %v708_v41 = vld [vmem:[%s7369_s3 + $0x630] sm:$0xff]  ;;  %v705_v42 = vld [vmem:[%s7369_s3 + $0x618] sm:$0xff] }
 0x1cb   : > { %3122 = vmatprep.subr.bf16.mxu0 %v6126_v43  ;;  %3245 = vmatprep.subr.bf16.mxu1 %v6128_v44  ;;  %v709_v43 = vld [vmem:[%s7369_s3 + $0x638] sm:$0xff]  ;;  %v6181_v44 = vcombine.low %v696_v31, %v700_v32  ;;  %v6190_v45 = vcombine.high %v704_v40, %v708_v41 }
 0x1cc   : > { %v6192_v46 = vcombine.high %v705_v42, %v709_v43 }
 0x1cd   : > { %3114 = vmatmul.mubr.bf16.vlgmr.msra.gmra.mrb[4].mxu0 %v7511_v12  ;;  %3237 = vmatmul.mubr.bf16.vlgmr.msra.gmra.mrb[4].mxu1 %v7511_v12  ;;  %v6141_v12 = vcombine.low %v656_v52, %v660_v54  ;;  %v6191_v52 = vcombine.low %v705_v42, %v709_v43  ;;  %v768_v43 = vld [vmem:[%s7369_s3 + $0x810] sm:$0xff] }
 0x1ce   : > { %3123 = vmatpush1.bf16.msra.mxu0 %v6125_v48  ;;  %3246 = vmatpush1.bf16.msra.mxu1 %v6127_v49  ;;  %v716_v48 = vld [vmem:[%s7369_s3 + $0x670] sm:$0xff]  ;;  %v713_v49 = vld [vmem:[%s7369_s3 + $0x658] sm:$0xff] }
 0x1cf   : > { %3124 = vmatprep.subr.bf16.mxu0 %v6134_v50  ;;  %3247 = vmatprep.subr.bf16.mxu1 %v6136_v51  ;;  %v717_v50 = vld [vmem:[%s7369_s3 + $0x678] sm:$0xff]  ;;  %v6189_v51 = vcombine.low %v704_v40, %v708_v41  ;;  %v6198_v54 = vcombine.high %v712_v47, %v716_v48 }
 0x1d0   : > { %3154 = vmatprep.mubr.bf16.mxu0 %v7522_v53  ;;  %3277 = vmatprep.mubr.bf16.mxu1 %v7522_v53  ;;  %v6151_v53 = vcombine.low %v665_v0, %v669_v57  ;;  %v6200_v55 = vcombine.high %v713_v49, %v717_v50  ;;  %v6199_v62 = vcombine.low %v713_v49, %v717_v50  ;;  %v728_v57 = vld [vmem:[%s7369_s3 + $0x6d0] sm:$0xff] }
 0x1d1   : > { %v776_v50 = vld [vmem:[%s7369_s3 + $0x850] sm:$0xff] }
 0x1d2   : > { %3125 = vmatpush1.bf16.msra.mxu0 %v6133_v58  ;;  %3248 = vmatpush1.bf16.msra.mxu1 %v6135_v59  ;;  %v724_v58 = vld [vmem:[%s7369_s3 + $0x6b0] sm:$0xff]  ;;  %v721_v59 = vld [vmem:[%s7369_s3 + $0x698] sm:$0xff] }
 0x1d3   : > { %3126 = vmatprep.subr.bf16.mxu0 %v6142_v60  ;;  %3249 = vmatprep.subr.bf16.mxu1 %v6144_v61  ;;  %v725_v60 = vld [vmem:[%s7369_s3 + $0x6b8] sm:$0xff]  ;;  %v6197_v61 = vcombine.low %v712_v47, %v716_v48  ;;  %v6206_v63 = vcombine.high %v720_v56, %v724_v58 }
 0x1d4   : > { %v6208_v0 = vcombine.high %v721_v59, %v725_v60  ;;  %v6207_v4 = vcombine.low %v721_v59, %v725_v60  ;;  %v784_v60 = vld [vmem:[%s7369_s3 + $0x890] sm:$0xff] }
 0x1d6   : > { %3127 = vmatpush1.bf16.msra.mxu0 %v6141_v12  ;;  %3250 = vmatpush1.bf16.msra.mxu1 %v6143_v1  ;;  %v732_v12 = vld [vmem:[%s7369_s3 + $0x6f0] sm:$0xff]  ;;  %v729_v1 = vld [vmem:[%s7369_s3 + $0x6d8] sm:$0xff] }
 0x1d7   : > { %3128 = vmatprep.subr.bf16.mxu0 %v6150_v2  ;;  %3251 = vmatprep.subr.bf16.mxu1 %v6152_v3  ;;  %v733_v2 = vld [vmem:[%s7369_s3 + $0x6f8] sm:$0xff]  ;;  %v6205_v3 = vcombine.low %v720_v56, %v724_v58  ;;  %v6214_v5 = vcombine.high %v728_v57, %v732_v12 }
 0x1d8   : > { %v6216_v6 = vcombine.high %v729_v1, %v733_v2  ;;  %v6215_v11 = vcombine.low %v729_v1, %v733_v2  ;;  %v792_v2 = vld [vmem:[%s7369_s3 + $0x8d0] sm:$0xff] }
 0x1da   : > { %3129 = vmatpush1.bf16.msra.mxu0 %v6149_v8  ;;  %3252 = vmatpush1.bf16.msra.mxu1 %v6151_v53  ;;  %v740_v8 = vld [vmem:[%s7369_s3 + $0x730] sm:$0xff]  ;;  %v737_v53 = vld [vmem:[%s7369_s3 + $0x718] sm:$0xff] }
 0x1db   : > { %3130 = vmatprep.subr.bf16.mxu0 %v6158_v9  ;;  %3253 = vmatprep.subr.bf16.mxu1 %v6160_v10  ;;  %v741_v9 = vld [vmem:[%s7369_s3 + $0x738] sm:$0xff]  ;;  %v6213_v10 = vcombine.low %v728_v57, %v732_v12  ;;  %v6222_v13 = vcombine.high %v736_v7, %v740_v8 }
 0x1dc   : > { %v6224_v14 = vcombine.high %v737_v53, %v741_v9  ;;  %v6223_v21 = vcombine.low %v737_v53, %v741_v9  ;;  %v800_v53 = vld [vmem:[%s7369_s3 + $0x910] sm:$0xff] }
 0x1dd   : > { %v804_v9 = vld [vmem:[%s7369_s3 + $0x930] sm:$0xff] }
 0x1de   : > { %3131 = vmatpush1.bf16.msra.mxu0 %v6157_v17  ;;  %3254 = vmatpush1.bf16.msra.mxu1 %v6159_v18  ;;  %v748_v17 = vld [vmem:[%s7369_s3 + $0x770] sm:$0xff]  ;;  %v745_v18 = vld [vmem:[%s7369_s3 + $0x758] sm:$0xff] }
 0x1df   : > { %3132 = vmatprep.subr.bf16.mxu0 %v6166_v19  ;;  %3255 = vmatprep.subr.bf16.mxu1 %v6168_v20  ;;  %v749_v19 = vld [vmem:[%s7369_s3 + $0x778] sm:$0xff]  ;;  %v6221_v20 = vcombine.low %v736_v7, %v740_v8  ;;  %v6230_v23 = vcombine.high %v744_v16, %v748_v17 }
 0x1e0   : > { %v6232_v24 = vcombine.high %v745_v18, %v749_v19  ;;  %v6231_v31 = vcombine.low %v745_v18, %v749_v19  ;;  %v812_v18 = vld [vmem:[%s7369_s3 + $0x970] sm:$0xff]  ;;  %v809_v19 = vld [vmem:[%s7369_s3 + $0x958] sm:$0xff] }
 0x1e2   : > { %3133 = vmatpush1.bf16.msra.mxu0 %v6165_v27  ;;  %3256 = vmatpush1.bf16.msra.mxu1 %v6167_v28  ;;  %v756_v27 = vld [vmem:[%s7369_s3 + $0x7b0] sm:$0xff]  ;;  %v753_v28 = vld [vmem:[%s7369_s3 + $0x798] sm:$0xff] }
 0x1e3   : > { %3134 = vmatprep.subr.bf16.mxu0 %v6174_v29  ;;  %3257 = vmatprep.subr.bf16.mxu1 %v6176_v30  ;;  %v757_v29 = vld [vmem:[%s7369_s3 + $0x7b8] sm:$0xff]  ;;  %v6229_v30 = vcombine.low %v744_v16, %v748_v17  ;;  %v6238_v32 = vcombine.high %v752_v26, %v756_v27  ;;  %v808_v17 = vld [vmem:[%s7369_s3 + $0x950] sm:$0xff] }
 0x1e4   : > { %v6240_v33 = vcombine.high %v753_v28, %v757_v29  ;;  %v6239_v40 = vcombine.low %v753_v28, %v757_v29  ;;  %v820_v28 = vld [vmem:[%s7369_s3 + $0x9b0] sm:$0xff]  ;;  %v817_v29 = vld [vmem:[%s7369_s3 + $0x998] sm:$0xff] }
 0x1e6   : > { %3135 = vmatpush1.bf16.msra.mxu0 %v6173_v35  ;;  %3258 = vmatpush1.bf16.msra.mxu1 %v6175_v37  ;;  %v764_v35 = vld [vmem:[%s7369_s3 + $0x7f0] sm:$0xff]  ;;  %v761_v37 = vld [vmem:[%s7369_s3 + $0x7d8] sm:$0xff] }
 0x1e7   : > { %3136 = vmatprep.subr.bf16.mxu0 %v6182_v38  ;;  %3259 = vmatprep.subr.bf16.mxu1 %v6184_v39  ;;  %v765_v38 = vld [vmem:[%s7369_s3 + $0x7f8] sm:$0xff]  ;;  %v6237_v39 = vcombine.low %v752_v26, %v756_v27  ;;  %v6246_v41 = vcombine.high %v760_v34, %v764_v35  ;;  %v816_v27 = vld [vmem:[%s7369_s3 + $0x990] sm:$0xff] }
 0x1e8   : > { %v6248_v42 = vcombine.high %v761_v37, %v765_v38  ;;  %v6247_v47 = vcombine.low %v761_v37, %v765_v38  ;;  %v828_v37 = vld [vmem:[%s7369_s3 + $0x9f0] sm:$0xff]  ;;  %v825_v38 = vld [vmem:[%s7369_s3 + $0x9d8] sm:$0xff] }
 0x1ea   : > { %3137 = vmatpush1.bf16.msra.mxu0 %v6181_v44  ;;  %3260 = vmatpush1.bf16.msra.mxu1 %v6183_v25  ;;  %v772_v44 = vld [vmem:[%s7369_s3 + $0x830] sm:$0xff]  ;;  %v769_v25 = vld [vmem:[%s7369_s3 + $0x818] sm:$0xff] }
 0x1eb   : > { %3138 = vmatprep.subr.bf16.mxu0 %v6190_v45  ;;  %3261 = vmatprep.subr.bf16.mxu1 %v6192_v46  ;;  %v773_v45 = vld [vmem:[%s7369_s3 + $0x838] sm:$0xff]  ;;  %v6245_v46 = vcombine.low %v760_v34, %v764_v35  ;;  %v6254_v48 = vcombine.high %v768_v43, %v772_v44  ;;  %v824_v35 = vld [vmem:[%s7369_s3 + $0x9d0] sm:$0xff] }
 0x1ec   : > { %v6256_v49 = vcombine.high %v769_v25, %v773_v45  ;;  %v6255_v56 = vcombine.low %v769_v25, %v773_v45  ;;  %v836_v25 = vld [vmem:[%s7369_s3 + $0xa30] sm:$0xff]  ;;  %v833_v45 = vld [vmem:[%s7369_s3 + $0xa18] sm:$0xff] }
 0x1ee   : > { %3139 = vmatpush1.bf16.msra.mxu0 %v6189_v51  ;;  %3262 = vmatpush1.bf16.msra.mxu1 %v6191_v52  ;;  %v780_v51 = vld [vmem:[%s7369_s3 + $0x870] sm:$0xff]  ;;  %v777_v52 = vld [vmem:[%s7369_s3 + $0x858] sm:$0xff] }
 0x1ef   : > { %3140 = vmatprep.subr.bf16.mxu0 %v6198_v54  ;;  %3263 = vmatprep.subr.bf16.mxu1 %v6200_v55  ;;  %v781_v54 = vld [vmem:[%s7369_s3 + $0x878] sm:$0xff]  ;;  %v6253_v55 = vcombine.low %v768_v43, %v772_v44  ;;  %v6262_v58 = vcombine.high %v776_v50, %v780_v51  ;;  %v832_v44 = vld [vmem:[%s7369_s3 + $0xa10] sm:$0xff] }
 0x1f0   : > { %v6264_v59 = vcombine.high %v777_v52, %v781_v54  ;;  %v6263_v57 = vcombine.low %v777_v52, %v781_v54  ;;  %v844_v52 = vld [vmem:[%s7369_s3 + $0xa70] sm:$0xff]  ;;  %v841_v54 = vld [vmem:[%s7369_s3 + $0xa58] sm:$0xff] }
 0x1f2   : > { %3141 = vmatpush1.bf16.msra.mxu0 %v6197_v61  ;;  %3264 = vmatpush1.bf16.msra.mxu1 %v6199_v62  ;;  %v788_v61 = vld [vmem:[%s7369_s3 + $0x8b0] sm:$0xff]  ;;  %v785_v62 = vld [vmem:[%s7369_s3 + $0x898] sm:$0xff] }
 0x1f3   : > { %3142 = vmatprep.subr.bf16.mxu0 %v6206_v63  ;;  %3265 = vmatprep.subr.bf16.mxu1 %v6208_v0  ;;  %v789_v63 = vld [vmem:[%s7369_s3 + $0x8b8] sm:$0xff]  ;;  %v6261_v0 = vcombine.low %v776_v50, %v780_v51  ;;  %v6270_v12 = vcombine.high %v784_v60, %v788_v61  ;;  %v840_v51 = vld [vmem:[%s7369_s3 + $0xa50] sm:$0xff] }
 0x1f4   : > { %v6272_v1 = vcombine.high %v785_v62, %v789_v63 }
 0x1f6   : > { %3143 = vmatpush1.bf16.msra.mxu0 %v6205_v3  ;;  %3266 = vmatpush1.bf16.msra.mxu1 %v6207_v4  ;;  %v796_v3 = vld [vmem:[%s7369_s3 + $0x8f0] sm:$0xff]  ;;  %v793_v4 = vld [vmem:[%s7369_s3 + $0x8d8] sm:$0xff] }
 0x1f7   : > { %3144 = vmatprep.subr.bf16.mxu0 %v6214_v5  ;;  %3267 = vmatprep.subr.bf16.mxu1 %v6216_v6  ;;  %v797_v5 = vld [vmem:[%s7369_s3 + $0x8f8] sm:$0xff]  ;;  %v6271_v6 = vcombine.low %v785_v62, %v789_v63  ;;  %v6278_v7 = vcombine.high %v792_v2, %v796_v3  ;;  %v852_v62 = vld [vmem:[%s7369_s3 + $0xab0] sm:$0xff] }
 0x1f8   : > { %v6280_v8 = vcombine.high %v793_v4, %v797_v5  ;;  %v849_v63 = vld [vmem:[%s7369_s3 + $0xa98] sm:$0xff] }
 0x1fa   : > { %3145 = vmatpush1.bf16.msra.mxu0 %v6213_v10  ;;  %3268 = vmatpush1.bf16.msra.mxu1 %v6215_v11  ;;  %v801_v10 = vld [vmem:[%s7369_s3 + $0x918] sm:$0xff] }
 0x1fb   : > { %3146 = vmatprep.subr.bf16.mxu0 %v6222_v13  ;;  %3269 = vmatprep.subr.bf16.mxu1 %v6224_v14  ;;  %v805_v11 = vld [vmem:[%s7369_s3 + $0x938] sm:$0xff]  ;;  %v6277_v13 = vcombine.low %v792_v2, %v796_v3  ;;  %v6286_v14 = vcombine.high %v800_v53, %v804_v9  ;;  %v856_v3 = vld [vmem:[%s7369_s3 + $0xad0] sm:$0xff] }
 0x1fc   : > { %v6288_v16 = vcombine.high %v801_v10, %v805_v11 }
 0x1fe   : > { %3147 = vmatpush1.bf16.msra.mxu0 %v6221_v20  ;;  %3270 = vmatpush1.bf16.msra.mxu1 %v6223_v21  ;;  %v813_v20 = vld [vmem:[%s7369_s3 + $0x978] sm:$0xff]  ;;  %v6285_v21 = vcombine.low %v800_v53, %v804_v9  ;;  %v864_v9 = vld [vmem:[%s7369_s3 + $0xb10] sm:$0xff] }
 0x1ff   : > { %3148 = vmatprep.subr.bf16.mxu0 %v6230_v23  ;;  %3271 = vmatprep.subr.bf16.mxu1 %v6232_v24  ;;  %v6287_v23 = vcombine.low %v801_v10, %v805_v11  ;;  %v6294_v24 = vcombine.high %v808_v17, %v812_v18  ;;  %v6296_v26 = vcombine.high %v809_v19, %v813_v20  ;;  %v868_v10 = vld [vmem:[%s7369_s3 + $0xb30] sm:$0xff]  ;;  %v865_v11 = vld [vmem:[%s7369_s3 + $0xb18] sm:$0xff] }
 0x202   : > { %3149 = vmatpush1.bf16.msra.mxu0 %v6229_v30  ;;  %3272 = vmatpush1.bf16.msra.mxu1 %v6231_v31  ;;  %v821_v30 = vld [vmem:[%s7369_s3 + $0x9b8] sm:$0xff]  ;;  %v6293_v31 = vcombine.low %v808_v17, %v812_v18  ;;  %v872_v18 = vld [vmem:[%s7369_s3 + $0xb50] sm:$0xff] }
 0x203   : > { %3150 = vmatprep.subr.bf16.mxu0 %v6238_v32  ;;  %3273 = vmatprep.subr.bf16.mxu1 %v6240_v33  ;;  %v6295_v32 = vcombine.low %v809_v19, %v813_v20  ;;  %v6302_v33 = vcombine.high %v816_v27, %v820_v28  ;;  %v6304_v34 = vcombine.high %v817_v29, %v821_v30  ;;  %v876_v19 = vld [vmem:[%s7369_s3 + $0xb70] sm:$0xff]  ;;  %v873_v20 = vld [vmem:[%s7369_s3 + $0xb58] sm:$0xff] }
 0x206   : > { %3151 = vmatpush1.bf16.msra.mxu0 %v6237_v39  ;;  %3274 = vmatpush1.bf16.msra.mxu1 %v6239_v40  ;;  %v829_v39 = vld [vmem:[%s7369_s3 + $0x9f8] sm:$0xff]  ;;  %v6301_v40 = vcombine.low %v816_v27, %v820_v28  ;;  %v880_v28 = vld [vmem:[%s7369_s3 + $0xb90] sm:$0xff] }
 0x207   : > { %3152 = vmatprep.subr.bf16.mxu0 %v6246_v41  ;;  %3275 = vmatprep.subr.bf16.mxu1 %v6248_v42  ;;  %v6303_v41 = vcombine.low %v817_v29, %v821_v30  ;;  %v6310_v42 = vcombine.high %v824_v35, %v828_v37  ;;  %v6312_v43 = vcombine.high %v825_v38, %v829_v39  ;;  %v884_v29 = vld [vmem:[%s7369_s3 + $0xbb0] sm:$0xff]  ;;  %v881_v30 = vld [vmem:[%s7369_s3 + $0xb98] sm:$0xff] }
 0x20a   : > { %3153 = vmatpush1.bf16.msra.mxu0 %v6245_v46  ;;  %3276 = vmatpush1.bf16.msra.mxu1 %v6247_v47  ;;  %v837_v46 = vld [vmem:[%s7369_s3 + $0xa38] sm:$0xff]  ;;  %v6309_v47 = vcombine.low %v824_v35, %v828_v37  ;;  %v888_v37 = vld [vmem:[%s7369_s3 + $0xbd0] sm:$0xff] }
 0x20b   : > { %3163 = vmatprep.subr.bf16.mxu0 %v6254_v48  ;;  %3286 = vmatprep.subr.bf16.mxu1 %v6256_v49  ;;  %v6311_v48 = vcombine.low %v825_v38, %v829_v39  ;;  %v6318_v49 = vcombine.high %v832_v44, %v836_v25  ;;  %v6320_v50 = vcombine.high %v833_v45, %v837_v46  ;;  %v892_v38 = vld [vmem:[%s7369_s3 + $0xbf0] sm:$0xff]  ;;  %v889_v39 = vld [vmem:[%s7369_s3 + $0xbd8] sm:$0xff] }
 0x20d   : > { %3155 = vmatmul.mubr.bf16.vlgmr.msra.gmra.mrb[4].mxu0 %v7590_v22  ;;  %3278 = vmatmul.mubr.bf16.vlgmr.msra.gmra.mrb[4].mxu1 %v7590_v22  ;;  %v6269_v22 = vcombine.low %v784_v60, %v788_v61  ;;  %v848_v61 = vld [vmem:[%s7369_s3 + $0xa90] sm:$0xff] }
 0x20e   : > { %3164 = vmatpush1.bf16.msra.mxu0 %v6253_v55  ;;  %3287 = vmatpush1.bf16.msra.mxu1 %v6255_v56  ;;  %v845_v55 = vld [vmem:[%s7369_s3 + $0xa78] sm:$0xff]  ;;  %v6317_v56 = vcombine.low %v832_v44, %v836_v25  ;;  %v6373_v25 = vcombine.low %v888_v37, %v892_v38 }
 0x20f   : > { %3165 = vmatprep.subr.bf16.mxu0 %v6262_v58  ;;  %3288 = vmatprep.subr.bf16.mxu1 %v6264_v59  ;;  %v6319_v58 = vcombine.low %v833_v45, %v837_v46  ;;  %v6326_v59 = vcombine.high %v840_v51, %v844_v52  ;;  %v6328_v60 = vcombine.high %v841_v54, %v845_v55 }
 0x210   : > { %3195 = vmatprep.mubr.bf16.mxu0 %v7601_v15  ;;  %3318 = vmatprep.mubr.bf16.mxu1 %v7601_v15  ;;  %v6279_v15 = vcombine.low %v793_v4, %v797_v5  ;;  %v860_v4 = vld [vmem:[%s7369_s3 + $0xaf0] sm:$0xff]  ;;  %v857_v5 = vld [vmem:[%s7369_s3 + $0xad8] sm:$0xff] }
 0x212   : > { %3166 = vmatpush1.bf16.msra.mxu0 %v6261_v0  ;;  %3289 = vmatpush1.bf16.msra.mxu1 %v6263_v57  ;;  %v853_v0 = vld [vmem:[%s7369_s3 + $0xab8] sm:$0xff]  ;;  %v6325_v57 = vcombine.low %v840_v51, %v844_v52 }
 0x213   : > { %3167 = vmatprep.subr.bf16.mxu0 %v6270_v12  ;;  %3290 = vmatprep.subr.bf16.mxu1 %v6272_v1  ;;  %v6327_v12 = vcombine.low %v841_v54, %v845_v55  ;;  %v6334_v1 = vcombine.high %v848_v61, %v852_v62  ;;  %v6336_v2 = vcombine.high %v849_v63, %v853_v0 }
 0x216   : > { %3168 = vmatpush1.bf16.msra.mxu0 %v6269_v22  ;;  %3291 = vmatpush1.bf16.msra.mxu1 %v6271_v6  ;;  %v861_v22 = vld [vmem:[%s7369_s3 + $0xaf8] sm:$0xff]  ;;  %v6333_v6 = vcombine.low %v848_v61, %v852_v62 }
 0x217   : > { %3169 = vmatprep.subr.bf16.mxu0 %v6278_v7  ;;  %3292 = vmatprep.subr.bf16.mxu1 %v6280_v8  ;;  %v6335_v7 = vcombine.low %v849_v63, %v853_v0  ;;  %v6342_v8 = vcombine.high %v856_v3, %v860_v4  ;;  %v6344_v53 = vcombine.high %v857_v5, %v861_v22 }
 0x21a   : > { %3170 = vmatpush1.bf16.msra.mxu0 %v6277_v13  ;;  %3293 = vmatpush1.bf16.msra.mxu1 %v6279_v15  ;;  %v869_v13 = vld [vmem:[%s7369_s3 + $0xb38] sm:$0xff]  ;;  %v6341_v15 = vcombine.low %v856_v3, %v860_v4 }
 0x21b   : > { %3171 = vmatprep.subr.bf16.mxu0 %v6286_v14  ;;  %3294 = vmatprep.subr.bf16.mxu1 %v6288_v16  ;;  %v6343_v14 = vcombine.low %v857_v5, %v861_v22  ;;  %v6350_v16 = vcombine.high %v864_v9, %v868_v10  ;;  %v6352_v17 = vcombine.high %v865_v11, %v869_v13 }
 0x21e   : > { %3172 = vmatpush1.bf16.msra.mxu0 %v6285_v21  ;;  %3295 = vmatpush1.bf16.msra.mxu1 %v6287_v23  ;;  %v877_v21 = vld [vmem:[%s7369_s3 + $0xb78] sm:$0xff]  ;;  %v6349_v23 = vcombine.low %v864_v9, %v868_v10 }
 0x21f   : > { %3173 = vmatprep.subr.bf16.mxu0 %v6294_v24  ;;  %3296 = vmatprep.subr.bf16.mxu1 %v6296_v26  ;;  %v6351_v24 = vcombine.low %v865_v11, %v869_v13  ;;  %v6358_v26 = vcombine.high %v872_v18, %v876_v19  ;;  %v6360_v27 = vcombine.high %v873_v20, %v877_v21 }
 0x222   : > { %3174 = vmatpush1.bf16.msra.mxu0 %v6293_v31  ;;  %3297 = vmatpush1.bf16.msra.mxu1 %v6295_v32  ;;  %v885_v31 = vld [vmem:[%s7369_s3 + $0xbb8] sm:$0xff]  ;;  %v6357_v32 = vcombine.low %v872_v18, %v876_v19 }
 0x223   : > { %3175 = vmatprep.subr.bf16.mxu0 %v6302_v33  ;;  %3298 = vmatprep.subr.bf16.mxu1 %v6304_v34  ;;  %v6359_v33 = vcombine.low %v873_v20, %v877_v21  ;;  %v6366_v34 = vcombine.high %v880_v28, %v884_v29  ;;  %v6368_v35 = vcombine.high %v881_v30, %v885_v31 }
 0x226   : > { %3176 = vmatpush1.bf16.msra.mxu0 %v6301_v40  ;;  %3299 = vmatpush1.bf16.msra.mxu1 %v6303_v41  ;;  %v893_v40 = vld [vmem:[%s7369_s3 + $0xbf8] sm:$0xff]  ;;  %v6365_v41 = vcombine.low %v880_v28, %v884_v29 }
 0x227   : > { %3177 = vmatprep.subr.bf16.mxu0 %v6310_v42  ;;  %3300 = vmatprep.subr.bf16.mxu1 %v6312_v43  ;;  %v6367_v42 = vcombine.low %v881_v30, %v885_v31  ;;  %v6374_v43 = vcombine.high %v888_v37, %v892_v38  ;;  %v6376_v44 = vcombine.high %v889_v39, %v893_v40 }
 0x228   : > { %v6375_v45 = vcombine.low %v889_v39, %v893_v40 }
 0x22a   : > { %3178 = vmatpush1.bf16.msra.mxu0 %v6309_v47  ;;  %3301 = vmatpush1.bf16.msra.mxu1 %v6311_v48 }
 0x22b   : > { %3179 = vmatprep.subr.bf16.mxu0 %v6318_v49  ;;  %3302 = vmatprep.subr.bf16.mxu1 %v6320_v50 }
 0x22e   : > { %3180 = vmatpush1.bf16.msra.mxu0 %v6317_v56  ;;  %3303 = vmatpush1.bf16.msra.mxu1 %v6319_v58 }
 0x22f   : > { %3181 = vmatprep.subr.bf16.mxu0 %v6326_v59  ;;  %3304 = vmatprep.subr.bf16.mxu1 %v6328_v60 }
 0x232   : > { %3182 = vmatpush1.bf16.msra.mxu0 %v6325_v57  ;;  %3305 = vmatpush1.bf16.msra.mxu1 %v6327_v12 }
 0x233   : > { %3183 = vmatprep.subr.bf16.mxu0 %v6334_v1  ;;  %3306 = vmatprep.subr.bf16.mxu1 %v6336_v2 }
 0x236   : > { %3184 = vmatpush1.bf16.msra.mxu0 %v6333_v6  ;;  %3307 = vmatpush1.bf16.msra.mxu1 %v6335_v7 }
 0x237   : > { %3185 = vmatprep.subr.bf16.mxu0 %v6342_v8  ;;  %3308 = vmatprep.subr.bf16.mxu1 %v6344_v53 }
 0x23a   : > { %3186 = vmatpush1.bf16.msra.mxu0 %v6341_v15  ;;  %3309 = vmatpush1.bf16.msra.mxu1 %v6343_v14 }
 0x23b   : > { %3187 = vmatprep.subr.bf16.mxu0 %v6350_v16  ;;  %3310 = vmatprep.subr.bf16.mxu1 %v6352_v17 }
 0x23e   : > { %3188 = vmatpush1.bf16.msra.mxu0 %v6349_v23  ;;  %3311 = vmatpush1.bf16.msra.mxu1 %v6351_v24 }
 0x23f   : > { %3189 = vmatprep.subr.bf16.mxu0 %v6358_v26  ;;  %3312 = vmatprep.subr.bf16.mxu1 %v6360_v27 }
 0x242   : > { %3190 = vmatpush1.bf16.msra.mxu0 %v6357_v32  ;;  %3313 = vmatpush1.bf16.msra.mxu1 %v6359_v33 }
 0x243   : > { %3191 = vmatprep.subr.bf16.mxu0 %v6366_v34  ;;  %3314 = vmatprep.subr.bf16.mxu1 %v6368_v35 }
 0x246   : > { %3192 = vmatpush1.bf16.msra.mxu0 %v6365_v41  ;;  %3315 = vmatpush1.bf16.msra.mxu1 %v6367_v42 }
 0x247   : > { %3193 = vmatprep.subr.bf16.mxu0 %v6374_v43  ;;  %3316 = vmatprep.subr.bf16.mxu1 %v6376_v44 }
 0x24a   : > { %3194 = vmatpush1.bf16.msra.mxu0 %v6373_v25  ;;  %3317 = vmatpush1.bf16.msra.mxu1 %v6375_v45 }
 0x24d   : > { %3196 = vmatmul.mubr.bf16.vlgmr.msra.gmra.mrb[4].mxu0 %v7669_v36  ;;  %3319 = vmatmul.mubr.bf16.vlgmr.msra.gmra.mrb[4].mxu1 %v7669_v36 }
 0x260   : > { %v2951_v46 = vpop.f32.mrb[0].mxu0  ;;  %v3074_v47 = vpop.f32.mrb[0].mxu1 }
 0x261   : > { %3327 = vst [vmem:[#allocation2] sm:$0xff] %v2951_v46  ;;  %v2953_v48 = vpop.f32.mrb[1].mxu0  ;;  %3329 = vst [vmem:[#allocation2 + $0x10] sm:$0xff] %v3074_v47  ;;  %v3076_v49 = vpop.f32.mrb[1].mxu1 }
 0x262   : > { %3328 = vst [vmem:[#allocation2 + $0x8] sm:$0xff] %v2953_v48  ;;  %v2955_v50 = vpop.f32.mrb[2].mxu0  ;;  %3330 = vst [vmem:[#allocation2 + $0x18] sm:$0xff] %v3076_v49  ;;  %v3078_v51 = vpop.f32.mrb[2].mxu1 }
 0x263   : > { %v2956_v52 = vpop.f32.mrb[3].mxu0  ;;  %v3079_v54 = vpop.f32.mrb[3].mxu1 }
 0x31d   : > { %3337 = sbr.rel (%p5984_p12) target bundleno = 1538 (0x602), region = 76 }
 0x320   : > { %v3197_v55 = vpop.f32.mrb[4].mxu0  ;;  %v3320_v56 = vpop.f32.mrb[4].mxu1 }
 0x321   : > { %3331 = vst [vmem:[#allocation2 + $0x20] sm:$0xff] %v3197_v55  ;;  %v3199_v58 = vpop.f32.mrb[5].mxu0  ;;  %3333 = vst [vmem:[#allocation2 + $0x30] sm:$0xff] %v3320_v56  ;;  %v3322_v59 = vpop.f32.mrb[5].mxu1 }
 0x322   : > { %3332 = vst [vmem:[#allocation2 + $0x28] sm:$0xff] %v3199_v58  ;;  %v3201_v36 = vpop.f32.mrb[6].mxu0  ;;  %3334 = vst [vmem:[#allocation2 + $0x38] sm:$0xff] %v3322_v59  ;;  %v3324_v60 = vpop.f32.mrb[6].mxu1 }
 0x323   : > { %v3202_v61 = vpop.f32.mrb[7].mxu0  ;;  %v3325_v62 = vpop.f32.mrb[7].mxu1 }
 0x324   : > { %7056 = dma.done.wait [#allocation4], 65536 }
 0x325   : > { %7057 = vsyncadd [#allocation4], 4294901760  ;;  %v3355_v63 = vld [vmem:[#allocation3 + $0x8] sm:$0xff]  ;;  %v3354_v57 = vld [vmem:[#allocation3] sm:$0xff] }
 0x326   : > { %v3483_v0 = vld [vmem:[#allocation3 + $0x408] sm:$0xff]  ;;  %3894 = vmatprep.subr.bf16.mxu0 %v3355_v63  ;;  %v3482_v12 = vld [vmem:[#allocation3 + $0x400] sm:$0xff] }
 0x327   : > { %3935 = vmatprep.subr.bf16.mxu1 %v3483_v0  ;;  %v3363_v1 = vld [vmem:[#allocation3 + $0x48] sm:$0xff]  ;;  %3895 = vmatpush1.bf16.msra.mxu0 %v3354_v57  ;;  %v3362_v3 = vld [vmem:[#allocation3 + $0x40] sm:$0xff] }
 0x328   : > { %v3491_v2 = vld [vmem:[#allocation3 + $0x448] sm:$0xff]  ;;  %3936 = vmatpush1.bf16.msra.mxu1 %v3482_v12  ;;  %3896 = vmatprep.subr.bf16.mxu0 %v3363_v1  ;;  %v3490_v4 = vld [vmem:[#allocation3 + $0x440] sm:$0xff] }
 0x329   : > { %3937 = vmatprep.subr.bf16.mxu1 %v3491_v2  ;;  %v3371_v5 = vld [vmem:[#allocation3 + $0x88] sm:$0xff]  ;;  %v3370_v6 = vld [vmem:[#allocation3 + $0x80] sm:$0xff] }
 0x32a   : > { %v3499_v22 = vld [vmem:[#allocation3 + $0x488] sm:$0xff]  ;;  %v3498_v7 = vld [vmem:[#allocation3 + $0x480] sm:$0xff] }
 0x32b   : > { %3897 = vmatpush1.bf16.msra.mxu0 %v3362_v3  ;;  %v3379_v8 = vld [vmem:[#allocation3 + $0xc8] sm:$0xff]  ;;  %v3378_v9 = vld [vmem:[#allocation3 + $0xc0] sm:$0xff] }
 0x32c   : > { %3938 = vmatpush1.bf16.msra.mxu1 %v3490_v4  ;;  %3898 = vmatprep.subr.bf16.mxu0 %v3371_v5  ;;  %v3507_v53 = vld [vmem:[#allocation3 + $0x4c8] sm:$0xff]  ;;  %v3506_v10 = vld [vmem:[#allocation3 + $0x4c0] sm:$0xff]  ;;  %v7904_v5 = vld [vmem:[%s8247_s0 + $0x10] sm:$0xff] }
 0x32d   : > { %3939 = vmatprep.subr.bf16.mxu1 %v3499_v22  ;;  %v3387_v11 = vld [vmem:[#allocation3 + $0x108] sm:$0xff]  ;;  %v3386_v15 = vld [vmem:[#allocation3 + $0x100] sm:$0xff]  ;;  %v7909_v22 = vld [vmem:[%s8247_s0 + $0x18] sm:$0xff] }
 0x32e   : > { %v3515_v13 = vld [vmem:[#allocation3 + $0x508] sm:$0xff]  ;;  %v3514_v14 = vld [vmem:[#allocation3 + $0x500] sm:$0xff] }
 0x32f   : > { %3899 = vmatpush1.bf16.msra.mxu0 %v3370_v6  ;;  %v3395_v16 = vld [vmem:[#allocation3 + $0x148] sm:$0xff]  ;;  %v3394_v18 = vld [vmem:[#allocation3 + $0x140] sm:$0xff] }
 0x330   : > { %3940 = vmatpush1.bf16.msra.mxu1 %v3498_v7  ;;  %3900 = vmatprep.subr.bf16.mxu0 %v3379_v8  ;;  %v3523_v17 = vld [vmem:[#allocation3 + $0x548] sm:$0xff]  ;;  %v3522_v19 = vld [vmem:[#allocation3 + $0x540] sm:$0xff] }
 0x331   : > { %3941 = vmatprep.subr.bf16.mxu1 %v3507_v53  ;;  %v3403_v20 = vld [vmem:[#allocation3 + $0x188] sm:$0xff]  ;;  %v7876_v23 = vld [vmem:[%s8247_s0] sm:$0xff] }
 0x332   : > { %v3531_v21 = vld [vmem:[#allocation3 + $0x588] sm:$0xff]  ;;  %v7885_v26 = vcombine.high %v7876_v23, %v7876_v23  ;;  %v3402_v28 = vld [vmem:[#allocation3 + $0x180] sm:$0xff]  ;;  %v7895_v3 = vcombine.low %v7876_v23, %v7876_v23 }
 0x333   : > { %3901 = vmatpush1.bf16.msra.mxu0 %v3378_v9  ;;  %v7881_v24 = vld [vmem:[%s8247_s0 + $0x8] sm:$0xff]  ;;  %v3530_v29 = vld [vmem:[#allocation3 + $0x580] sm:$0xff]  ;;  %v7913_v9 = vcombine.high %v7904_v5, %v7904_v5 }
 0x334   : > { %3942 = vmatpush1.bf16.msra.mxu1 %v3506_v10  ;;  %3902 = vmatprep.subr.bf16.mxu0 %v3387_v11  ;;  %v7889_v27 = vcombine.high %v7881_v24, %v7881_v24  ;;  %v3411_v30 = vld [vmem:[#allocation3 + $0x1c8] sm:$0xff]  ;;  %v3410_v32 = vld [vmem:[#allocation3 + $0x1c0] sm:$0xff]  ;;  %v7899_v4 = vcombine.low %v7881_v24, %v7881_v24  ;;  %v7917_v10 = vcombine.high %v7909_v22, %v7909_v22 }
 0x335   : > { %3943 = vmatprep.subr.bf16.mxu1 %v3515_v13  ;;  %v3539_v31 = vld [vmem:[#allocation3 + $0x5c8] sm:$0xff]  ;;  %3926 = vmatprep.mubr.bf16.mxu0 %v7885_v26  ;;  %v3538_v33 = vld [vmem:[#allocation3 + $0x5c0] sm:$0xff] }
 0x336   : > { %3967 = vmatprep.mubr.bf16.mxu1 %v7889_v27  ;;  %v3419_v34 = vld [vmem:[#allocation3 + $0x208] sm:$0xff]  ;;  %v3418_v37 = vld [vmem:[#allocation3 + $0x200] sm:$0xff] }
 0x337   : > { %3903 = vmatpush1.bf16.msra.mxu0 %v3386_v15  ;;  %v3547_v35 = vld [vmem:[#allocation3 + $0x608] sm:$0xff]  ;;  %v3546_v38 = vld [vmem:[#allocation3 + $0x600] sm:$0xff] }
 0x338   : > { %3944 = vmatpush1.bf16.msra.mxu1 %v3514_v14  ;;  %3904 = vmatprep.subr.bf16.mxu0 %v3395_v16  ;;  %v3427_v39 = vld [vmem:[#allocation3 + $0x248] sm:$0xff]  ;;  %v3426_v41 = vld [vmem:[#allocation3 + $0x240] sm:$0xff] }
 0x339   : > { %3945 = vmatprep.subr.bf16.mxu1 %v3523_v17  ;;  %v3555_v40 = vld [vmem:[#allocation3 + $0x648] sm:$0xff]  ;;  %v3554_v42 = vld [vmem:[#allocation3 + $0x640] sm:$0xff] }
 0x33a   : > { %v3435_v43 = vld [vmem:[#allocation3 + $0x288] sm:$0xff]  ;;  %v3434_v25 = vld [vmem:[#allocation3 + $0x280] sm:$0xff] }
 0x33b   : > { %3905 = vmatpush1.bf16.msra.mxu0 %v3394_v18  ;;  %v3563_v44 = vld [vmem:[#allocation3 + $0x688] sm:$0xff]  ;;  %v3562_v45 = vld [vmem:[#allocation3 + $0x680] sm:$0xff] }
 0x33c   : > { %3946 = vmatpush1.bf16.msra.mxu1 %v3522_v19  ;;  %3906 = vmatprep.subr.bf16.mxu0 %v3403_v20  ;;  %v3443_v46 = vld [vmem:[#allocation3 + $0x2c8] sm:$0xff]  ;;  %v3442_v48 = vld [vmem:[#allocation3 + $0x2c0] sm:$0xff] }
 0x33d   : > { %3947 = vmatprep.subr.bf16.mxu1 %v3531_v21  ;;  %v3571_v47 = vld [vmem:[#allocation3 + $0x6c8] sm:$0xff]  ;;  %v3570_v49 = vld [vmem:[#allocation3 + $0x6c0] sm:$0xff] }
 0x33e   : > { %v3451_v50 = vld [vmem:[#allocation3 + $0x308] sm:$0xff]  ;;  %v3450_v52 = vld [vmem:[#allocation3 + $0x300] sm:$0xff] }
 0x33f   : > { %3907 = vmatpush1.bf16.msra.mxu0 %v3402_v28  ;;  %v3579_v51 = vld [vmem:[#allocation3 + $0x708] sm:$0xff]  ;;  %v3578_v54 = vld [vmem:[#allocation3 + $0x700] sm:$0xff] }
 0x340   : > { %3948 = vmatpush1.bf16.msra.mxu1 %v3530_v29  ;;  %3908 = vmatprep.subr.bf16.mxu0 %v3411_v30  ;;  %v3459_v55 = vld [vmem:[#allocation3 + $0x348] sm:$0xff]  ;;  %v3458_v58 = vld [vmem:[#allocation3 + $0x340] sm:$0xff] }
 0x341   : > { %3949 = vmatprep.subr.bf16.mxu1 %v3539_v31  ;;  %v3587_v56 = vld [vmem:[#allocation3 + $0x748] sm:$0xff]  ;;  %v3586_v59 = vld [vmem:[#allocation3 + $0x740] sm:$0xff] }
 0x342   : > { %v3467_v36 = vld [vmem:[#allocation3 + $0x388] sm:$0xff]  ;;  %v3466_v61 = vld [vmem:[#allocation3 + $0x380] sm:$0xff] }
 0x343   : > { %3909 = vmatpush1.bf16.msra.mxu0 %v3410_v32  ;;  %v3595_v60 = vld [vmem:[#allocation3 + $0x788] sm:$0xff]  ;;  %v3594_v62 = vld [vmem:[#allocation3 + $0x780] sm:$0xff] }
 0x344   : > { %3950 = vmatpush1.bf16.msra.mxu1 %v3538_v33  ;;  %3910 = vmatprep.subr.bf16.mxu0 %v3419_v34  ;;  %v3475_v63 = vld [vmem:[#allocation3 + $0x3c8] sm:$0xff]  ;;  %v3474_v57 = vld [vmem:[#allocation3 + $0x3c0] sm:$0xff] }
 0x345   : > { %3951 = vmatprep.subr.bf16.mxu1 %v3547_v35  ;;  %v3603_v0 = vld [vmem:[#allocation3 + $0x7c8] sm:$0xff]  ;;  %v3602_v12 = vld [vmem:[#allocation3 + $0x7c0] sm:$0xff] }
 0x346   : > { %v3611_v1 = vld [vmem:[#allocation3 + $0x808] sm:$0xff]  ;;  %v3610_v6 = vld [vmem:[#allocation3 + $0x800] sm:$0xff] }
 0x347   : > { %3911 = vmatpush1.bf16.msra.mxu0 %v3418_v37  ;;  %v3739_v2 = vld [vmem:[#allocation3 + $0xc08] sm:$0xff]  ;;  %v3738_v7 = vld [vmem:[#allocation3 + $0xc00] sm:$0xff] }
 0x348   : > { %3952 = vmatpush1.bf16.msra.mxu1 %v3546_v38  ;;  %3912 = vmatprep.subr.bf16.mxu0 %v3427_v39  ;;  %v3619_v8 = vld [vmem:[#allocation3 + $0x848] sm:$0xff]  ;;  %v3618_v11 = vld [vmem:[#allocation3 + $0x840] sm:$0xff] }
 0x349   : > { %3953 = vmatprep.subr.bf16.mxu1 %v3555_v40  ;;  %v3747_v53 = vld [vmem:[#allocation3 + $0xc48] sm:$0xff]  ;;  %v3746_v13 = vld [vmem:[#allocation3 + $0xc40] sm:$0xff] }
 0x34a   : > { %v3627_v15 = vld [vmem:[#allocation3 + $0x888] sm:$0xff]  ;;  %v3626_v16 = vld [vmem:[#allocation3 + $0x880] sm:$0xff] }
 0x34b   : > { %3913 = vmatpush1.bf16.msra.mxu0 %v3426_v41  ;;  %v3755_v14 = vld [vmem:[#allocation3 + $0xc88] sm:$0xff]  ;;  %v3754_v17 = vld [vmem:[#allocation3 + $0xc80] sm:$0xff] }
 0x34c   : > { %3954 = vmatpush1.bf16.msra.mxu1 %v3554_v42  ;;  %3914 = vmatprep.subr.bf16.mxu0 %v3435_v43  ;;  %v3635_v18 = vld [vmem:[#allocation3 + $0x8c8] sm:$0xff]  ;;  %v3634_v20 = vld [vmem:[#allocation3 + $0x8c0] sm:$0xff] }
 0x34d   : > { %3955 = vmatprep.subr.bf16.mxu1 %v3563_v44  ;;  %v3763_v19 = vld [vmem:[#allocation3 + $0xcc8] sm:$0xff]  ;;  %v3762_v21 = vld [vmem:[#allocation3 + $0xcc0] sm:$0xff] }
 0x34e   : > { %v3643_v23 = vld [vmem:[#allocation3 + $0x908] sm:$0xff]  ;;  %v3642_v28 = vld [vmem:[#allocation3 + $0x900] sm:$0xff] }
 0x34f   : > { %3915 = vmatpush1.bf16.msra.mxu0 %v3434_v25  ;;  %v3771_v24 = vld [vmem:[#allocation3 + $0xd08] sm:$0xff]  ;;  %v3770_v29 = vld [vmem:[#allocation3 + $0xd00] sm:$0xff] }
 0x350   : > { %3956 = vmatpush1.bf16.msra.mxu1 %v3562_v45  ;;  %3916 = vmatprep.subr.bf16.mxu0 %v3443_v46  ;;  %v3651_v30 = vld [vmem:[#allocation3 + $0x948] sm:$0xff]  ;;  %v3650_v32 = vld [vmem:[#allocation3 + $0x940] sm:$0xff] }
 0x351   : > { %3957 = vmatprep.subr.bf16.mxu1 %v3571_v47  ;;  %v3779_v31 = vld [vmem:[#allocation3 + $0xd48] sm:$0xff]  ;;  %v3778_v33 = vld [vmem:[#allocation3 + $0xd40] sm:$0xff] }
 0x352   : > { %v3659_v34 = vld [vmem:[#allocation3 + $0x988] sm:$0xff]  ;;  %v3658_v37 = vld [vmem:[#allocation3 + $0x980] sm:$0xff] }
 0x353   : > { %3917 = vmatpush1.bf16.msra.mxu0 %v3442_v48  ;;  %v3787_v35 = vld [vmem:[#allocation3 + $0xd88] sm:$0xff]  ;;  %v3786_v38 = vld [vmem:[#allocation3 + $0xd80] sm:$0xff] }
 0x354   : > { %3958 = vmatpush1.bf16.msra.mxu1 %v3570_v49  ;;  %3918 = vmatprep.subr.bf16.mxu0 %v3451_v50  ;;  %v3667_v39 = vld [vmem:[#allocation3 + $0x9c8] sm:$0xff]  ;;  %v3666_v41 = vld [vmem:[#allocation3 + $0x9c0] sm:$0xff] }
 0x355   : > { %3959 = vmatprep.subr.bf16.mxu1 %v3579_v51  ;;  %v3795_v40 = vld [vmem:[#allocation3 + $0xdc8] sm:$0xff]  ;;  %v3794_v42 = vld [vmem:[#allocation3 + $0xdc0] sm:$0xff] }
 0x356   : > { %v3675_v43 = vld [vmem:[#allocation3 + $0xa08] sm:$0xff]  ;;  %v3674_v25 = vld [vmem:[#allocation3 + $0xa00] sm:$0xff] }
 0x357   : > { %3919 = vmatpush1.bf16.msra.mxu0 %v3450_v52  ;;  %v3803_v44 = vld [vmem:[#allocation3 + $0xe08] sm:$0xff]  ;;  %v3802_v45 = vld [vmem:[#allocation3 + $0xe00] sm:$0xff] }
 0x358   : > { %3960 = vmatpush1.bf16.msra.mxu1 %v3578_v54  ;;  %3920 = vmatprep.subr.bf16.mxu0 %v3459_v55  ;;  %v3683_v46 = vld [vmem:[#allocation3 + $0xa48] sm:$0xff]  ;;  %v3682_v48 = vld [vmem:[#allocation3 + $0xa40] sm:$0xff] }
 0x359   : > { %3961 = vmatprep.subr.bf16.mxu1 %v3587_v56  ;;  %v3811_v47 = vld [vmem:[#allocation3 + $0xe48] sm:$0xff]  ;;  %v3810_v49 = vld [vmem:[#allocation3 + $0xe40] sm:$0xff] }
 0x35a   : > { %v3691_v50 = vld [vmem:[#allocation3 + $0xa88] sm:$0xff]  ;;  %v3690_v52 = vld [vmem:[#allocation3 + $0xa80] sm:$0xff] }
 0x35b   : > { %3921 = vmatpush1.bf16.msra.mxu0 %v3458_v58  ;;  %v3819_v51 = vld [vmem:[#allocation3 + $0xe88] sm:$0xff]  ;;  %v3818_v54 = vld [vmem:[#allocation3 + $0xe80] sm:$0xff] }
 0x35c   : > { %3962 = vmatpush1.bf16.msra.mxu1 %v3586_v59  ;;  %3922 = vmatprep.subr.bf16.mxu0 %v3467_v36  ;;  %v3699_v55 = vld [vmem:[#allocation3 + $0xac8] sm:$0xff]  ;;  %v3698_v58 = vld [vmem:[#allocation3 + $0xac0] sm:$0xff] }
 0x35d   : > { %3963 = vmatprep.subr.bf16.mxu1 %v3595_v60  ;;  %v3827_v56 = vld [vmem:[#allocation3 + $0xec8] sm:$0xff]  ;;  %v3826_v59 = vld [vmem:[#allocation3 + $0xec0] sm:$0xff] }
 0x35e   : > { %v3707_v36 = vld [vmem:[#allocation3 + $0xb08] sm:$0xff] }
 0x35f   : > { %3923 = vmatpush1.bf16.msra.mxu0 %v3466_v61  ;;  %v3835_v60 = vld [vmem:[#allocation3 + $0xf08] sm:$0xff]  ;;  %v3706_v61 = vld [vmem:[#allocation3 + $0xb00] sm:$0xff] }
 0x360   : > { %3964 = vmatpush1.bf16.msra.mxu1 %v3594_v62  ;;  %3924 = vmatprep.subr.bf16.mxu0 %v3475_v63  ;;  %v3834_v62 = vld [vmem:[#allocation3 + $0xf00] sm:$0xff]  ;;  %v3715_v63 = vld [vmem:[#allocation3 + $0xb48] sm:$0xff] }
 0x361   : > { %3965 = vmatprep.subr.bf16.mxu1 %v3603_v0  ;;  %v3843_v0 = vld [vmem:[#allocation3 + $0xf48] sm:$0xff] }
 0x363   : > { %3925 = vmatpush1.bf16.msra.mxu0 %v3474_v57  ;;  %v3714_v57 = vld [vmem:[#allocation3 + $0xb40] sm:$0xff] }
 0x364   : > { %3966 = vmatpush1.bf16.msra.mxu1 %v3602_v12  ;;  %3976 = vmatprep.subr.bf16.mxu0 %v3611_v1  ;;  %v3842_v12 = vld [vmem:[#allocation3 + $0xf40] sm:$0xff]  ;;  %v3723_v1 = vld [vmem:[#allocation3 + $0xb88] sm:$0xff] }
 0x365   : > { %4017 = vmatprep.subr.bf16.mxu1 %v3739_v2  ;;  %v3851_v2 = vld [vmem:[#allocation3 + $0xf88] sm:$0xff] }
 0x366   : > { %3927 = vmatmul.mubr.bf16.vlgmr.msra.gmra.mrb[0].mxu0 %v7895_v3 }
 0x367   : > { %3968 = vmatmul.mubr.bf16.vlgmr.msra.gmra.mrb[0].mxu1 %v7899_v4  ;;  %3977 = vmatpush1.bf16.msra.mxu0 %v3610_v6  ;;  %v3722_v6 = vld [vmem:[#allocation3 + $0xb80] sm:$0xff] }
 0x368   : > { %4018 = vmatpush1.bf16.msra.mxu1 %v3738_v7  ;;  %3978 = vmatprep.subr.bf16.mxu0 %v3619_v8  ;;  %v3850_v7 = vld [vmem:[#allocation3 + $0xf80] sm:$0xff]  ;;  %v3731_v8 = vld [vmem:[#allocation3 + $0xbc8] sm:$0xff] }
 0x369   : > { %4019 = vmatprep.subr.bf16.mxu1 %v3747_v53  ;;  %4008 = vmatprep.mubr.bf16.mxu0 %v7913_v9  ;;  %v3859_v53 = vld [vmem:[#allocation3 + $0xfc8] sm:$0xff] }
 0x36a   : > { %4049 = vmatprep.mubr.bf16.mxu1 %v7917_v10 }
 0x36b   : > { %3979 = vmatpush1.bf16.msra.mxu0 %v3618_v11  ;;  %v3730_v11 = vld [vmem:[#allocation3 + $0xbc0] sm:$0xff] }
 0x36c   : > { %4020 = vmatpush1.bf16.msra.mxu1 %v3746_v13  ;;  %3980 = vmatprep.subr.bf16.mxu0 %v3627_v15  ;;  %v3858_v13 = vld [vmem:[#allocation3 + $0xfc0] sm:$0xff]  ;;  %v3357_v15 = vld [vmem:[#allocation3 + $0x18] sm:$0xff] }
 0x36d   : > { %4021 = vmatprep.subr.bf16.mxu1 %v3755_v14  ;;  %v3485_v14 = vld [vmem:[#allocation3 + $0x418] sm:$0xff] }
 0x36f   : > { %3981 = vmatpush1.bf16.msra.mxu0 %v3626_v16  ;;  %v7925_v16 = vcombine.low %v7904_v5, %v7904_v5  ;;  %v3364_v5 = vld [vmem:[#allocation3 + $0x50] sm:$0xff] }
 0x370   : > { %4022 = vmatpush1.bf16.msra.mxu1 %v3754_v17  ;;  %3982 = vmatprep.subr.bf16.mxu0 %v3635_v18  ;;  %v7929_v17 = vcombine.low %v7909_v22, %v7909_v22  ;;  %v3356_v18 = vld [vmem:[#allocation3 + $0x10] sm:$0xff]  ;;  %v3373_v22 = vld [vmem:[#allocation3 + $0x98] sm:$0xff] }
 0x371   : > { %4023 = vmatprep.subr.bf16.mxu1 %v3763_v19  ;;  %v3484_v19 = vld [vmem:[#allocation3 + $0x410] sm:$0xff] }
 0x373   : > { %3983 = vmatpush1.bf16.msra.mxu0 %v3634_v20  ;;  %v3365_v20 = vld [vmem:[#allocation3 + $0x58] sm:$0xff] }
 0x374   : > { %4024 = vmatpush1.bf16.msra.mxu1 %v3762_v21  ;;  %3984 = vmatprep.subr.bf16.mxu0 %v3643_v23  ;;  %v3493_v21 = vld [vmem:[#allocation3 + $0x458] sm:$0xff]  ;;  %v3492_v23 = vld [vmem:[#allocation3 + $0x450] sm:$0xff] }
 0x375   : > { %4025 = vmatprep.subr.bf16.mxu1 %v3771_v24  ;;  %v3501_v24 = vld [vmem:[#allocation3 + $0x498] sm:$0xff] }
 0x377   : > { %3985 = vmatpush1.bf16.msra.mxu0 %v3642_v28  ;;  %v3372_v28 = vld [vmem:[#allocation3 + $0x90] sm:$0xff] }
 0x378   : > { %4026 = vmatpush1.bf16.msra.mxu1 %v3770_v29  ;;  %3986 = vmatprep.subr.bf16.mxu0 %v3651_v30  ;;  %v3500_v29 = vld [vmem:[#allocation3 + $0x490] sm:$0xff]  ;;  %v3381_v30 = vld [vmem:[#allocation3 + $0xd8] sm:$0xff] }
 0x379   : > { %4027 = vmatprep.subr.bf16.mxu1 %v3779_v31  ;;  %v3509_v31 = vld [vmem:[#allocation3 + $0x4d8] sm:$0xff] }
 0x37b   : > { %3987 = vmatpush1.bf16.msra.mxu0 %v3650_v32  ;;  %v3380_v32 = vld [vmem:[#allocation3 + $0xd0] sm:$0xff] }
 0x37c   : > { %4028 = vmatpush1.bf16.msra.mxu1 %v3778_v33  ;;  %3988 = vmatprep.subr.bf16.mxu0 %v3659_v34  ;;  %v3508_v33 = vld [vmem:[#allocation3 + $0x4d0] sm:$0xff]  ;;  %v3389_v34 = vld [vmem:[#allocation3 + $0x118] sm:$0xff] }
 0x37d   : > { %4029 = vmatprep.subr.bf16.mxu1 %v3787_v35  ;;  %v3517_v35 = vld [vmem:[#allocation3 + $0x518] sm:$0xff] }
 0x37f   : > { %3989 = vmatpush1.bf16.msra.mxu0 %v3658_v37  ;;  %v3388_v37 = vld [vmem:[#allocation3 + $0x110] sm:$0xff] }
 0x380   : > { %4030 = vmatpush1.bf16.msra.mxu1 %v3786_v38  ;;  %3990 = vmatprep.subr.bf16.mxu0 %v3667_v39  ;;  %v3516_v38 = vld [vmem:[#allocation3 + $0x510] sm:$0xff]  ;;  %v3397_v39 = vld [vmem:[#allocation3 + $0x158] sm:$0xff] }
 0x381   : > { %4031 = vmatprep.subr.bf16.mxu1 %v3795_v40  ;;  %v3525_v40 = vld [vmem:[#allocation3 + $0x558] sm:$0xff] }
 0x383   : > { %3991 = vmatpush1.bf16.msra.mxu0 %v3666_v41  ;;  %v3396_v41 = vld [vmem:[#allocation3 + $0x150] sm:$0xff] }
 0x384   : > { %4032 = vmatpush1.bf16.msra.mxu1 %v3794_v42  ;;  %3992 = vmatprep.subr.bf16.mxu0 %v3675_v43  ;;  %v3524_v42 = vld [vmem:[#allocation3 + $0x550] sm:$0xff]  ;;  %v3405_v43 = vld [vmem:[#allocation3 + $0x198] sm:$0xff] }
 0x385   : > { %4033 = vmatprep.subr.bf16.mxu1 %v3803_v44  ;;  %v3533_v44 = vld [vmem:[#allocation3 + $0x598] sm:$0xff] }
 0x387   : > { %3993 = vmatpush1.bf16.msra.mxu0 %v3674_v25  ;;  %v3404_v25 = vld [vmem:[#allocation3 + $0x190] sm:$0xff] }
 0x388   : > { %4034 = vmatpush1.bf16.msra.mxu1 %v3802_v45  ;;  %3994 = vmatprep.subr.bf16.mxu0 %v3683_v46  ;;  %v3532_v45 = vld [vmem:[#allocation3 + $0x590] sm:$0xff]  ;;  %v3413_v46 = vld [vmem:[#allocation3 + $0x1d8] sm:$0xff] }
 0x389   : > { %4035 = vmatprep.subr.bf16.mxu1 %v3811_v47  ;;  %v3541_v47 = vld [vmem:[#allocation3 + $0x5d8] sm:$0xff] }
 0x38b   : > { %3995 = vmatpush1.bf16.msra.mxu0 %v3682_v48  ;;  %v3412_v48 = vld [vmem:[#allocation3 + $0x1d0] sm:$0xff] }
 0x38c   : > { %4036 = vmatpush1.bf16.msra.mxu1 %v3810_v49  ;;  %3996 = vmatprep.subr.bf16.mxu0 %v3691_v50  ;;  %v3540_v49 = vld [vmem:[#allocation3 + $0x5d0] sm:$0xff]  ;;  %v3421_v50 = vld [vmem:[#allocation3 + $0x218] sm:$0xff] }
 0x38d   : > { %4037 = vmatprep.subr.bf16.mxu1 %v3819_v51  ;;  %v3549_v51 = vld [vmem:[#allocation3 + $0x618] sm:$0xff] }
 0x38f   : > { %3997 = vmatpush1.bf16.msra.mxu0 %v3690_v52  ;;  %v3420_v52 = vld [vmem:[#allocation3 + $0x210] sm:$0xff] }
 0x390   : > { %4038 = vmatpush1.bf16.msra.mxu1 %v3818_v54  ;;  %3998 = vmatprep.subr.bf16.mxu0 %v3699_v55  ;;  %v3548_v54 = vld [vmem:[#allocation3 + $0x610] sm:$0xff]  ;;  %v3429_v55 = vld [vmem:[#allocation3 + $0x258] sm:$0xff] }
 0x391   : > { %4039 = vmatprep.subr.bf16.mxu1 %v3827_v56  ;;  %v3557_v56 = vld [vmem:[#allocation3 + $0x658] sm:$0xff] }
 0x393   : > { %3999 = vmatpush1.bf16.msra.mxu0 %v3698_v58  ;;  %v3428_v58 = vld [vmem:[#allocation3 + $0x250] sm:$0xff] }
 0x394   : > { %4040 = vmatpush1.bf16.msra.mxu1 %v3826_v59  ;;  %4000 = vmatprep.subr.bf16.mxu0 %v3707_v36  ;;  %v3556_v59 = vld [vmem:[#allocation3 + $0x650] sm:$0xff]  ;;  %v3437_v36 = vld [vmem:[#allocation3 + $0x298] sm:$0xff] }
 0x395   : > { %4041 = vmatprep.subr.bf16.mxu1 %v3835_v60  ;;  %v3565_v60 = vld [vmem:[#allocation3 + $0x698] sm:$0xff] }
 0x397   : > { %4001 = vmatpush1.bf16.msra.mxu0 %v3706_v61  ;;  %v3436_v61 = vld [vmem:[#allocation3 + $0x290] sm:$0xff] }
 0x398   : > { %4042 = vmatpush1.bf16.msra.mxu1 %v3834_v62  ;;  %4002 = vmatprep.subr.bf16.mxu0 %v3715_v63  ;;  %v3564_v62 = vld [vmem:[#allocation3 + $0x690] sm:$0xff]  ;;  %v3445_v63 = vld [vmem:[#allocation3 + $0x2d8] sm:$0xff] }
 0x399   : > { %4043 = vmatprep.subr.bf16.mxu1 %v3843_v0  ;;  %v3573_v0 = vld [vmem:[#allocation3 + $0x6d8] sm:$0xff] }
 0x39b   : > { %4003 = vmatpush1.bf16.msra.mxu0 %v3714_v57  ;;  %v3444_v57 = vld [vmem:[#allocation3 + $0x2d0] sm:$0xff] }
 0x39c   : > { %4044 = vmatpush1.bf16.msra.mxu1 %v3842_v12  ;;  %4004 = vmatprep.subr.bf16.mxu0 %v3723_v1  ;;  %v3572_v12 = vld [vmem:[#allocation3 + $0x6d0] sm:$0xff]  ;;  %v3453_v1 = vld [vmem:[#allocation3 + $0x318] sm:$0xff] }
 0x39d   : > { %4045 = vmatprep.subr.bf16.mxu1 %v3851_v2  ;;  %v3581_v2 = vld [vmem:[#allocation3 + $0x718] sm:$0xff] }
 0x39f   : > { %4005 = vmatpush1.bf16.msra.mxu0 %v3722_v6  ;;  %v3452_v6 = vld [vmem:[#allocation3 + $0x310] sm:$0xff] }
 0x3a0   : > { %4046 = vmatpush1.bf16.msra.mxu1 %v3850_v7  ;;  %4006 = vmatprep.subr.bf16.mxu0 %v3731_v8  ;;  %v3580_v7 = vld [vmem:[#allocation3 + $0x710] sm:$0xff]  ;;  %v3461_v8 = vld [vmem:[#allocation3 + $0x358] sm:$0xff] }
 0x3a1   : > { %4047 = vmatprep.subr.bf16.mxu1 %v3859_v53  ;;  %v3589_v53 = vld [vmem:[#allocation3 + $0x758] sm:$0xff] }
 0x3a3   : > { %4007 = vmatpush1.bf16.msra.mxu0 %v3730_v11  ;;  %v3460_v11 = vld [vmem:[#allocation3 + $0x350] sm:$0xff] }
 0x3a4   : > { %4048 = vmatpush1.bf16.msra.mxu1 %v3858_v13  ;;  %4058 = vmatprep.subr.bf16.mxu0 %v3357_v15  ;;  %v3588_v13 = vld [vmem:[#allocation3 + $0x750] sm:$0xff]  ;;  %v3469_v15 = vld [vmem:[#allocation3 + $0x398] sm:$0xff] }
 0x3a5   : > { %4099 = vmatprep.subr.bf16.mxu1 %v3485_v14  ;;  %v3597_v14 = vld [vmem:[#allocation3 + $0x798] sm:$0xff] }
 0x3a6   : > { %4009 = vmatmul.mubr.bf16.vlgmr.msra.gmra.mrb[4].mxu0 %v7925_v16 }
 0x3a7   : > { %4050 = vmatmul.mubr.bf16.vlgmr.msra.gmra.mrb[4].mxu1 %v7929_v17  ;;  %4059 = vmatpush1.bf16.msra.mxu0 %v3356_v18  ;;  %v3468_v18 = vld [vmem:[#allocation3 + $0x390] sm:$0xff] }
 0x3a8   : > { %4100 = vmatpush1.bf16.msra.mxu1 %v3484_v19  ;;  %4060 = vmatprep.subr.bf16.mxu0 %v3365_v20  ;;  %v3596_v19 = vld [vmem:[#allocation3 + $0x790] sm:$0xff]  ;;  %v3477_v20 = vld [vmem:[#allocation3 + $0x3d8] sm:$0xff] }
 0x3a9   : > { %4101 = vmatprep.subr.bf16.mxu1 %v3493_v21  ;;  %4090 = vmatprep.mubr.bf16.mxu0 %v7885_v26  ;;  %v3605_v21 = vld [vmem:[#allocation3 + $0x7d8] sm:$0xff] }
 0x3aa   : > { %4131 = vmatprep.mubr.bf16.mxu1 %v7889_v27 }
 0x3ab   : > { %4061 = vmatpush1.bf16.msra.mxu0 %v3364_v5  ;;  %v3476_v5 = vld [vmem:[#allocation3 + $0x3d0] sm:$0xff] }
 0x3ac   : > { %4102 = vmatpush1.bf16.msra.mxu1 %v3492_v23  ;;  %4062 = vmatprep.subr.bf16.mxu0 %v3373_v22  ;;  %v3604_v23 = vld [vmem:[#allocation3 + $0x7d0] sm:$0xff]  ;;  %v3613_v22 = vld [vmem:[#allocation3 + $0x818] sm:$0xff] }
 0x3ad   : > { %4103 = vmatprep.subr.bf16.mxu1 %v3501_v24  ;;  %v3741_v24 = vld [vmem:[#allocation3 + $0xc18] sm:$0xff] }
 0x3af   : > { %4063 = vmatpush1.bf16.msra.mxu0 %v3372_v28  ;;  %v3612_v28 = vld [vmem:[#allocation3 + $0x810] sm:$0xff] }
 0x3b0   : > { %4104 = vmatpush1.bf16.msra.mxu1 %v3500_v29  ;;  %4064 = vmatprep.subr.bf16.mxu0 %v3381_v30  ;;  %v3740_v29 = vld [vmem:[#allocation3 + $0xc10] sm:$0xff]  ;;  %v3621_v30 = vld [vmem:[#allocation3 + $0x858] sm:$0xff] }
 0x3b1   : > { %4105 = vmatprep.subr.bf16.mxu1 %v3509_v31  ;;  %v3749_v31 = vld [vmem:[#allocation3 + $0xc58] sm:$0xff] }
 0x3b3   : > { %4065 = vmatpush1.bf16.msra.mxu0 %v3380_v32  ;;  %v3620_v32 = vld [vmem:[#allocation3 + $0x850] sm:$0xff] }
 0x3b4   : > { %4106 = vmatpush1.bf16.msra.mxu1 %v3508_v33  ;;  %4066 = vmatprep.subr.bf16.mxu0 %v3389_v34  ;;  %v3748_v33 = vld [vmem:[#allocation3 + $0xc50] sm:$0xff]  ;;  %v3629_v34 = vld [vmem:[#allocation3 + $0x898] sm:$0xff] }
 0x3b5   : > { %4107 = vmatprep.subr.bf16.mxu1 %v3517_v35  ;;  %v3757_v35 = vld [vmem:[#allocation3 + $0xc98] sm:$0xff] }
 0x3b7   : > { %4067 = vmatpush1.bf16.msra.mxu0 %v3388_v37  ;;  %v3628_v37 = vld [vmem:[#allocation3 + $0x890] sm:$0xff] }
 0x3b8   : > { %4108 = vmatpush1.bf16.msra.mxu1 %v3516_v38  ;;  %4068 = vmatprep.subr.bf16.mxu0 %v3397_v39  ;;  %v3756_v38 = vld [vmem:[#allocation3 + $0xc90] sm:$0xff]  ;;  %v3637_v39 = vld [vmem:[#allocation3 + $0x8d8] sm:$0xff] }
 0x3b9   : > { %4109 = vmatprep.subr.bf16.mxu1 %v3525_v40  ;;  %v3765_v40 = vld [vmem:[#allocation3 + $0xcd8] sm:$0xff] }
 0x3bb   : > { %4069 = vmatpush1.bf16.msra.mxu0 %v3396_v41  ;;  %v3636_v41 = vld [vmem:[#allocation3 + $0x8d0] sm:$0xff] }
 0x3bc   : > { %4110 = vmatpush1.bf16.msra.mxu1 %v3524_v42  ;;  %4070 = vmatprep.subr.bf16.mxu0 %v3405_v43  ;;  %v3764_v42 = vld [vmem:[#allocation3 + $0xcd0] sm:$0xff]  ;;  %v3645_v43 = vld [vmem:[#allocation3 + $0x918] sm:$0xff] }
 0x3bd   : > { %4111 = vmatprep.subr.bf16.mxu1 %v3533_v44  ;;  %v3773_v44 = vld [vmem:[#allocation3 + $0xd18] sm:$0xff] }
 0x3bf   : > { %4071 = vmatpush1.bf16.msra.mxu0 %v3404_v25  ;;  %v3644_v25 = vld [vmem:[#allocation3 + $0x910] sm:$0xff] }
 0x3c0   : > { %4112 = vmatpush1.bf16.msra.mxu1 %v3532_v45  ;;  %4072 = vmatprep.subr.bf16.mxu0 %v3413_v46  ;;  %v3772_v45 = vld [vmem:[#allocation3 + $0xd10] sm:$0xff]  ;;  %v3653_v46 = vld [vmem:[#allocation3 + $0x958] sm:$0xff] }
 0x3c1   : > { %4113 = vmatprep.subr.bf16.mxu1 %v3541_v47  ;;  %v3781_v47 = vld [vmem:[#allocation3 + $0xd58] sm:$0xff] }
 0x3c3   : > { %4073 = vmatpush1.bf16.msra.mxu0 %v3412_v48  ;;  %v3652_v48 = vld [vmem:[#allocation3 + $0x950] sm:$0xff] }
 0x3c4   : > { %4114 = vmatpush1.bf16.msra.mxu1 %v3540_v49  ;;  %4074 = vmatprep.subr.bf16.mxu0 %v3421_v50  ;;  %v3780_v49 = vld [vmem:[#allocation3 + $0xd50] sm:$0xff]  ;;  %v3661_v50 = vld [vmem:[#allocation3 + $0x998] sm:$0xff] }
 0x3c5   : > { %4115 = vmatprep.subr.bf16.mxu1 %v3549_v51  ;;  %v3789_v51 = vld [vmem:[#allocation3 + $0xd98] sm:$0xff] }
 0x3c7   : > { %4075 = vmatpush1.bf16.msra.mxu0 %v3420_v52  ;;  %v3660_v52 = vld [vmem:[#allocation3 + $0x990] sm:$0xff] }
 0x3c8   : > { %4116 = vmatpush1.bf16.msra.mxu1 %v3548_v54  ;;  %4076 = vmatprep.subr.bf16.mxu0 %v3429_v55  ;;  %v3788_v54 = vld [vmem:[#allocation3 + $0xd90] sm:$0xff]  ;;  %v3669_v55 = vld [vmem:[#allocation3 + $0x9d8] sm:$0xff] }
 0x3c9   : > { %4117 = vmatprep.subr.bf16.mxu1 %v3557_v56  ;;  %v3797_v56 = vld [vmem:[#allocation3 + $0xdd8] sm:$0xff] }
 0x3cb   : > { %4077 = vmatpush1.bf16.msra.mxu0 %v3428_v58  ;;  %v3668_v58 = vld [vmem:[#allocation3 + $0x9d0] sm:$0xff] }
 0x3cc   : > { %4118 = vmatpush1.bf16.msra.mxu1 %v3556_v59  ;;  %4078 = vmatprep.subr.bf16.mxu0 %v3437_v36  ;;  %v3796_v59 = vld [vmem:[#allocation3 + $0xdd0] sm:$0xff]  ;;  %v3677_v36 = vld [vmem:[#allocation3 + $0xa18] sm:$0xff] }
 0x3cd   : > { %4119 = vmatprep.subr.bf16.mxu1 %v3565_v60  ;;  %v3805_v60 = vld [vmem:[#allocation3 + $0xe18] sm:$0xff] }
 0x3cf   : > { %4079 = vmatpush1.bf16.msra.mxu0 %v3436_v61  ;;  %v3676_v61 = vld [vmem:[#allocation3 + $0xa10] sm:$0xff] }
 0x3d0   : > { %4120 = vmatpush1.bf16.msra.mxu1 %v3564_v62  ;;  %4080 = vmatprep.subr.bf16.mxu0 %v3445_v63  ;;  %v3804_v62 = vld [vmem:[#allocation3 + $0xe10] sm:$0xff]  ;;  %v3685_v63 = vld [vmem:[#allocation3 + $0xa58] sm:$0xff] }
 0x3d1   : > { %4121 = vmatprep.subr.bf16.mxu1 %v3573_v0  ;;  %v3813_v0 = vld [vmem:[#allocation3 + $0xe58] sm:$0xff] }
 0x3d3   : > { %4081 = vmatpush1.bf16.msra.mxu0 %v3444_v57  ;;  %v3684_v57 = vld [vmem:[#allocation3 + $0xa50] sm:$0xff] }
 0x3d4   : > { %4122 = vmatpush1.bf16.msra.mxu1 %v3572_v12  ;;  %4082 = vmatprep.subr.bf16.mxu0 %v3453_v1  ;;  %v3812_v12 = vld [vmem:[#allocation3 + $0xe50] sm:$0xff]  ;;  %v3693_v1 = vld [vmem:[#allocation3 + $0xa98] sm:$0xff] }
 0x3d5   : > { %4123 = vmatprep.subr.bf16.mxu1 %v3581_v2  ;;  %v3821_v2 = vld [vmem:[#allocation3 + $0xe98] sm:$0xff] }
 0x3d7   : > { %4083 = vmatpush1.bf16.msra.mxu0 %v3452_v6  ;;  %v3692_v6 = vld [vmem:[#allocation3 + $0xa90] sm:$0xff] }
 0x3d8   : > { %4124 = vmatpush1.bf16.msra.mxu1 %v3580_v7  ;;  %4084 = vmatprep.subr.bf16.mxu0 %v3461_v8  ;;  %v3820_v7 = vld [vmem:[#allocation3 + $0xe90] sm:$0xff]  ;;  %v3701_v8 = vld [vmem:[#allocation3 + $0xad8] sm:$0xff] }
 0x3d9   : > { %4125 = vmatprep.subr.bf16.mxu1 %v3589_v53  ;;  %v3829_v53 = vld [vmem:[#allocation3 + $0xed8] sm:$0xff] }
 0x3db   : > { %4085 = vmatpush1.bf16.msra.mxu0 %v3460_v11  ;;  %v3700_v11 = vld [vmem:[#allocation3 + $0xad0] sm:$0xff] }
 0x3dc   : > { %4126 = vmatpush1.bf16.msra.mxu1 %v3588_v13  ;;  %4086 = vmatprep.subr.bf16.mxu0 %v3469_v15  ;;  %v3828_v13 = vld [vmem:[#allocation3 + $0xed0] sm:$0xff]  ;;  %v3709_v15 = vld [vmem:[#allocation3 + $0xb18] sm:$0xff] }
 0x3dd   : > { %4127 = vmatprep.subr.bf16.mxu1 %v3597_v14  ;;  %v3837_v14 = vld [vmem:[#allocation3 + $0xf18] sm:$0xff] }
 0x3df   : > { %4087 = vmatpush1.bf16.msra.mxu0 %v3468_v18  ;;  %v3708_v18 = vld [vmem:[#allocation3 + $0xb10] sm:$0xff] }
 0x3e0   : > { %4128 = vmatpush1.bf16.msra.mxu1 %v3596_v19  ;;  %4088 = vmatprep.subr.bf16.mxu0 %v3477_v20  ;;  %v3836_v19 = vld [vmem:[#allocation3 + $0xf10] sm:$0xff]  ;;  %v3717_v20 = vld [vmem:[#allocation3 + $0xb58] sm:$0xff] }
 0x3e1   : > { %4129 = vmatprep.subr.bf16.mxu1 %v3605_v21  ;;  %v3845_v21 = vld [vmem:[#allocation3 + $0xf58] sm:$0xff] }
 0x3e3   : > { %4089 = vmatpush1.bf16.msra.mxu0 %v3476_v5  ;;  %v3716_v5 = vld [vmem:[#allocation3 + $0xb50] sm:$0xff] }
 0x3e4   : > { %4130 = vmatpush1.bf16.msra.mxu1 %v3604_v23  ;;  %4140 = vmatprep.subr.bf16.mxu0 %v3613_v22  ;;  %v3844_v23 = vld [vmem:[#allocation3 + $0xf50] sm:$0xff]  ;;  %v3725_v22 = vld [vmem:[#allocation3 + $0xb98] sm:$0xff] }
 0x3e5   : > { %4181 = vmatprep.subr.bf16.mxu1 %v3741_v24  ;;  %v3853_v24 = vld [vmem:[#allocation3 + $0xf98] sm:$0xff] }
 0x3e6   : > { %4091 = vmatmul.mubr.bf16.vlgmr.msra.gmra.mrb[8].mxu0 %v7895_v3 }
 0x3e7   : > { %4132 = vmatmul.mubr.bf16.vlgmr.msra.gmra.mrb[8].mxu1 %v7899_v4  ;;  %4141 = vmatpush1.bf16.msra.mxu0 %v3612_v28  ;;  %v3724_v28 = vld [vmem:[#allocation3 + $0xb90] sm:$0xff] }
 0x3e8   : > { %4182 = vmatpush1.bf16.msra.mxu1 %v3740_v29  ;;  %4142 = vmatprep.subr.bf16.mxu0 %v3621_v30  ;;  %v3852_v29 = vld [vmem:[#allocation3 + $0xf90] sm:$0xff]  ;;  %v3733_v30 = vld [vmem:[#allocation3 + $0xbd8] sm:$0xff] }
 0x3e9   : > { %4183 = vmatprep.subr.bf16.mxu1 %v3749_v31  ;;  %4172 = vmatprep.mubr.bf16.mxu0 %v7913_v9  ;;  %v3861_v31 = vld [vmem:[#allocation3 + $0xfd8] sm:$0xff] }
 0x3ea   : > { %4213 = vmatprep.mubr.bf16.mxu1 %v7917_v10 }
 0x3eb   : > { %4143 = vmatpush1.bf16.msra.mxu0 %v3620_v32  ;;  %v3732_v32 = vld [vmem:[#allocation3 + $0xbd0] sm:$0xff] }
 0x3ec   : > { %4184 = vmatpush1.bf16.msra.mxu1 %v3748_v33  ;;  %4144 = vmatprep.subr.bf16.mxu0 %v3629_v34  ;;  %v3860_v33 = vld [vmem:[#allocation3 + $0xfd0] sm:$0xff]  ;;  %v3359_v34 = vld [vmem:[#allocation3 + $0x28] sm:$0xff] }
 0x3ed   : > { %4185 = vmatprep.subr.bf16.mxu1 %v3757_v35  ;;  %v3487_v35 = vld [vmem:[#allocation3 + $0x428] sm:$0xff] }
 0x3ef   : > { %4145 = vmatpush1.bf16.msra.mxu0 %v3628_v37  ;;  %v3358_v37 = vld [vmem:[#allocation3 + $0x20] sm:$0xff] }
 0x3f0   : > { %4186 = vmatpush1.bf16.msra.mxu1 %v3756_v38  ;;  %4146 = vmatprep.subr.bf16.mxu0 %v3637_v39  ;;  %v3486_v38 = vld [vmem:[#allocation3 + $0x420] sm:$0xff]  ;;  %v3367_v39 = vld [vmem:[#allocation3 + $0x68] sm:$0xff] }
 0x3f1   : > { %4187 = vmatprep.subr.bf16.mxu1 %v3765_v40  ;;  %v3495_v40 = vld [vmem:[#allocation3 + $0x468] sm:$0xff] }
 0x3f3   : > { %4147 = vmatpush1.bf16.msra.mxu0 %v3636_v41  ;;  %v3366_v41 = vld [vmem:[#allocation3 + $0x60] sm:$0xff] }
 0x3f4   : > { %4188 = vmatpush1.bf16.msra.mxu1 %v3764_v42  ;;  %4148 = vmatprep.subr.bf16.mxu0 %v3645_v43  ;;  %v3494_v42 = vld [vmem:[#allocation3 + $0x460] sm:$0xff]  ;;  %v3375_v43 = vld [vmem:[#allocation3 + $0xa8] sm:$0xff] }
 0x3f5   : > { %4189 = vmatprep.subr.bf16.mxu1 %v3773_v44  ;;  %v3503_v44 = vld [vmem:[#allocation3 + $0x4a8] sm:$0xff] }
 0x3f7   : > { %4149 = vmatpush1.bf16.msra.mxu0 %v3644_v25  ;;  %v3374_v25 = vld [vmem:[#allocation3 + $0xa0] sm:$0xff] }
 0x3f8   : > { %4190 = vmatpush1.bf16.msra.mxu1 %v3772_v45  ;;  %4150 = vmatprep.subr.bf16.mxu0 %v3653_v46  ;;  %v3502_v45 = vld [vmem:[#allocation3 + $0x4a0] sm:$0xff]  ;;  %v3383_v46 = vld [vmem:[#allocation3 + $0xe8] sm:$0xff] }
 0x3f9   : > { %4191 = vmatprep.subr.bf16.mxu1 %v3781_v47  ;;  %v3511_v47 = vld [vmem:[#allocation3 + $0x4e8] sm:$0xff] }
 0x3fb   : > { %4151 = vmatpush1.bf16.msra.mxu0 %v3652_v48  ;;  %v3382_v48 = vld [vmem:[#allocation3 + $0xe0] sm:$0xff] }
 0x3fc   : > { %4192 = vmatpush1.bf16.msra.mxu1 %v3780_v49  ;;  %4152 = vmatprep.subr.bf16.mxu0 %v3661_v50  ;;  %v3510_v49 = vld [vmem:[#allocation3 + $0x4e0] sm:$0xff]  ;;  %v3391_v50 = vld [vmem:[#allocation3 + $0x128] sm:$0xff] }
 0x3fd   : > { %4193 = vmatprep.subr.bf16.mxu1 %v3789_v51  ;;  %v3519_v51 = vld [vmem:[#allocation3 + $0x528] sm:$0xff] }
 0x3ff   : > { %4153 = vmatpush1.bf16.msra.mxu0 %v3660_v52  ;;  %v3390_v52 = vld [vmem:[#allocation3 + $0x120] sm:$0xff] }
 0x400   : > { %4194 = vmatpush1.bf16.msra.mxu1 %v3788_v54  ;;  %4154 = vmatprep.subr.bf16.mxu0 %v3669_v55  ;;  %v3518_v54 = vld [vmem:[#allocation3 + $0x520] sm:$0xff]  ;;  %v3399_v55 = vld [vmem:[#allocation3 + $0x168] sm:$0xff] }
 0x401   : > { %4195 = vmatprep.subr.bf16.mxu1 %v3797_v56  ;;  %v3527_v56 = vld [vmem:[#allocation3 + $0x568] sm:$0xff] }
 0x403   : > { %4155 = vmatpush1.bf16.msra.mxu0 %v3668_v58  ;;  %v3398_v58 = vld [vmem:[#allocation3 + $0x160] sm:$0xff] }
 0x404   : > { %4196 = vmatpush1.bf16.msra.mxu1 %v3796_v59  ;;  %4156 = vmatprep.subr.bf16.mxu0 %v3677_v36  ;;  %v3526_v59 = vld [vmem:[#allocation3 + $0x560] sm:$0xff] }
 0x405   : > { %4197 = vmatprep.subr.bf16.mxu1 %v3805_v60 }
 0x407   : > { %4157 = vmatpush1.bf16.msra.mxu0 %v3676_v61  ;;  %v3407_v61 = vld [vmem:[#allocation3 + $0x1a8] sm:$0xff] }
 0x408   : > { %4198 = vmatpush1.bf16.msra.mxu1 %v3804_v62  ;;  %4158 = vmatprep.subr.bf16.mxu0 %v3685_v63  ;;  %v3535_v62 = vld [vmem:[#allocation3 + $0x5a8] sm:$0xff] }
 0x409   : > { %4199 = vmatprep.subr.bf16.mxu1 %v3813_v0 }
 0x40b   : > { %4159 = vmatpush1.bf16.msra.mxu0 %v3684_v57 }
 0x40c   : > { %4200 = vmatpush1.bf16.msra.mxu1 %v3812_v12  ;;  %4160 = vmatprep.subr.bf16.mxu0 %v3693_v1 }
 0x40d   : > { %4201 = vmatprep.subr.bf16.mxu1 %v3821_v2 }
 0x40f   : > { %4161 = vmatpush1.bf16.msra.mxu0 %v3692_v6 }
 0x410   : > { %4202 = vmatpush1.bf16.msra.mxu1 %v3820_v7  ;;  %4162 = vmatprep.subr.bf16.mxu0 %v3701_v8  ;;  %v3406_v8 = vld [vmem:[#allocation3 + $0x1a0] sm:$0xff] }
 0x411   : > { %4203 = vmatprep.subr.bf16.mxu1 %v3829_v53  ;;  %v3534_v53 = vld [vmem:[#allocation3 + $0x5a0] sm:$0xff] }
 0x413   : > { %4163 = vmatpush1.bf16.msra.mxu0 %v3700_v11  ;;  %v3415_v11 = vld [vmem:[#allocation3 + $0x1e8] sm:$0xff] }
 0x414   : > { %4204 = vmatpush1.bf16.msra.mxu1 %v3828_v13  ;;  %4164 = vmatprep.subr.bf16.mxu0 %v3709_v15  ;;  %v3543_v13 = vld [vmem:[#allocation3 + $0x5e8] sm:$0xff]  ;;  %v3414_v15 = vld [vmem:[#allocation3 + $0x1e0] sm:$0xff] }
 0x415   : > { %4205 = vmatprep.subr.bf16.mxu1 %v3837_v14  ;;  %v3542_v14 = vld [vmem:[#allocation3 + $0x5e0] sm:$0xff] }
 0x417   : > { %4165 = vmatpush1.bf16.msra.mxu0 %v3708_v18  ;;  %v3423_v18 = vld [vmem:[#allocation3 + $0x228] sm:$0xff] }
 0x418   : > { %4206 = vmatpush1.bf16.msra.mxu1 %v3836_v19  ;;  %4166 = vmatprep.subr.bf16.mxu0 %v3717_v20  ;;  %v3551_v19 = vld [vmem:[#allocation3 + $0x628] sm:$0xff]  ;;  %v3422_v20 = vld [vmem:[#allocation3 + $0x220] sm:$0xff] }
 0x419   : > { %4207 = vmatprep.subr.bf16.mxu1 %v3845_v21  ;;  %v3550_v21 = vld [vmem:[#allocation3 + $0x620] sm:$0xff] }
 0x41b   : > { %4167 = vmatpush1.bf16.msra.mxu0 %v3716_v5  ;;  %v3431_v5 = vld [vmem:[#allocation3 + $0x268] sm:$0xff] }
 0x41c   : > { %4208 = vmatpush1.bf16.msra.mxu1 %v3844_v23  ;;  %4168 = vmatprep.subr.bf16.mxu0 %v3725_v22  ;;  %v3559_v23 = vld [vmem:[#allocation3 + $0x668] sm:$0xff]  ;;  %v3430_v22 = vld [vmem:[#allocation3 + $0x260] sm:$0xff] }
 0x41d   : > { %4209 = vmatprep.subr.bf16.mxu1 %v3853_v24  ;;  %v3558_v24 = vld [vmem:[#allocation3 + $0x660] sm:$0xff] }
 0x41f   : > { %4169 = vmatpush1.bf16.msra.mxu0 %v3724_v28  ;;  %v3439_v28 = vld [vmem:[#allocation3 + $0x2a8] sm:$0xff] }
 0x420   : > { %4210 = vmatpush1.bf16.msra.mxu1 %v3852_v29  ;;  %4170 = vmatprep.subr.bf16.mxu0 %v3733_v30  ;;  %v3567_v29 = vld [vmem:[#allocation3 + $0x6a8] sm:$0xff]  ;;  %v3438_v30 = vld [vmem:[#allocation3 + $0x2a0] sm:$0xff] }
 0x421   : > { %4211 = vmatprep.subr.bf16.mxu1 %v3861_v31  ;;  %v3566_v31 = vld [vmem:[#allocation3 + $0x6a0] sm:$0xff] }
 0x423   : > { %4171 = vmatpush1.bf16.msra.mxu0 %v3732_v32  ;;  %v3447_v32 = vld [vmem:[#allocation3 + $0x2e8] sm:$0xff] }
 0x424   : > { %4212 = vmatpush1.bf16.msra.mxu1 %v3860_v33  ;;  %4222 = vmatprep.subr.bf16.mxu0 %v3359_v34  ;;  %v3575_v33 = vld [vmem:[#allocation3 + $0x6e8] sm:$0xff]  ;;  %v3446_v34 = vld [vmem:[#allocation3 + $0x2e0] sm:$0xff] }
 0x425   : > { %4263 = vmatprep.subr.bf16.mxu1 %v3487_v35  ;;  %v3574_v35 = vld [vmem:[#allocation3 + $0x6e0] sm:$0xff] }
 0x426   : > { %4173 = vmatmul.mubr.bf16.vlgmr.msra.gmra.mrb[12].mxu0 %v7925_v16 }
 0x427   : > { %4214 = vmatmul.mubr.bf16.vlgmr.msra.gmra.mrb[12].mxu1 %v7929_v17  ;;  %4223 = vmatpush1.bf16.msra.mxu0 %v3358_v37  ;;  %v3455_v37 = vld [vmem:[#allocation3 + $0x328] sm:$0xff] }
 0x428   : > { %4264 = vmatpush1.bf16.msra.mxu1 %v3486_v38  ;;  %4224 = vmatprep.subr.bf16.mxu0 %v3367_v39  ;;  %v3583_v38 = vld [vmem:[#allocation3 + $0x728] sm:$0xff]  ;;  %v3454_v39 = vld [vmem:[#allocation3 + $0x320] sm:$0xff] }
 0x429   : > { %4265 = vmatprep.subr.bf16.mxu1 %v3495_v40  ;;  %4254 = vmatprep.mubr.bf16.mxu0 %v7885_v26  ;;  %v3582_v40 = vld [vmem:[#allocation3 + $0x720] sm:$0xff] }
 0x42a   : > { %4295 = vmatprep.mubr.bf16.mxu1 %v7889_v27 }
 0x42b   : > { %4225 = vmatpush1.bf16.msra.mxu0 %v3366_v41  ;;  %v3463_v41 = vld [vmem:[#allocation3 + $0x368] sm:$0xff] }
 0x42c   : > { %4266 = vmatpush1.bf16.msra.mxu1 %v3494_v42  ;;  %4226 = vmatprep.subr.bf16.mxu0 %v3375_v43  ;;  %v3591_v42 = vld [vmem:[#allocation3 + $0x768] sm:$0xff]  ;;  %v3462_v43 = vld [vmem:[#allocation3 + $0x360] sm:$0xff] }
 0x42d   : > { %4267 = vmatprep.subr.bf16.mxu1 %v3503_v44  ;;  %v3590_v44 = vld [vmem:[#allocation3 + $0x760] sm:$0xff] }
 0x42f   : > { %4227 = vmatpush1.bf16.msra.mxu0 %v3374_v25  ;;  %v3471_v25 = vld [vmem:[#allocation3 + $0x3a8] sm:$0xff] }
 0x430   : > { %4268 = vmatpush1.bf16.msra.mxu1 %v3502_v45  ;;  %4228 = vmatprep.subr.bf16.mxu0 %v3383_v46  ;;  %v3599_v45 = vld [vmem:[#allocation3 + $0x7a8] sm:$0xff]  ;;  %v3470_v46 = vld [vmem:[#allocation3 + $0x3a0] sm:$0xff] }
 0x431   : > { %4269 = vmatprep.subr.bf16.mxu1 %v3511_v47  ;;  %v3598_v47 = vld [vmem:[#allocation3 + $0x7a0] sm:$0xff] }
 0x433   : > { %4229 = vmatpush1.bf16.msra.mxu0 %v3382_v48  ;;  %v3479_v48 = vld [vmem:[#allocation3 + $0x3e8] sm:$0xff] }
 0x434   : > { %4270 = vmatpush1.bf16.msra.mxu1 %v3510_v49  ;;  %4230 = vmatprep.subr.bf16.mxu0 %v3391_v50  ;;  %v3607_v49 = vld [vmem:[#allocation3 + $0x7e8] sm:$0xff]  ;;  %v3478_v50 = vld [vmem:[#allocation3 + $0x3e0] sm:$0xff] }
 0x435   : > { %4271 = vmatprep.subr.bf16.mxu1 %v3519_v51  ;;  %v3606_v51 = vld [vmem:[#allocation3 + $0x7e0] sm:$0xff] }
 0x437   : > { %4231 = vmatpush1.bf16.msra.mxu0 %v3390_v52  ;;  %v3615_v52 = vld [vmem:[#allocation3 + $0x828] sm:$0xff] }
 0x438   : > { %4272 = vmatpush1.bf16.msra.mxu1 %v3518_v54  ;;  %4232 = vmatprep.subr.bf16.mxu0 %v3399_v55  ;;  %v3743_v54 = vld [vmem:[#allocation3 + $0xc28] sm:$0xff]  ;;  %v3614_v55 = vld [vmem:[#allocation3 + $0x820] sm:$0xff] }
 0x439   : > { %4273 = vmatprep.subr.bf16.mxu1 %v3527_v56  ;;  %v3928_v36 = vpop.f32.mrb[0].mxu0  ;;  %v3742_v56 = vld [vmem:[#allocation3 + $0xc20] sm:$0xff] }
 0x43a   : > { %v3969_v60 = vpop.f32.mrb[0].mxu1  ;;  %v3930_v0 = vpop.f32.mrb[1].mxu0 }
 0x43b   : > { %v7943_v63 = vadd.f32 %v3969_v60, %v3928_v36  ;;  %v3971_v57 = vpop.f32.mrb[1].mxu1  ;;  %v3932_v1 = vpop.f32.mrb[2].mxu0  ;;  %4233 = vmatpush1.bf16.msra.mxu0 %v3398_v58  ;;  %v3623_v58 = vld [vmem:[#allocation3 + $0x868] sm:$0xff]  ;;  %v3622_v36 = vld [vmem:[#allocation3 + $0x860] sm:$0xff] }
 0x43c   : > { %v7945_v12 = vadd.f32 %v3971_v57, %v3930_v0  ;;  %v3973_v2 = vpop.f32.mrb[2].mxu1  ;;  %4274 = vmatpush1.bf16.msra.mxu1 %v3526_v59  ;;  %v3933_v6 = vpop.f32.mrb[3].mxu0  ;;  %4234 = vmatprep.subr.bf16.mxu0 %v3407_v61  ;;  %v3751_v59 = vld [vmem:[#allocation3 + $0xc68] sm:$0xff]  ;;  %v3750_v60 = vld [vmem:[#allocation3 + $0xc60] sm:$0xff] }
 0x43d   : > { %v3974_v7 = vpop.f32.mrb[3].mxu1  ;;  %4275 = vmatprep.subr.bf16.mxu1 %v3535_v62  ;;  %v3631_v61 = vld [vmem:[#allocation3 + $0x8a8] sm:$0xff]  ;;  %v3630_v0 = vld [vmem:[#allocation3 + $0x8a0] sm:$0xff] }
 0x43e   : > { %v3759_v62 = vld [vmem:[#allocation3 + $0xca8] sm:$0xff]  ;;  %v3758_v57 = vld [vmem:[#allocation3 + $0xca0] sm:$0xff] }
 0x43f   : > { %4235 = vmatpush1.bf16.msra.mxu0 %v3406_v8  ;;  %v3639_v1 = vld [vmem:[#allocation3 + $0x8e8] sm:$0xff]  ;;  %v3638_v6 = vld [vmem:[#allocation3 + $0x8e0] sm:$0xff] }
 0x440   : > { %4276 = vmatpush1.bf16.msra.mxu1 %v3534_v53  ;;  %4236 = vmatprep.subr.bf16.mxu0 %v3415_v11  ;;  %v3767_v2 = vld [vmem:[#allocation3 + $0xce8] sm:$0xff]  ;;  %v3766_v7 = vld [vmem:[#allocation3 + $0xce0] sm:$0xff] }
 0x441   : > { %4277 = vmatprep.subr.bf16.mxu1 %v3543_v13  ;;  %v3647_v8 = vld [vmem:[#allocation3 + $0x928] sm:$0xff]  ;;  %v3646_v11 = vld [vmem:[#allocation3 + $0x920] sm:$0xff] }
 0x442   : > { %v3775_v53 = vld [vmem:[#allocation3 + $0xd28] sm:$0xff]  ;;  %v3774_v13 = vld [vmem:[#allocation3 + $0xd20] sm:$0xff] }
 0x443   : > { %4237 = vmatpush1.bf16.msra.mxu0 %v3414_v15  ;;  %v3655_v15 = vld [vmem:[#allocation3 + $0x968] sm:$0xff] }
 0x444   : > { %4278 = vmatpush1.bf16.msra.mxu1 %v3542_v14  ;;  %4238 = vmatprep.subr.bf16.mxu0 %v3423_v18  ;;  %v3783_v14 = vld [vmem:[#allocation3 + $0xd68] sm:$0xff]  ;;  %v3654_v18 = vld [vmem:[#allocation3 + $0x960] sm:$0xff] }
 0x445   : > { %4279 = vmatprep.subr.bf16.mxu1 %v3551_v19  ;;  %v3782_v19 = vld [vmem:[#allocation3 + $0xd60] sm:$0xff] }
 0x447   : > { %4239 = vmatpush1.bf16.msra.mxu0 %v3422_v20 }
 0x448   : > { %4280 = vmatpush1.bf16.msra.mxu1 %v3550_v21  ;;  %4240 = vmatprep.subr.bf16.mxu0 %v3431_v5  ;;  %v3663_v5 = vld [vmem:[#allocation3 + $0x9a8] sm:$0xff] }
 0x449   : > { %4281 = vmatprep.subr.bf16.mxu1 %v3559_v23  ;;  %v3791_v23 = vld [vmem:[#allocation3 + $0xda8] sm:$0xff] }
 0x44b   : > { %4241 = vmatpush1.bf16.msra.mxu0 %v3430_v22 }
 0x44c   : > { %4282 = vmatpush1.bf16.msra.mxu1 %v3558_v24  ;;  %4242 = vmatprep.subr.bf16.mxu0 %v3439_v28 }
 0x44d   : > { %4283 = vmatprep.subr.bf16.mxu1 %v3567_v29  ;;  %v3342_v29 = vld [vmem:[#allocation2] sm:$0xff] }
 0x44f   : > { %4243 = vmatpush1.bf16.msra.mxu0 %v3438_v30 }
 0x450   : > { %4284 = vmatpush1.bf16.msra.mxu1 %v3566_v31  ;;  %4244 = vmatprep.subr.bf16.mxu0 %v3447_v32 }
 0x451   : > { %4285 = vmatprep.subr.bf16.mxu1 %v3575_v33 }
 0x453   : > { %4245 = vmatpush1.bf16.msra.mxu0 %v3446_v34  ;;  %v3343_v34 = vld [vmem:[#allocation2 + $0x8] sm:$0xff] }
 0x454   : > { %4286 = vmatpush1.bf16.msra.mxu1 %v3574_v35  ;;  %4246 = vmatprep.subr.bf16.mxu0 %v3455_v37 }
 0x455   : > { %4287 = vmatprep.subr.bf16.mxu1 %v3583_v38  ;;  %v3662_v38 = vld [vmem:[#allocation3 + $0x9a0] sm:$0xff] }
 0x457   : > { %4247 = vmatpush1.bf16.msra.mxu0 %v3454_v39  ;;  %v3790_v39 = vld [vmem:[#allocation3 + $0xda0] sm:$0xff] }
 0x458   : > { %4288 = vmatpush1.bf16.msra.mxu1 %v3582_v40  ;;  %4248 = vmatprep.subr.bf16.mxu0 %v3463_v41  ;;  %v3671_v41 = vld [vmem:[#allocation3 + $0x9e8] sm:$0xff] }
 0x459   : > { %4289 = vmatprep.subr.bf16.mxu1 %v3591_v42 }
 0x45b   : > { %4249 = vmatpush1.bf16.msra.mxu0 %v3462_v43 }
 0x45c   : > { %4290 = vmatpush1.bf16.msra.mxu1 %v3590_v44  ;;  %4250 = vmatprep.subr.bf16.mxu0 %v3471_v25  ;;  %v3798_v44 = vld [vmem:[#allocation3 + $0xde0] sm:$0xff]  ;;  %v3679_v25 = vld [vmem:[#allocation3 + $0xa28] sm:$0xff] }
 0x45d   : > { %4291 = vmatprep.subr.bf16.mxu1 %v3599_v45  ;;  %v3807_v45 = vld [vmem:[#allocation3 + $0xe28] sm:$0xff] }
 0x45f   : > { %4251 = vmatpush1.bf16.msra.mxu0 %v3470_v46  ;;  %v3678_v46 = vld [vmem:[#allocation3 + $0xa20] sm:$0xff] }
 0x460   : > { %4292 = vmatpush1.bf16.msra.mxu1 %v3598_v47  ;;  %4252 = vmatprep.subr.bf16.mxu0 %v3479_v48  ;;  %v3806_v47 = vld [vmem:[#allocation3 + $0xe20] sm:$0xff]  ;;  %v3687_v48 = vld [vmem:[#allocation3 + $0xa68] sm:$0xff] }
 0x461   : > { %4293 = vmatprep.subr.bf16.mxu1 %v3607_v49  ;;  %v3815_v49 = vld [vmem:[#allocation3 + $0xe68] sm:$0xff] }
 0x463   : > { %4253 = vmatpush1.bf16.msra.mxu0 %v3478_v50  ;;  %v3686_v50 = vld [vmem:[#allocation3 + $0xa60] sm:$0xff] }
 0x464   : > { %4294 = vmatpush1.bf16.msra.mxu1 %v3606_v51  ;;  %4304 = vmatprep.subr.bf16.mxu0 %v3615_v52  ;;  %v3814_v51 = vld [vmem:[#allocation3 + $0xe60] sm:$0xff]  ;;  %v3695_v52 = vld [vmem:[#allocation3 + $0xaa8] sm:$0xff] }
 0x465   : > { %4345 = vmatprep.subr.bf16.mxu1 %v3743_v54  ;;  %v3823_v54 = vld [vmem:[#allocation3 + $0xea8] sm:$0xff] }
 0x466   : > { %4255 = vmatmul.mubr.bf16.vlgmr.msra.gmra.mrb[16].mxu0 %v7895_v3 }
 0x467   : > { %4296 = vmatmul.mubr.bf16.vlgmr.msra.gmra.mrb[16].mxu1 %v7899_v4  ;;  %4305 = vmatpush1.bf16.msra.mxu0 %v3614_v55  ;;  %v3694_v55 = vld [vmem:[#allocation3 + $0xaa0] sm:$0xff] }
 0x468   : > { %4346 = vmatpush1.bf16.msra.mxu1 %v3742_v56  ;;  %4306 = vmatprep.subr.bf16.mxu0 %v3623_v58  ;;  %v3822_v56 = vld [vmem:[#allocation3 + $0xea0] sm:$0xff]  ;;  %v3703_v58 = vld [vmem:[#allocation3 + $0xae8] sm:$0xff] }
 0x469   : > { %4347 = vmatprep.subr.bf16.mxu1 %v3751_v59  ;;  %4336 = vmatprep.mubr.bf16.mxu0 %v7913_v9  ;;  %v3831_v59 = vld [vmem:[#allocation3 + $0xee8] sm:$0xff] }
 0x46a   : > { %4377 = vmatprep.mubr.bf16.mxu1 %v7917_v10 }
 0x46b   : > { %4307 = vmatpush1.bf16.msra.mxu0 %v3622_v36  ;;  %v3702_v36 = vld [vmem:[#allocation3 + $0xae0] sm:$0xff] }
 0x46c   : > { %4348 = vmatpush1.bf16.msra.mxu1 %v3750_v60  ;;  %4308 = vmatprep.subr.bf16.mxu0 %v3631_v61  ;;  %v3830_v60 = vld [vmem:[#allocation3 + $0xee0] sm:$0xff]  ;;  %v3711_v61 = vld [vmem:[#allocation3 + $0xb28] sm:$0xff] }
 0x46d   : > { %4349 = vmatprep.subr.bf16.mxu1 %v3759_v62  ;;  %v3839_v62 = vld [vmem:[#allocation3 + $0xf28] sm:$0xff] }
 0x46f   : > { %4309 = vmatpush1.bf16.msra.mxu0 %v3630_v0  ;;  %v3710_v0 = vld [vmem:[#allocation3 + $0xb20] sm:$0xff] }
 0x470   : > { %4350 = vmatpush1.bf16.msra.mxu1 %v3758_v57  ;;  %4310 = vmatprep.subr.bf16.mxu0 %v3639_v1  ;;  %v3838_v57 = vld [vmem:[#allocation3 + $0xf20] sm:$0xff]  ;;  %v3719_v1 = vld [vmem:[#allocation3 + $0xb68] sm:$0xff] }
 0x471   : > { %4351 = vmatprep.subr.bf16.mxu1 %v3767_v2  ;;  %v3847_v2 = vld [vmem:[#allocation3 + $0xf68] sm:$0xff] }
 0x473   : > { %4311 = vmatpush1.bf16.msra.mxu0 %v3638_v6  ;;  %v3718_v6 = vld [vmem:[#allocation3 + $0xb60] sm:$0xff] }
 0x474   : > { %4352 = vmatpush1.bf16.msra.mxu1 %v3766_v7  ;;  %4312 = vmatprep.subr.bf16.mxu0 %v3647_v8  ;;  %v3846_v7 = vld [vmem:[#allocation3 + $0xf60] sm:$0xff]  ;;  %v3727_v8 = vld [vmem:[#allocation3 + $0xba8] sm:$0xff] }
 0x475   : > { %4353 = vmatprep.subr.bf16.mxu1 %v3775_v53  ;;  %v3855_v53 = vld [vmem:[#allocation3 + $0xfa8] sm:$0xff] }
 0x477   : > { %4313 = vmatpush1.bf16.msra.mxu0 %v3646_v11  ;;  %v3726_v11 = vld [vmem:[#allocation3 + $0xba0] sm:$0xff] }
 0x478   : > { %4354 = vmatpush1.bf16.msra.mxu1 %v3774_v13  ;;  %4314 = vmatprep.subr.bf16.mxu0 %v3655_v15  ;;  %v3854_v13 = vld [vmem:[#allocation3 + $0xfa0] sm:$0xff]  ;;  %v3735_v15 = vld [vmem:[#allocation3 + $0xbe8] sm:$0xff] }
 0x479   : > { %4355 = vmatprep.subr.bf16.mxu1 %v3783_v14  ;;  %v4010_v20 = vpop.f32.mrb[4].mxu0  ;;  %v3863_v14 = vld [vmem:[#allocation3 + $0xfe8] sm:$0xff] }
 0x47a   : > { %v4051_v21 = vpop.f32.mrb[4].mxu1  ;;  %v4011_v22 = vadd.f32 %v4010_v20, %v7943_v63  ;;  %v4012_v24 = vpop.f32.mrb[5].mxu0  ;;  %v3799_v63 = vld [vmem:[#allocation3 + $0xde8] sm:$0xff]  ;;  %v3361_v20 = vld [vmem:[#allocation3 + $0x38] sm:$0xff] }
 0x47b   : > { %v4053_v28 = vpop.f32.mrb[5].mxu1  ;;  %v4013_v30 = vadd.f32 %v4012_v24, %v7945_v12  ;;  %v4014_v31 = vpop.f32.mrb[6].mxu0  ;;  %4315 = vmatpush1.bf16.msra.mxu0 %v3654_v18  ;;  %v3670_v12 = vld [vmem:[#allocation3 + $0x9e0] sm:$0xff]  ;;  %v3497_v24 = vld [vmem:[#allocation3 + $0x478] sm:$0xff] }
 0x47c   : > { %v4055_v32 = vpop.f32.mrb[6].mxu1  ;;  %4356 = vmatpush1.bf16.msra.mxu1 %v3782_v19  ;;  %v4052_v33 = vadd.f32 %v4051_v21, %v4011_v22  ;;  %v4015_v35 = vpop.f32.mrb[7].mxu0  ;;  %4316 = vmatprep.subr.bf16.mxu0 %v3663_v5  ;;  %v3734_v18 = vld [vmem:[#allocation3 + $0xbe0] sm:$0xff]  ;;  %v3489_v21 = vld [vmem:[#allocation3 + $0x438] sm:$0xff]  ;;  %v3360_v5 = vld [vmem:[#allocation3 + $0x30] sm:$0xff] }
 0x47d   : > { %v4056_v37 = vpop.f32.mrb[7].mxu1  ;;  %4357 = vmatprep.subr.bf16.mxu1 %v3791_v23  ;;  %v4054_v40 = vadd.f32 %v4053_v28, %v4013_v30  ;;  %v3862_v19 = vld [vmem:[#allocation3 + $0xfe0] sm:$0xff]  ;;  %v3488_v23 = vld [vmem:[#allocation3 + $0x430] sm:$0xff]  ;;  %v3369_v22 = vld [vmem:[#allocation3 + $0x78] sm:$0xff] }
 0x47e   : > { %v4550_v42 = vadd.f32 %v4052_v33, %v3342_v29  ;;  %v3368_v28 = vld [vmem:[#allocation3 + $0x70] sm:$0xff]  ;;  %v3377_v30 = vld [vmem:[#allocation3 + $0xb8] sm:$0xff] }
 0x47f   : > { %v4551_v43 = vadd.f32 %v4054_v40, %v3343_v34  ;;  %4317 = vmatpush1.bf16.msra.mxu0 %v3662_v38  ;;  %v3496_v29 = vld [vmem:[#allocation3 + $0x470] sm:$0xff]  ;;  %v3505_v31 = vld [vmem:[#allocation3 + $0x4b8] sm:$0xff] }
 0x480   : > { %4358 = vmatpush1.bf16.msra.mxu1 %v3790_v39  ;;  %4558 = vst [vmem:[#allocation2] sm:$0xff] %v4550_v42  ;;  %4318 = vmatprep.subr.bf16.mxu0 %v3671_v41  ;;  %v3376_v32 = vld [vmem:[#allocation3 + $0xb0] sm:$0xff]  ;;  %v3385_v34 = vld [vmem:[#allocation3 + $0xf8] sm:$0xff] }
 0x481   : > { %4359 = vmatprep.subr.bf16.mxu1 %v3799_v63  ;;  %4559 = vst [vmem:[#allocation2 + $0x8] sm:$0xff] %v4551_v43  ;;  %v3504_v33 = vld [vmem:[#allocation3 + $0x4b0] sm:$0xff]  ;;  %v3513_v35 = vld [vmem:[#allocation3 + $0x4f8] sm:$0xff] }
 0x482   : > { %v3384_v37 = vld [vmem:[#allocation3 + $0xf0] sm:$0xff]  ;;  %v3393_v39 = vld [vmem:[#allocation3 + $0x138] sm:$0xff] }
 0x483   : > { %4319 = vmatpush1.bf16.msra.mxu0 %v3670_v12  ;;  %v3512_v38 = vld [vmem:[#allocation3 + $0x4f0] sm:$0xff]  ;;  %v3521_v40 = vld [vmem:[#allocation3 + $0x538] sm:$0xff] }
 0x484   : > { %4360 = vmatpush1.bf16.msra.mxu1 %v3798_v44  ;;  %4320 = vmatprep.subr.bf16.mxu0 %v3679_v25  ;;  %v3401_v41 = vld [vmem:[#allocation3 + $0x178] sm:$0xff]  ;;  %v3400_v42 = vld [vmem:[#allocation3 + $0x170] sm:$0xff] }
 0x485   : > { %4361 = vmatprep.subr.bf16.mxu1 %v3807_v45  ;;  %v3529_v63 = vld [vmem:[#allocation3 + $0x578] sm:$0xff]  ;;  %v3528_v43 = vld [vmem:[#allocation3 + $0x570] sm:$0xff] }
 0x486   : > { %v3409_v25 = vld [vmem:[#allocation3 + $0x1b8] sm:$0xff] }
 0x487   : > { %4321 = vmatpush1.bf16.msra.mxu0 %v3678_v46  ;;  %v3537_v45 = vld [vmem:[#allocation3 + $0x5b8] sm:$0xff] }
 0x488   : > { %4362 = vmatpush1.bf16.msra.mxu1 %v3806_v47  ;;  %4322 = vmatprep.subr.bf16.mxu0 %v3687_v48 }
 0x489   : > { %4363 = vmatprep.subr.bf16.mxu1 %v3815_v49 }
 0x48b   : > { %4323 = vmatpush1.bf16.msra.mxu0 %v3686_v50 }
 0x48c   : > { %4364 = vmatpush1.bf16.msra.mxu1 %v3814_v51  ;;  %4324 = vmatprep.subr.bf16.mxu0 %v3695_v52 }
 0x48d   : > { %4365 = vmatprep.subr.bf16.mxu1 %v3823_v54 }
 0x48f   : > { %4325 = vmatpush1.bf16.msra.mxu0 %v3694_v55  ;;  %v3408_v55 = vld [vmem:[#allocation3 + $0x1b0] sm:$0xff] }
 0x490   : > { %4366 = vmatpush1.bf16.msra.mxu1 %v3822_v56  ;;  %4326 = vmatprep.subr.bf16.mxu0 %v3703_v58  ;;  %v3536_v56 = vld [vmem:[#allocation3 + $0x5b0] sm:$0xff]  ;;  %v3417_v58 = vld [vmem:[#allocation3 + $0x1f8] sm:$0xff] }
 0x491   : > { %4367 = vmatprep.subr.bf16.mxu1 %v3831_v59  ;;  %v3545_v59 = vld [vmem:[#allocation3 + $0x5f8] sm:$0xff] }
 0x493   : > { %4327 = vmatpush1.bf16.msra.mxu0 %v3702_v36  ;;  %v3416_v36 = vld [vmem:[#allocation3 + $0x1f0] sm:$0xff] }
 0x494   : > { %4368 = vmatpush1.bf16.msra.mxu1 %v3830_v60  ;;  %4328 = vmatprep.subr.bf16.mxu0 %v3711_v61  ;;  %v3544_v60 = vld [vmem:[#allocation3 + $0x5f0] sm:$0xff]  ;;  %v3425_v61 = vld [vmem:[#allocation3 + $0x238] sm:$0xff] }
 0x495   : > { %4369 = vmatprep.subr.bf16.mxu1 %v3839_v62  ;;  %v3553_v62 = vld [vmem:[#allocation3 + $0x638] sm:$0xff] }
 0x497   : > { %4329 = vmatpush1.bf16.msra.mxu0 %v3710_v0  ;;  %v3424_v0 = vld [vmem:[#allocation3 + $0x230] sm:$0xff] }
 0x498   : > { %4370 = vmatpush1.bf16.msra.mxu1 %v3838_v57  ;;  %4330 = vmatprep.subr.bf16.mxu0 %v3719_v1  ;;  %v3552_v57 = vld [vmem:[#allocation3 + $0x630] sm:$0xff]  ;;  %v3433_v1 = vld [vmem:[#allocation3 + $0x278] sm:$0xff] }
 0x499   : > { %4371 = vmatprep.subr.bf16.mxu1 %v3847_v2  ;;  %v3561_v2 = vld [vmem:[#allocation3 + $0x678] sm:$0xff] }
 0x49b   : > { %4331 = vmatpush1.bf16.msra.mxu0 %v3718_v6  ;;  %v3432_v6 = vld [vmem:[#allocation3 + $0x270] sm:$0xff] }
 0x49c   : > { %4372 = vmatpush1.bf16.msra.mxu1 %v3846_v7  ;;  %4332 = vmatprep.subr.bf16.mxu0 %v3727_v8  ;;  %v3560_v7 = vld [vmem:[#allocation3 + $0x670] sm:$0xff]  ;;  %v3441_v8 = vld [vmem:[#allocation3 + $0x2b8] sm:$0xff] }
 0x49d   : > { %4373 = vmatprep.subr.bf16.mxu1 %v3855_v53  ;;  %v3569_v53 = vld [vmem:[#allocation3 + $0x6b8] sm:$0xff] }
 0x49f   : > { %4333 = vmatpush1.bf16.msra.mxu0 %v3726_v11  ;;  %v3440_v11 = vld [vmem:[#allocation3 + $0x2b0] sm:$0xff] }
 0x4a0   : > { %4374 = vmatpush1.bf16.msra.mxu1 %v3854_v13  ;;  %4334 = vmatprep.subr.bf16.mxu0 %v3735_v15  ;;  %v3568_v13 = vld [vmem:[#allocation3 + $0x6b0] sm:$0xff]  ;;  %v3449_v15 = vld [vmem:[#allocation3 + $0x2f8] sm:$0xff] }
 0x4a1   : > { %4375 = vmatprep.subr.bf16.mxu1 %v3863_v14  ;;  %v3577_v14 = vld [vmem:[#allocation3 + $0x6f8] sm:$0xff] }
 0x4a3   : > { %4335 = vmatpush1.bf16.msra.mxu0 %v3734_v18  ;;  %v3448_v18 = vld [vmem:[#allocation3 + $0x2f0] sm:$0xff] }
 0x4a4   : > { %4376 = vmatpush1.bf16.msra.mxu1 %v3862_v19  ;;  %4386 = vmatprep.subr.bf16.mxu0 %v3361_v20  ;;  %v3576_v19 = vld [vmem:[#allocation3 + $0x6f0] sm:$0xff]  ;;  %v3457_v20 = vld [vmem:[#allocation3 + $0x338] sm:$0xff] }
 0x4a5   : > { %4427 = vmatprep.subr.bf16.mxu1 %v3489_v21  ;;  %v3585_v21 = vld [vmem:[#allocation3 + $0x738] sm:$0xff] }
 0x4a6   : > { %4337 = vmatmul.mubr.bf16.vlgmr.msra.gmra.mrb[20].mxu0 %v7925_v16 }
 0x4a7   : > { %4378 = vmatmul.mubr.bf16.vlgmr.msra.gmra.mrb[20].mxu1 %v7929_v17  ;;  %4387 = vmatpush1.bf16.msra.mxu0 %v3360_v5  ;;  %v3456_v5 = vld [vmem:[#allocation3 + $0x330] sm:$0xff] }
 0x4a8   : > { %4428 = vmatpush1.bf16.msra.mxu1 %v3488_v23  ;;  %4388 = vmatprep.subr.bf16.mxu0 %v3369_v22  ;;  %v3584_v23 = vld [vmem:[#allocation3 + $0x730] sm:$0xff]  ;;  %v3465_v22 = vld [vmem:[#allocation3 + $0x378] sm:$0xff] }
 0x4a9   : > { %4429 = vmatprep.subr.bf16.mxu1 %v3497_v24  ;;  %4418 = vmatprep.mubr.bf16.mxu0 %v7885_v26  ;;  %v3392_v26 = vld [vmem:[#allocation3 + $0x130] sm:$0xff]  ;;  %v3593_v24 = vld [vmem:[#allocation3 + $0x778] sm:$0xff] }
 0x4aa   : > { %4459 = vmatprep.mubr.bf16.mxu1 %v7889_v27  ;;  %v3520_v27 = vld [vmem:[#allocation3 + $0x530] sm:$0xff] }
 0x4ab   : > { %4389 = vmatpush1.bf16.msra.mxu0 %v3368_v28  ;;  %v3464_v28 = vld [vmem:[#allocation3 + $0x370] sm:$0xff] }
 0x4ac   : > { %4430 = vmatpush1.bf16.msra.mxu1 %v3496_v29  ;;  %4390 = vmatprep.subr.bf16.mxu0 %v3377_v30  ;;  %v3592_v29 = vld [vmem:[#allocation3 + $0x770] sm:$0xff]  ;;  %v3473_v30 = vld [vmem:[#allocation3 + $0x3b8] sm:$0xff] }
 0x4ad   : > { %4431 = vmatprep.subr.bf16.mxu1 %v3505_v31  ;;  %v3601_v31 = vld [vmem:[#allocation3 + $0x7b8] sm:$0xff] }
 0x4af   : > { %4391 = vmatpush1.bf16.msra.mxu0 %v3376_v32  ;;  %v3472_v32 = vld [vmem:[#allocation3 + $0x3b0] sm:$0xff] }
 0x4b0   : > { %4432 = vmatpush1.bf16.msra.mxu1 %v3504_v33  ;;  %4392 = vmatprep.subr.bf16.mxu0 %v3385_v34  ;;  %v3600_v33 = vld [vmem:[#allocation3 + $0x7b0] sm:$0xff]  ;;  %v3481_v34 = vld [vmem:[#allocation3 + $0x3f8] sm:$0xff] }
 0x4b1   : > { %4433 = vmatprep.subr.bf16.mxu1 %v3513_v35  ;;  %v3609_v35 = vld [vmem:[#allocation3 + $0x7f8] sm:$0xff] }
 0x4b3   : > { %4393 = vmatpush1.bf16.msra.mxu0 %v3384_v37  ;;  %v3480_v37 = vld [vmem:[#allocation3 + $0x3f0] sm:$0xff] }
 0x4b4   : > { %4434 = vmatpush1.bf16.msra.mxu1 %v3512_v38  ;;  %4394 = vmatprep.subr.bf16.mxu0 %v3393_v39  ;;  %v3608_v38 = vld [vmem:[#allocation3 + $0x7f0] sm:$0xff]  ;;  %v3617_v39 = vld [vmem:[#allocation3 + $0x838] sm:$0xff] }
 0x4b5   : > { %4435 = vmatprep.subr.bf16.mxu1 %v3521_v40  ;;  %v3745_v40 = vld [vmem:[#allocation3 + $0xc38] sm:$0xff] }
 0x4b7   : > { %4395 = vmatpush1.bf16.msra.mxu0 %v3392_v26  ;;  %v3616_v26 = vld [vmem:[#allocation3 + $0x830] sm:$0xff] }
 0x4b8   : > { %4436 = vmatpush1.bf16.msra.mxu1 %v3520_v27  ;;  %4396 = vmatprep.subr.bf16.mxu0 %v3401_v41  ;;  %v3744_v27 = vld [vmem:[#allocation3 + $0xc30] sm:$0xff]  ;;  %v3625_v41 = vld [vmem:[#allocation3 + $0x878] sm:$0xff] }
 0x4b9   : > { %4437 = vmatprep.subr.bf16.mxu1 %v3529_v63  ;;  %v4092_v12 = vpop.f32.mrb[8].mxu0  ;;  %v3753_v63 = vld [vmem:[#allocation3 + $0xc78] sm:$0xff] }
 0x4ba   : > { %v4133_v44 = vpop.f32.mrb[8].mxu1  ;;  %v4094_v47 = vpop.f32.mrb[9].mxu0 }
 0x4bb   : > { %v7957_v46 = vadd.f32 %v4133_v44, %v4092_v12  ;;  %v4135_v48 = vpop.f32.mrb[9].mxu1  ;;  %v4096_v50 = vpop.f32.mrb[10].mxu0  ;;  %4397 = vmatpush1.bf16.msra.mxu0 %v3400_v42  ;;  %v3624_v42 = vld [vmem:[#allocation3 + $0x870] sm:$0xff]  ;;  %v3633_v12 = vld [vmem:[#allocation3 + $0x8b8] sm:$0xff] }
 0x4bc   : > { %v7959_v49 = vadd.f32 %v4135_v48, %v4094_v47  ;;  %v4137_v51 = vpop.f32.mrb[10].mxu1  ;;  %4438 = vmatpush1.bf16.msra.mxu1 %v3528_v43  ;;  %v4097_v52 = vpop.f32.mrb[11].mxu0  ;;  %4398 = vmatprep.subr.bf16.mxu0 %v3409_v25  ;;  %v3752_v43 = vld [vmem:[#allocation3 + $0xc70] sm:$0xff]  ;;  %v3761_v44 = vld [vmem:[#allocation3 + $0xcb8] sm:$0xff] }
 0x4bd   : > { %v4138_v54 = vpop.f32.mrb[11].mxu1  ;;  %4439 = vmatprep.subr.bf16.mxu1 %v3537_v45  ;;  %v3632_v25 = vld [vmem:[#allocation3 + $0x8b0] sm:$0xff]  ;;  %v3641_v45 = vld [vmem:[#allocation3 + $0x8f8] sm:$0xff] }
 0x4be   : > { %v3640_v47 = vld [vmem:[#allocation3 + $0x8f0] sm:$0xff]  ;;  %v3649_v50 = vld [vmem:[#allocation3 + $0x938] sm:$0xff] }
 0x4bf   : > { %4399 = vmatpush1.bf16.msra.mxu0 %v3408_v55  ;;  %v3768_v48 = vld [vmem:[#allocation3 + $0xcf0] sm:$0xff]  ;;  %v3777_v51 = vld [vmem:[#allocation3 + $0xd38] sm:$0xff] }
 0x4c0   : > { %4440 = vmatpush1.bf16.msra.mxu1 %v3536_v56  ;;  %4400 = vmatprep.subr.bf16.mxu0 %v3417_v58  ;;  %v3657_v52 = vld [vmem:[#allocation3 + $0x978] sm:$0xff]  ;;  %v3656_v55 = vld [vmem:[#allocation3 + $0x970] sm:$0xff] }
 0x4c1   : > { %4441 = vmatprep.subr.bf16.mxu1 %v3545_v59  ;;  %v3785_v54 = vld [vmem:[#allocation3 + $0xd78] sm:$0xff]  ;;  %v3784_v56 = vld [vmem:[#allocation3 + $0xd70] sm:$0xff] }
 0x4c3   : > { %4401 = vmatpush1.bf16.msra.mxu0 %v3416_v36  ;;  %v3665_v36 = vld [vmem:[#allocation3 + $0x9b8] sm:$0xff] }
 0x4c4   : > { %4442 = vmatpush1.bf16.msra.mxu1 %v3544_v60  ;;  %4402 = vmatprep.subr.bf16.mxu0 %v3425_v61  ;;  %v3793_v60 = vld [vmem:[#allocation3 + $0xdb8] sm:$0xff] }
 0x4c5   : > { %4443 = vmatprep.subr.bf16.mxu1 %v3553_v62 }
 0x4c7   : > { %4403 = vmatpush1.bf16.msra.mxu0 %v3424_v0 }
 0x4c8   : > { %4444 = vmatpush1.bf16.msra.mxu1 %v3552_v57  ;;  %4404 = vmatprep.subr.bf16.mxu0 %v3433_v1  ;;  %v3344_v57 = vld [vmem:[#allocation2 + $0x10] sm:$0xff] }
 0x4c9   : > { %4445 = vmatprep.subr.bf16.mxu1 %v3561_v2 }
 0x4cb   : > { %4405 = vmatpush1.bf16.msra.mxu0 %v3432_v6 }
 0x4cc   : > { %4446 = vmatpush1.bf16.msra.mxu1 %v3560_v7  ;;  %4406 = vmatprep.subr.bf16.mxu0 %v3441_v8  ;;  %v3345_v8 = vld [vmem:[#allocation2 + $0x18] sm:$0xff] }
 0x4cd   : > { %4447 = vmatprep.subr.bf16.mxu1 %v3569_v53 }
 0x4cf   : > { %4407 = vmatpush1.bf16.msra.mxu0 %v3440_v11 }
 0x4d0   : > { %4448 = vmatpush1.bf16.msra.mxu1 %v3568_v13  ;;  %4408 = vmatprep.subr.bf16.mxu0 %v3449_v15  ;;  %v3664_v13 = vld [vmem:[#allocation3 + $0x9b0] sm:$0xff] }
 0x4d1   : > { %4449 = vmatprep.subr.bf16.mxu1 %v3577_v14  ;;  %v3792_v15 = vld [vmem:[#allocation3 + $0xdb0] sm:$0xff] }
 0x4d3   : > { %4409 = vmatpush1.bf16.msra.mxu0 %v3448_v18  ;;  %v3673_v18 = vld [vmem:[#allocation3 + $0x9f8] sm:$0xff] }
 0x4d4   : > { %4450 = vmatpush1.bf16.msra.mxu1 %v3576_v19  ;;  %4410 = vmatprep.subr.bf16.mxu0 %v3457_v20 }
 0x4d5   : > { %4451 = vmatprep.subr.bf16.mxu1 %v3585_v21  ;;  %v3800_v21 = vld [vmem:[#allocation3 + $0xdf0] sm:$0xff] }
 0x4d7   : > { %4411 = vmatpush1.bf16.msra.mxu0 %v3456_v5  ;;  %v3681_v5 = vld [vmem:[#allocation3 + $0xa38] sm:$0xff] }
 0x4d8   : > { %4452 = vmatpush1.bf16.msra.mxu1 %v3584_v23  ;;  %4412 = vmatprep.subr.bf16.mxu0 %v3465_v22  ;;  %v3809_v23 = vld [vmem:[#allocation3 + $0xe38] sm:$0xff]  ;;  %v3680_v22 = vld [vmem:[#allocation3 + $0xa30] sm:$0xff] }
 0x4d9   : > { %4453 = vmatprep.subr.bf16.mxu1 %v3593_v24  ;;  %v3808_v24 = vld [vmem:[#allocation3 + $0xe30] sm:$0xff] }
 0x4db   : > { %4413 = vmatpush1.bf16.msra.mxu0 %v3464_v28  ;;  %v3689_v28 = vld [vmem:[#allocation3 + $0xa78] sm:$0xff] }
 0x4dc   : > { %4454 = vmatpush1.bf16.msra.mxu1 %v3592_v29  ;;  %4414 = vmatprep.subr.bf16.mxu0 %v3473_v30  ;;  %v3817_v29 = vld [vmem:[#allocation3 + $0xe78] sm:$0xff]  ;;  %v3688_v30 = vld [vmem:[#allocation3 + $0xa70] sm:$0xff] }
 0x4dd   : > { %4455 = vmatprep.subr.bf16.mxu1 %v3601_v31  ;;  %v3816_v31 = vld [vmem:[#allocation3 + $0xe70] sm:$0xff] }
 0x4df   : > { %4415 = vmatpush1.bf16.msra.mxu0 %v3472_v32  ;;  %v3697_v32 = vld [vmem:[#allocation3 + $0xab8] sm:$0xff] }
 0x4e0   : > { %4456 = vmatpush1.bf16.msra.mxu1 %v3600_v33  ;;  %4416 = vmatprep.subr.bf16.mxu0 %v3481_v34  ;;  %v3825_v33 = vld [vmem:[#allocation3 + $0xeb8] sm:$0xff]  ;;  %v3696_v34 = vld [vmem:[#allocation3 + $0xab0] sm:$0xff] }
 0x4e1   : > { %4457 = vmatprep.subr.bf16.mxu1 %v3609_v35  ;;  %v3824_v35 = vld [vmem:[#allocation3 + $0xeb0] sm:$0xff] }
 0x4e3   : > { %4417 = vmatpush1.bf16.msra.mxu0 %v3480_v37  ;;  %v3705_v37 = vld [vmem:[#allocation3 + $0xaf8] sm:$0xff] }
 0x4e4   : > { %4458 = vmatpush1.bf16.msra.mxu1 %v3608_v38  ;;  %4468 = vmatprep.subr.bf16.mxu0 %v3617_v39  ;;  %v3833_v38 = vld [vmem:[#allocation3 + $0xef8] sm:$0xff]  ;;  %v3704_v39 = vld [vmem:[#allocation3 + $0xaf0] sm:$0xff] }
 0x4e5   : > { %4509 = vmatprep.subr.bf16.mxu1 %v3745_v40  ;;  %v3832_v40 = vld [vmem:[#allocation3 + $0xef0] sm:$0xff] }
 0x4e6   : > { %4419 = vmatmul.mubr.bf16.vlgmr.msra.gmra.mrb[24].mxu0 %v7895_v3  ;;  %v3760_v3 = vld [vmem:[#allocation3 + $0xcb0] sm:$0xff] }
 0x4e7   : > { %4460 = vmatmul.mubr.bf16.vlgmr.msra.gmra.mrb[24].mxu1 %v7899_v4  ;;  %4469 = vmatpush1.bf16.msra.mxu0 %v3616_v26  ;;  %v3769_v4 = vld [vmem:[#allocation3 + $0xcf8] sm:$0xff] }
 0x4e8   : > { %4510 = vmatpush1.bf16.msra.mxu1 %v3744_v27  ;;  %4470 = vmatprep.subr.bf16.mxu0 %v3625_v41  ;;  %v3713_v26 = vld [vmem:[#allocation3 + $0xb38] sm:$0xff]  ;;  %v3712_v41 = vld [vmem:[#allocation3 + $0xb30] sm:$0xff] }
 0x4e9   : > { %4511 = vmatprep.subr.bf16.mxu1 %v3753_v63  ;;  %4500 = vmatprep.mubr.bf16.mxu0 %v7913_v9  ;;  %v3648_v9 = vld [vmem:[#allocation3 + $0x930] sm:$0xff]  ;;  %v3841_v27 = vld [vmem:[#allocation3 + $0xf38] sm:$0xff] }
 0x4ea   : > { %4541 = vmatprep.mubr.bf16.mxu1 %v7917_v10  ;;  %v3776_v10 = vld [vmem:[#allocation3 + $0xd30] sm:$0xff] }
 0x4eb   : > { %4471 = vmatpush1.bf16.msra.mxu0 %v3624_v42  ;;  %v3840_v63 = vld [vmem:[#allocation3 + $0xf30] sm:$0xff]  ;;  %v3721_v42 = vld [vmem:[#allocation3 + $0xb78] sm:$0xff] }
 0x4ec   : > { %4512 = vmatpush1.bf16.msra.mxu1 %v3752_v43  ;;  %4472 = vmatprep.subr.bf16.mxu0 %v3633_v12  ;;  %v3849_v43 = vld [vmem:[#allocation3 + $0xf78] sm:$0xff]  ;;  %v3720_v12 = vld [vmem:[#allocation3 + $0xb70] sm:$0xff] }
 0x4ed   : > { %4513 = vmatprep.subr.bf16.mxu1 %v3761_v44  ;;  %v3848_v44 = vld [vmem:[#allocation3 + $0xf70] sm:$0xff] }
 0x4ef   : > { %4473 = vmatpush1.bf16.msra.mxu0 %v3632_v25  ;;  %v3729_v25 = vld [vmem:[#allocation3 + $0xbb8] sm:$0xff] }
 0x4f0   : > { %4514 = vmatpush1.bf16.msra.mxu1 %v3760_v3  ;;  %4474 = vmatprep.subr.bf16.mxu0 %v3641_v45  ;;  %v3857_v3 = vld [vmem:[#allocation3 + $0xfb8] sm:$0xff]  ;;  %v3728_v45 = vld [vmem:[#allocation3 + $0xbb0] sm:$0xff] }
 0x4f1   : > { %4515 = vmatprep.subr.bf16.mxu1 %v3769_v4  ;;  %v3856_v4 = vld [vmem:[#allocation3 + $0xfb0] sm:$0xff] }
 0x4f3   : > { %4475 = vmatpush1.bf16.msra.mxu0 %v3640_v47  ;;  %v3737_v47 = vld [vmem:[#allocation3 + $0xbf8] sm:$0xff] }
 0x4f4   : > { %4516 = vmatpush1.bf16.msra.mxu1 %v3768_v48  ;;  %4476 = vmatprep.subr.bf16.mxu0 %v3649_v50  ;;  %v3865_v48 = vld [vmem:[#allocation3 + $0xff8] sm:$0xff]  ;;  %v3736_v50 = vld [vmem:[#allocation3 + $0xbf0] sm:$0xff] }
 0x4f5   : > { %4517 = vmatprep.subr.bf16.mxu1 %v3777_v51  ;;  %v3864_v51 = vld [vmem:[#allocation3 + $0xff0] sm:$0xff] }
 0x4f7   : > { %4477 = vmatpush1.bf16.msra.mxu0 %v3648_v9 }
 0x4f8   : > { %4518 = vmatpush1.bf16.msra.mxu1 %v3776_v10  ;;  %4478 = vmatprep.subr.bf16.mxu0 %v3657_v52 }
 0x4f9   : > { %4519 = vmatprep.subr.bf16.mxu1 %v3785_v54  ;;  %v4174_v58 = vpop.f32.mrb[12].mxu0 }
 0x4fa   : > { %v4215_v59 = vpop.f32.mrb[12].mxu1  ;;  %v4175_v61 = vadd.f32 %v4174_v58, %v7957_v46  ;;  %v4176_v62 = vpop.f32.mrb[13].mxu0  ;;  %v3801_v46 = vld [vmem:[#allocation3 + $0xdf8] sm:$0xff] }
 0x4fb   : > { %v4217_v0 = vpop.f32.mrb[13].mxu1  ;;  %v4177_v1 = vadd.f32 %v4176_v62, %v7959_v49  ;;  %v4178_v2 = vpop.f32.mrb[14].mxu0  ;;  %4479 = vmatpush1.bf16.msra.mxu0 %v3656_v55  ;;  %v3672_v49 = vld [vmem:[#allocation3 + $0x9f0] sm:$0xff] }
 0x4fc   : > { %v4219_v6 = vpop.f32.mrb[14].mxu1  ;;  %4520 = vmatpush1.bf16.msra.mxu1 %v3784_v56  ;;  %v4216_v7 = vadd.f32 %v4215_v59, %v4175_v61  ;;  %v4179_v53 = vpop.f32.mrb[15].mxu0  ;;  %4480 = vmatprep.subr.bf16.mxu0 %v3665_v36  ;;  %v3346_v2 = vld [vmem:[#allocation2 + $0x20] sm:$0xff] }
 0x4fd   : > { %v4220_v11 = vpop.f32.mrb[15].mxu1  ;;  %4521 = vmatprep.subr.bf16.mxu1 %v3793_v60  ;;  %v4218_v14 = vadd.f32 %v4217_v0, %v4177_v1 }
 0x4fe   : > { %v4552_v19 = vadd.f32 %v4216_v7, %v3344_v57 }
 0x4ff   : > { %v4553_v20 = vadd.f32 %v4218_v14, %v3345_v8  ;;  %4481 = vmatpush1.bf16.msra.mxu0 %v3664_v13  ;;  %v3347_v8 = vld [vmem:[#allocation2 + $0x28] sm:$0xff] }
 0x500   : > { %4522 = vmatpush1.bf16.msra.mxu1 %v3792_v15  ;;  %4560 = vst [vmem:[#allocation2 + $0x10] sm:$0xff] %v4552_v19  ;;  %4482 = vmatprep.subr.bf16.mxu0 %v3673_v18 }
 0x501   : > { %4523 = vmatprep.subr.bf16.mxu1 %v3801_v46  ;;  %4561 = vst [vmem:[#allocation2 + $0x18] sm:$0xff] %v4553_v20 }
 0x503   : > { %4483 = vmatpush1.bf16.msra.mxu0 %v3672_v49 }
 0x504   : > { %4524 = vmatpush1.bf16.msra.mxu1 %v3800_v21  ;;  %4484 = vmatprep.subr.bf16.mxu0 %v3681_v5 }
 0x505   : > { %4525 = vmatprep.subr.bf16.mxu1 %v3809_v23 }
 0x507   : > { %4485 = vmatpush1.bf16.msra.mxu0 %v3680_v22 }
 0x508   : > { %4526 = vmatpush1.bf16.msra.mxu1 %v3808_v24  ;;  %4486 = vmatprep.subr.bf16.mxu0 %v3689_v28 }
 0x509   : > { %4527 = vmatprep.subr.bf16.mxu1 %v3817_v29 }
 0x50b   : > { %4487 = vmatpush1.bf16.msra.mxu0 %v3688_v30 }
 0x50c   : > { %4528 = vmatpush1.bf16.msra.mxu1 %v3816_v31  ;;  %4488 = vmatprep.subr.bf16.mxu0 %v3697_v32 }
 0x50d   : > { %4529 = vmatprep.subr.bf16.mxu1 %v3825_v33  ;;  %v3348_v33 = vld [vmem:[#allocation2 + $0x30] sm:$0xff] }
 0x50f   : > { %4489 = vmatpush1.bf16.msra.mxu0 %v3696_v34 }
 0x510   : > { %4530 = vmatpush1.bf16.msra.mxu1 %v3824_v35  ;;  %4490 = vmatprep.subr.bf16.mxu0 %v3705_v37 }
 0x511   : > { %4531 = vmatprep.subr.bf16.mxu1 %v3833_v38 }
 0x513   : > { %4491 = vmatpush1.bf16.msra.mxu0 %v3704_v39  ;;  %v3349_v39 = vld [vmem:[#allocation2 + $0x38] sm:$0xff] }
 0x514   : > { %4532 = vmatpush1.bf16.msra.mxu1 %v3832_v40  ;;  %4492 = vmatprep.subr.bf16.mxu0 %v3713_v26 }
 0x515   : > { %4533 = vmatprep.subr.bf16.mxu1 %v3841_v27 }
 0x517   : > { %4493 = vmatpush1.bf16.msra.mxu0 %v3712_v41 }
 0x518   : > { %4534 = vmatpush1.bf16.msra.mxu1 %v3840_v63  ;;  %4494 = vmatprep.subr.bf16.mxu0 %v3721_v42 }
 0x519   : > { %4535 = vmatprep.subr.bf16.mxu1 %v3849_v43 }
 0x51b   : > { %4495 = vmatpush1.bf16.msra.mxu0 %v3720_v12 }
 0x51c   : > { %4536 = vmatpush1.bf16.msra.mxu1 %v3848_v44  ;;  %4496 = vmatprep.subr.bf16.mxu0 %v3729_v25 }
 0x51d   : > { %4537 = vmatprep.subr.bf16.mxu1 %v3857_v3 }
 0x51f   : > { %4497 = vmatpush1.bf16.msra.mxu0 %v3728_v45 }
 0x520   : > { %4538 = vmatpush1.bf16.msra.mxu1 %v3856_v4  ;;  %4498 = vmatprep.subr.bf16.mxu0 %v3737_v47 }
 0x521   : > { %4539 = vmatprep.subr.bf16.mxu1 %v3865_v48 }
 0x523   : > { %4499 = vmatpush1.bf16.msra.mxu0 %v3736_v50 }
 0x524   : > { %4540 = vmatpush1.bf16.msra.mxu1 %v3864_v51 }
 0x526   : > { %4501 = vmatmul.mubr.bf16.vlgmr.msra.gmra.mrb[28].mxu0 %v7925_v16 }
 0x527   : > { %4542 = vmatmul.mubr.bf16.vlgmr.msra.gmra.mrb[28].mxu1 %v7929_v17 }
 0x539   : > { %v4256_v9 = vpop.f32.mrb[16].mxu0 }
 0x53a   : > { %v4297_v10 = vpop.f32.mrb[16].mxu1  ;;  %v4258_v54 = vpop.f32.mrb[17].mxu0 }
 0x53b   : > { %v4298_v52 = vadd.f32 %v4297_v10, %v4256_v9  ;;  %v4299_v55 = vpop.f32.mrb[17].mxu1  ;;  %v4260_v58 = vpop.f32.mrb[18].mxu0 }
 0x53c   : > { %v4300_v56 = vadd.f32 %v4299_v55, %v4258_v54  ;;  %v4301_v59 = vpop.f32.mrb[18].mxu1  ;;  %v4261_v36 = vpop.f32.mrb[19].mxu0 }
 0x53d   : > { %v4302_v60 = vpop.f32.mrb[19].mxu1 }
 0x579   : > { %v4338_v61 = vpop.f32.mrb[20].mxu0 }
 0x57a   : > { %v4379_v62 = vpop.f32.mrb[20].mxu1  ;;  %v4339_v0 = vadd.f32 %v4338_v61, %v4298_v52  ;;  %v4340_v57 = vpop.f32.mrb[21].mxu0 }
 0x57b   : > { %v4381_v1 = vpop.f32.mrb[21].mxu1  ;;  %v4341_v6 = vadd.f32 %v4340_v57, %v4300_v56  ;;  %v4342_v16 = vpop.f32.mrb[22].mxu0 }
 0x57c   : > { %v4383_v7 = vpop.f32.mrb[22].mxu1  ;;  %v4380_v17 = vadd.f32 %v4379_v62, %v4339_v0  ;;  %v4343_v53 = vpop.f32.mrb[23].mxu0 }
 0x57d   : > { %v4384_v11 = vpop.f32.mrb[23].mxu1  ;;  %v4382_v13 = vadd.f32 %v4381_v1, %v4341_v6 }
 0x57e   : > { %v4554_v15 = vadd.f32 %v4380_v17, %v3346_v2 }
 0x57f   : > { %v4555_v14 = vadd.f32 %v4382_v13, %v3347_v8 }
 0x580   : > { %4562 = vst [vmem:[#allocation2 + $0x20] sm:$0xff] %v4554_v15 }
 0x581   : > { %4563 = vst [vmem:[#allocation2 + $0x28] sm:$0xff] %v4555_v14 }
 0x5b9   : > { %v4420_v18 = vpop.f32.mrb[24].mxu0 }
 0x5ba   : > { %v4461_v46 = vpop.f32.mrb[24].mxu1  ;;  %v4422_v20 = vpop.f32.mrb[25].mxu0 }
 0x5bb   : > { %v4462_v19 = vadd.f32 %v4461_v46, %v4420_v18  ;;  %v4463_v49 = vpop.f32.mrb[25].mxu1  ;;  %v4424_v5 = vpop.f32.mrb[26].mxu0 }
 0x5bc   : > { %v4464_v21 = vadd.f32 %v4463_v49, %v4422_v20  ;;  %v4465_v23 = vpop.f32.mrb[26].mxu1  ;;  %v4425_v22 = vpop.f32.mrb[27].mxu0 }
 0x5bd   : > { %v4466_v24 = vpop.f32.mrb[27].mxu1 }
 0x5f9   : > { %v4502_v28 = vpop.f32.mrb[28].mxu0 }
 0x5fa   : > { %v4543_v29 = vpop.f32.mrb[28].mxu1  ;;  %v4503_v30 = vadd.f32 %v4502_v28, %v4462_v19  ;;  %v4504_v31 = vpop.f32.mrb[29].mxu0 }
 0x5fb   : > { %v4545_v32 = vpop.f32.mrb[29].mxu1  ;;  %v4505_v34 = vadd.f32 %v4504_v31, %v4464_v21  ;;  %v4506_v35 = vpop.f32.mrb[30].mxu0 }
 0x5fc   : > { %v4547_v37 = vpop.f32.mrb[30].mxu1  ;;  %v4544_v38 = vadd.f32 %v4543_v29, %v4503_v30  ;;  %v4507_v40 = vpop.f32.mrb[31].mxu0 }
 0x5fd   : > { %v4548_v26 = vpop.f32.mrb[31].mxu1  ;;  %v4546_v27 = vadd.f32 %v4545_v32, %v4505_v34 }
 0x5fe   : > { %v4556_v41 = vadd.f32 %v4544_v38, %v3348_v33 }
 0x5ff   : > { %v4557_v63 = vadd.f32 %v4546_v27, %v3349_v39 }
 0x600   : > { %4564 = vst [vmem:[#allocation2 + $0x30] sm:$0xff] %v4556_v41 }
 0x601   : > { %4565 = vst [vmem:[#allocation2 + $0x38] sm:$0xff] %v4557_v63 }
 0x602 PF: > { %v4729_v49 = vlaneseq }
 0x603   : > { %v6670_v42 = vld [vmem:[%s7384_s21 + $0x4] ss:$8 sps:$4 sm:$0xff]   ;;  %v6674_v12 = vld [vmem:[%s7384_s21] ss:$8 sps:$4 sm:$0xff]   ;;  %v6676_v25 = vld [vmem:[%s7384_s21 + $0x14] ss:$8 sps:$4 sm:$0xff]  }
 0x604   : > { %v6672_v43 = vld [vmem:[%s7384_s21 + $0x204] ss:$8 sps:$4 sm:$0xff]   ;;  %5623 = vmatprep.subr.bf16.mxu1 %v6670_v42  ;;  %v6675_v44 = vld [vmem:[%s7384_s21 + $0x200] ss:$8 sps:$4 sm:$0xff]   ;;  %v6678_v3 = vld [vmem:[%s7384_s21 + $0x214] ss:$8 sps:$4 sm:$0xff]  }
 0x605   : > { %5705 = vmatprep.subr.bf16.mxu0 %v6672_v43  ;;  %5624 = vmatpush1.bf16.msra.mxu1 %v6674_v12  ;;  %v6680_v45 = vld [vmem:[%s7384_s21 + $0x10] ss:$8 sps:$4 sm:$0xff]   ;;  %v6682_v47 = vld [vmem:[%s7384_s21 + $0x24] ss:$8 sps:$4 sm:$0xff]   ;;  %v6686_v50 = vld [vmem:[%s7384_s21 + $0x20] ss:$8 sps:$4 sm:$0xff]  }
 0x606   : > { %5706 = vmatpush1.bf16.msra.mxu0 %v6675_v44  ;;  %5625 = vmatprep.subr.bf16.mxu1 %v6676_v25  ;;  %v6681_v4 = vld [vmem:[%s7384_s21 + $0x210] ss:$8 sps:$4 sm:$0xff]   ;;  %v6684_v48 = vld [vmem:[%s7384_s21 + $0x224] ss:$8 sps:$4 sm:$0xff]   ;;  %v6687_v51 = vld [vmem:[%s7384_s21 + $0x220] ss:$8 sps:$4 sm:$0xff]  }
 0x607   : > { %5707 = vmatprep.subr.bf16.mxu0 %v6678_v3  ;;  %v6688_v9 = vld [vmem:[%s7384_s21 + $0x34] ss:$8 sps:$4 sm:$0xff]   ;;  %v6692_v52 = vld [vmem:[%s7384_s21 + $0x30] ss:$8 sps:$4 sm:$0xff]   ;;  %v6694_v55 = vld [vmem:[%s7384_s21 + $0x44] ss:$8 sps:$4 sm:$0xff]  }
 0x608   : > { %v6690_v10 = vld [vmem:[%s7384_s21 + $0x234] ss:$8 sps:$4 sm:$0xff]   ;;  %v6693_v54 = vld [vmem:[%s7384_s21 + $0x230] ss:$8 sps:$4 sm:$0xff]   ;;  %v6696_v56 = vld [vmem:[%s7384_s21 + $0x244] ss:$8 sps:$4 sm:$0xff]  }
 0x609   : > { %5626 = vmatpush1.bf16.msra.mxu1 %v6680_v45  ;;  %v6698_v58 = vld [vmem:[%s7384_s21 + $0x40] ss:$8 sps:$4 sm:$0xff]   ;;  %v6700_v36 = vld [vmem:[%s7384_s21 + $0x54] ss:$8 sps:$4 sm:$0xff]   ;;  %v6704_v61 = vld [vmem:[%s7384_s21 + $0x50] ss:$8 sps:$4 sm:$0xff]  }
 0x60a   : > { %5708 = vmatpush1.bf16.msra.mxu0 %v6681_v4  ;;  %5627 = vmatprep.subr.bf16.mxu1 %v6682_v47  ;;  %v6699_v59 = vld [vmem:[%s7384_s21 + $0x240] ss:$8 sps:$4 sm:$0xff]   ;;  %v6702_v60 = vld [vmem:[%s7384_s21 + $0x254] ss:$8 sps:$4 sm:$0xff]   ;;  %v6705_v62 = vld [vmem:[%s7384_s21 + $0x250] ss:$8 sps:$4 sm:$0xff]  }
 0x60b   : > { %5709 = vmatprep.subr.bf16.mxu0 %v6684_v48  ;;  %v6706_v0 = vld [vmem:[%s7384_s21 + $0x64] ss:$8 sps:$4 sm:$0xff]   ;;  %v6710_v1 = vld [vmem:[%s7384_s21 + $0x60] ss:$8 sps:$4 sm:$0xff]   ;;  %v6712_v6 = vld [vmem:[%s7384_s21 + $0x74] ss:$8 sps:$4 sm:$0xff]  }
 0x60c   : > { %v6708_v57 = vld [vmem:[%s7384_s21 + $0x264] ss:$8 sps:$4 sm:$0xff]   ;;  %v6711_v2 = vld [vmem:[%s7384_s21 + $0x260] ss:$8 sps:$4 sm:$0xff]   ;;  %v6714_v16 = vld [vmem:[%s7384_s21 + $0x274] ss:$8 sps:$4 sm:$0xff]  }
 0x60d   : > { %5628 = vmatpush1.bf16.msra.mxu1 %v6686_v50  ;;  %v6716_v7 = vld [vmem:[%s7384_s21 + $0x70] ss:$8 sps:$4 sm:$0xff]   ;;  %v6718_v8 = vld [vmem:[%s7384_s21 + $0x84] ss:$8 sps:$4 sm:$0xff]   ;;  %v6722_v11 = vld [vmem:[%s7384_s21 + $0x80] ss:$8 sps:$4 sm:$0xff]  }
 0x60e   : > { %5710 = vmatpush1.bf16.msra.mxu0 %v6687_v51  ;;  %5629 = vmatprep.subr.bf16.mxu1 %v6688_v9  ;;  %v6717_v17 = vld [vmem:[%s7384_s21 + $0x270] ss:$8 sps:$4 sm:$0xff]   ;;  %v6720_v53 = vld [vmem:[%s7384_s21 + $0x284] ss:$8 sps:$4 sm:$0xff]   ;;  %v6723_v13 = vld [vmem:[%s7384_s21 + $0x280] ss:$8 sps:$4 sm:$0xff]  }
 0x60f   : > { %5711 = vmatprep.subr.bf16.mxu0 %v6690_v10  ;;  %v6724_v15 = vld [vmem:[%s7384_s21 + $0x94] ss:$8 sps:$4 sm:$0xff]   ;;  %v6728_v18 = vld [vmem:[%s7384_s21 + $0x90] ss:$8 sps:$4 sm:$0xff]   ;;  %v6730_v19 = vld [vmem:[%s7384_s21 + $0xa4] ss:$8 sps:$4 sm:$0xff]  }
 0x610   : > { %v6726_v14 = vld [vmem:[%s7384_s21 + $0x294] ss:$8 sps:$4 sm:$0xff]   ;;  %v6729_v46 = vld [vmem:[%s7384_s21 + $0x290] ss:$8 sps:$4 sm:$0xff]   ;;  %v6732_v20 = vld [vmem:[%s7384_s21 + $0x2a4] ss:$8 sps:$4 sm:$0xff]  }
 0x611   : > { %5630 = vmatpush1.bf16.msra.mxu1 %v6692_v52  ;;  %v6734_v21 = vld [vmem:[%s7384_s21 + $0xa0] ss:$8 sps:$4 sm:$0xff]   ;;  %v6736_v23 = vld [vmem:[%s7384_s21 + $0xb4] ss:$8 sps:$4 sm:$0xff]   ;;  %v8017_v28 = vshrl.u32 %v4729_v49, 7 }
 0x612   : > { %5712 = vmatpush1.bf16.msra.mxu0 %v6693_v54  ;;  %5631 = vmatprep.subr.bf16.mxu1 %v6694_v55  ;;  %v6735_v5 = vld [vmem:[%s7384_s21 + $0x2a0] ss:$8 sps:$4 sm:$0xff]   ;;  %v6738_v22 = vld [vmem:[%s7384_s21 + $0x2b4] ss:$8 sps:$4 sm:$0xff]   ;;  %v6740_v29 = vld [vmem:[%s7384_s21 + $0xb0] ss:$8 sps:$4 sm:$0xff]  }
 0x613   : > { %5713 = vmatprep.subr.bf16.mxu0 %v6696_v56  ;;  %v8015_v24 = vld [vmem:[#allocation2 + $0x8] sm:$0xff]  ;;  %v6741_v30 = vld [vmem:[%s7384_s21 + $0x2b0] ss:$8 sps:$4 sm:$0xff]   ;;  %v4739_v37 = vsub.s32 2, %v8017_v28  ;;  %v4755_v38 = vsub.s32 6, %v8017_v28  ;;  %v8032_v27 = vld [vmem:[#allocation2] sm:$0xff] }
 0x614   : > { %v4580_v31 = vrot.slane %v8015_v24, 4  ;;  %v6742_v32 = vld [vmem:[%s7384_s21 + $0xc4] ss:$8 sps:$4 sm:$0xff]   ;;  %v6746_v39 = vld [vmem:[%s7384_s21 + $0xc0] ss:$8 sps:$4 sm:$0xff]   ;;  %v4574_v63 = vrot.slane %v8032_v27, 4 }
 0x615   : > { %5632 = vmatpush1.bf16.msra.mxu1 %v6698_v58  ;;  %v6744_v33 = vld [vmem:[%s7384_s21 + $0x2c4] ss:$8 sps:$4 sm:$0xff]   ;;  %v6747_v40 = vld [vmem:[%s7384_s21 + $0x2c0] ss:$8 sps:$4 sm:$0xff]   ;;  %v6748_v43 = vld [vmem:[%s7384_s21 + $0xd4] ss:$8 sps:$4 sm:$0xff]  }
 0x616   : > { %5714 = vmatpush1.bf16.msra.mxu0 %v6699_v59  ;;  %5633 = vmatprep.subr.bf16.mxu1 %v6700_v36  ;;  %v4581_v34 = vadd.f32 %v4580_v31, %v8015_v24  ;;  %v8025_v35 = vld [vmem:[#allocation2 + $0x28] sm:$0xff]  ;;  %v8035_v42 = vld [vmem:[#allocation2 + $0x20] sm:$0xff]  ;;  %v6750_v3 = vld [vmem:[%s7384_s21 + $0x2d4] ss:$8 sps:$4 sm:$0xff]   ;;  %v4575_v47 = vadd.f32 %v4574_v63, %v8032_v27 }
 0x617   : > { %5715 = vmatprep.subr.bf16.mxu0 %v6702_v60  ;;  %v4604_v26 = vrot.slane %v8025_v35, 4  ;;  %v8039_v12 = vld [vmem:[%s7376_s22] sm:$0xff]  ;;  %v4598_v25 = vrot.slane %v8035_v42, 4  ;;  %v8045_v4 = vld [vmem:[%s7382_s17] sm:$0xff] }
 0x618   : > { %v4582_v41 = vrot.slane %v4581_v34, 2  ;;  %v8049_v48 = vrot.slane %v8039_v12, %v4739_v37  ;;  %v8053_v9 = vrot.slane %v8045_v4, %v4739_v37  ;;  %v8056_v10 = vrot.slane %v8039_v12, %v4755_v38  ;;  %v6752_v56 = vld [vmem:[%s7384_s21 + $0xd0] ss:$8 sps:$4 sm:$0xff]   ;;  %v6754_v60 = vld [vmem:[%s7384_s21 + $0xe4] ss:$8 sps:$4 sm:$0xff]  }
 0x619   : > { %5634 = vmatpush1.bf16.msra.mxu1 %v6704_v61  ;;  %v4605_v44 = vadd.f32 %v4604_v26, %v8025_v35  ;;  %v4599_v51 = vadd.f32 %v4598_v25, %v8035_v42  ;;  %v4576_v54 = vrot.slane %v4575_v47, 2  ;;  %v8059_v55 = vrot.slane %v8045_v4, %v4755_v38  ;;  %v6753_v58 = vld [vmem:[%s7384_s21 + $0x2d0] ss:$8 sps:$4 sm:$0xff]   ;;  %v6756_v61 = vld [vmem:[%s7384_s21 + $0x2e4] ss:$8 sps:$4 sm:$0xff]  }
 0x61a   : > { %5716 = vmatpush1.bf16.msra.mxu0 %v6705_v62  ;;  %5635 = vmatprep.subr.bf16.mxu1 %v6706_v0  ;;  %v4583_v45 = vadd.f32 %v4582_v41, %v4581_v34  ;;  %v6765_v49 = vld [vmem:[%s7384_s21 + $0x2f0] ss:$8 sps:$4 sm:$0xff]  }
 0x61b   : > { %5717 = vmatprep.subr.bf16.mxu0 %v6708_v57  ;;  %v4606_v50 = vrot.slane %v4605_v44, 2  ;;  %v4600_v36 = vrot.slane %v4599_v51, 2  ;;  %v4577_v0 = vadd.f32 %v4576_v54, %v4575_v47 }
 0x61c   : > { %v4584_v52 = vrot.slane %v4583_v45, 1 }
 0x61d   : > { %5636 = vmatpush1.bf16.msra.mxu1 %v6710_v1  ;;  %v4607_v59 = vadd.f32 %v4606_v50, %v4605_v44  ;;  %v4601_v1 = vadd.f32 %v4600_v36, %v4599_v51 }
 0x61e   : > { %5718 = vmatpush1.bf16.msra.mxu0 %v6711_v2  ;;  %5637 = vmatprep.subr.bf16.mxu1 %v6712_v6  ;;  %v4585_v62 = vadd.f32 %v4584_v52, %v4583_v45  ;;  %v4578_v6 = vrot.slane %v4577_v0, 1 }
 0x61f   : > { %5719 = vmatprep.subr.bf16.mxu0 %v6714_v16  ;;  %v4608_v57 = vrot.slane %v4607_v59, 1  ;;  %v6758_v16 = vld [vmem:[%s7384_s21 + $0xe0] ss:$8 sps:$4 sm:$0xff]  }
 0x620   : > { %v4624_v2 = vmul.f32 0.125, %v4585_v62 }
 0x621   : > { %5638 = vmatpush1.bf16.msra.mxu1 %v6716_v7  ;;  %v6759_v7 = vld [vmem:[%s7384_s21 + $0x2e0] ss:$8 sps:$4 sm:$0xff]  }
 0x622   : > { %5720 = vmatpush1.bf16.msra.mxu0 %v6717_v17  ;;  %5639 = vmatprep.subr.bf16.mxu1 %v6718_v8  ;;  %v4609_v17 = vadd.f32 %v4608_v57, %v4607_v59  ;;  %v4602_v8 = vrot.slane %v4601_v1, 1 }
 0x623   : > { %5721 = vmatprep.subr.bf16.mxu0 %v6720_v53  ;;  %v6760_v53 = vld [vmem:[%s7384_s21 + $0xf4] ss:$8 sps:$4 sm:$0xff]  }
 0x625   : > { %5640 = vmatpush1.bf16.msra.mxu1 %v6722_v11  ;;  %v6762_v11 = vld [vmem:[%s7384_s21 + $0x2f4] ss:$8 sps:$4 sm:$0xff]  }
 0x626   : > { %5722 = vmatpush1.bf16.msra.mxu0 %v6723_v13  ;;  %5641 = vmatprep.subr.bf16.mxu1 %v6724_v15  ;;  %v8070_v13 = vsub.f32 %v8015_v24, %v4624_v2  ;;  %v4579_v15 = vadd.f32 %v4578_v6, %v4577_v0  ;;  %v6771_v24 = vld [vmem:[%s7384_s21 + $0x304] ss:$8 sps:$4 sm:$0xff]   ;;  %v8094_v2 = vsub.s32 1, %v8017_v28  ;;  %v4751_v6 = vsub.s32 5, %v8017_v28 }
 0x627   : > { %5723 = vmatprep.subr.bf16.mxu0 %v6726_v14  ;;  %v4628_v14 = vmul.f32 0.125, %v4609_v17  ;;  %v4747_v17 = vsub.s32 4, %v8017_v28 }
 0x629   : > { %5642 = vmatpush1.bf16.msra.mxu1 %v6728_v18  ;;  %v4603_v18 = vadd.f32 %v4602_v8, %v4601_v1 }
 0x62a   : > { %5724 = vmatpush1.bf16.msra.mxu0 %v6729_v46  ;;  %5643 = vmatprep.subr.bf16.mxu1 %v6730_v19  ;;  %v4640_v46 = vmul.f32 %v8070_v13, %v8070_v13  ;;  %v4623_v19 = vmul.f32 0.125, %v4579_v15 }
 0x62b   : > { %5725 = vmatprep.subr.bf16.mxu0 %v6732_v20  ;;  %v6764_v20 = vld [vmem:[%s7384_s21 + $0xf0] ss:$8 sps:$4 sm:$0xff]  }
 0x62d   : > { %5644 = vmatpush1.bf16.msra.mxu1 %v6734_v21  ;;  %v8077_v21 = vsub.f32 %v8025_v35, %v4628_v14  ;;  %v4752_v14 = vrot.slane %v8039_v12, %v4751_v6 }
 0x62e   : > { %5726 = vmatpush1.bf16.msra.mxu0 %v6735_v5  ;;  %5645 = vmatprep.subr.bf16.mxu1 %v6736_v23  ;;  %v4627_v5 = vmul.f32 0.125, %v4603_v18  ;;  %v4653_v23 = vrot.slane %v4640_v46, 4  ;;  %v4802_v18 = vrot.slane %v8045_v4, %v4751_v6  ;;  %v6766_v6 = vld [vmem:[%s7384_s21 + $0x100] ss:$8 sps:$4 sm:$0xff]  }
 0x62f   : > { %5727 = vmatprep.subr.bf16.mxu0 %v6738_v22  ;;  %v6768_v22 = vld [vmem:[%s7384_s21 + $0x104] ss:$8 sps:$4 sm:$0xff]  }
 0x630   : > { %v8087_v31 = vsub.f32 %v8035_v42, %v4627_v5 }
 0x631   : > { %5646 = vmatpush1.bf16.msra.mxu1 %v6740_v29  ;;  %v8082_v29 = vsub.f32 %v8032_v27, %v4623_v19  ;;  %v8111_v19 = vld [vmem:[#allocation2 + $0x38] sm:$0xff] }
 0x632   : > { %5728 = vmatpush1.bf16.msra.mxu0 %v6741_v30  ;;  %5647 = vmatprep.subr.bf16.mxu1 %v6742_v32  ;;  %v4644_v30 = vmul.f32 %v8077_v21, %v8077_v21  ;;  %v4654_v32 = vadd.f32 %v4653_v23, %v4640_v46  ;;  %v4643_v35 = vmul.f32 %v8087_v31, %v8087_v31  ;;  %v4616_v23 = vrot.slane %v8111_v19, 4 }
 0x633   : > { %5729 = vmatprep.subr.bf16.mxu0 %v6744_v33  ;;  %v4639_v33 = vmul.f32 %v8082_v29, %v8082_v29 }
 0x634   : > { %v4677_v34 = vrot.slane %v4644_v30, 4  ;;  %v4655_v37 = vrot.slane %v4654_v32, 2 }
 0x635   : > { %5648 = vmatpush1.bf16.msra.mxu1 %v6746_v39  ;;  %v4647_v38 = vrot.slane %v4639_v33, 4 }
 0x636   : > { %5730 = vmatpush1.bf16.msra.mxu0 %v6747_v40  ;;  %5649 = vmatprep.subr.bf16.mxu1 %v6748_v43  ;;  %v4678_v39 = vadd.f32 %v4677_v34, %v4644_v30  ;;  %v4671_v40 = vrot.slane %v4643_v35, 4  ;;  %v4656_v26 = vadd.f32 %v4655_v37, %v4654_v32 }
 0x637   : > { %5731 = vmatprep.subr.bf16.mxu0 %v6750_v3  ;;  %v4648_v27 = vadd.f32 %v4647_v38, %v4639_v33  ;;  %v4748_v33 = vrot.slane %v8039_v12, %v4747_v17  ;;  %v4617_v38 = vadd.f32 %v4616_v23, %v8111_v19 }
 0x638   : > { %v4679_v41 = vrot.slane %v4678_v39, 2  ;;  %v4672_v63 = vadd.f32 %v4671_v40, %v4643_v35  ;;  %v4657_v42 = vrot.slane %v4656_v26, 1 }
 0x639   : > { %5650 = vmatpush1.bf16.msra.mxu1 %v6752_v56  ;;  %v4649_v43 = vrot.slane %v4648_v27, 2 }
 0x63a   : > { %5732 = vmatpush1.bf16.msra.mxu0 %v6753_v58  ;;  %5651 = vmatprep.subr.bf16.mxu1 %v6754_v60  ;;  %v4680_v44 = vadd.f32 %v4679_v41, %v4678_v39  ;;  %v4673_v25 = vrot.slane %v4672_v63, 2  ;;  %v4658_v3 = vadd.f32 %v4657_v42, %v4656_v26 }
 0x63b   : > { %5733 = vmatprep.subr.bf16.mxu0 %v6756_v61  ;;  %v4650_v45 = vadd.f32 %v4649_v43, %v4648_v27 }
 0x63c   : > { %v4681_v47 = vrot.slane %v4680_v44, 1  ;;  %v4674_v50 = vadd.f32 %v4673_v25, %v4672_v63  ;;  %v4696_v51 = vmul.f32 0.125, %v4658_v3  ;;  %v4798_v63 = vrot.slane %v8045_v4, %v4747_v17 }
 0x63d   : > { %5652 = vmatpush1.bf16.msra.mxu1 %v6758_v16  ;;  %v4651_v52 = vrot.slane %v4650_v45, 1  ;;  %v8098_v16 = vsub.s32 0, %v8017_v28  ;;  %v4618_v25 = vrot.slane %v4617_v38, 2 }
 0x63e   : > { %5734 = vmatpush1.bf16.msra.mxu0 %v6759_v7  ;;  %5653 = vmatprep.subr.bf16.mxu1 %v6760_v53  ;;  %v4682_v54 = vadd.f32 %v4681_v47, %v4680_v44  ;;  %v4675_v56 = vrot.slane %v4674_v50, 1  ;;  %v4704_v58 = vadd.f32 1e-05, %v4696_v51  ;;  %v4736_v7 = vrot.slane %v8039_v12, %v8094_v2 }
 0x63f   : > { %5735 = vmatprep.subr.bf16.mxu0 %v6762_v11  ;;  %v4652_v59 = vadd.f32 %v4651_v52, %v4650_v45  ;;  %v4786_v53 = vrot.slane %v8045_v4, %v8094_v2  ;;  %v8105_v11 = vld [vmem:[#allocation2 + $0x18] sm:$0xff]  ;;  %v4732_v5 = vrot.slane %v8039_v12, %v8098_v16  ;;  %v4782_v32 = vrot.slane %v8045_v4, %v8098_v16 }
 0x640   : > { %v4700_v36 = vmul.f32 0.125, %v4682_v54  ;;  %v4676_v60 = vadd.f32 %v4675_v56, %v4674_v50  ;;  %6862 = vrsqrt.f32 %v4704_v58  ;;  %v4592_v46 = vrot.slane %v8105_v11, 4 }
 0x641   : > { %5654 = vmatpush1.bf16.msra.mxu1 %v6764_v20  ;;  %v4695_v61 = vmul.f32 0.125, %v4652_v59  ;;  %v8113_v20 = vld [vmem:[#allocation2 + $0x10] sm:$0xff]  ;;  %v4619_v54 = vadd.f32 %v4618_v25, %v4617_v38  ;;  %v6780_v38 = vld [vmem:[%s7384_s21 + $0x124] ss:$8 sps:$4 sm:$0xff]  }
 0x642   : > { %5736 = vmatpush1.bf16.msra.mxu0 %v6765_v49  ;;  %5664 = vmatprep.subr.bf16.mxu1 %v6768_v22  ;;  %v4708_v62 = vadd.f32 1e-05, %v4700_v36  ;;  %v4699_v0 = vmul.f32 0.125, %v4676_v60  ;;  %v8115_v49 = vld [vmem:[#allocation2 + $0x30] sm:$0xff]  ;;  %v4586_v22 = vrot.slane %v8113_v20, 4  ;;  %v4593_v34 = vadd.f32 %v4592_v46, %v8105_v11 }
 0x643   : > { %5746 = vmatprep.subr.bf16.mxu0 %v6771_v24  ;;  %v4703_v57 = vadd.f32 1e-05, %v4695_v61 }
 0x644   : > { %6864 = vrsqrt.f32 %v4708_v62  ;;  %v4707_v1 = vadd.f32 1e-05, %v4699_v0  ;;  %v4587_v39 = vadd.f32 %v4586_v22, %v8113_v20  ;;  %v4594_v42 = vrot.slane %v4593_v34, 2  ;;  %v6777_v22 = vld [vmem:[%s7384_s21 + $0x314] ss:$8 sps:$4 sm:$0xff]  }
 0x645   : > { %6866 = vrsqrt.f32 %v4703_v57 }
 0x646   : > { %6868 = vrsqrt.f32 %v4707_v1  ;;  %v4588_v3 = vrot.slane %v4587_v39, 2  ;;  %v4595_v47 = vadd.f32 %v4594_v42, %v4593_v34 }
 0x648   : > { %v4589_v56 = vadd.f32 %v4588_v3, %v4587_v39  ;;  %v6789_v3 = vld [vmem:[%s7384_s21 + $0x334] ss:$8 sps:$4 sm:$0xff]  }
 0x64a   : > { %v6863_v8 = vpop.eup %6862  ;;  %v4590_v62 = vrot.slane %v4589_v56, 1 }
 0x64b   : > { %v4720_v15 = vmul.f32 %v6863_v8, %v8070_v13  ;;  %v4610_v13 = vrot.slane %v8115_v49, 4 }
 0x64d   : > { %v4770_v30 = vmul.f32 %v4736_v7, %v4720_v15  ;;  %v4611_v40 = vadd.f32 %v4610_v13, %v8115_v49  ;;  %v6769_v15 = vld [vmem:[%s7384_s21 + $0x300] ss:$8 sps:$4 sm:$0xff]  }
 0x64e   : > { %v6865_v24 = vpop.eup %6864 }
 0x64f   : > { %v6867_v35 = vpop.eup %6866  ;;  %v4724_v37 = vmul.f32 %v6865_v24, %v8077_v21  ;;  %v4820_v27 = vadd.f32 %v4786_v53, %v4770_v30  ;;  %v4612_v50 = vrot.slane %v4611_v40, 2  ;;  %v4591_v53 = vadd.f32 %v4590_v62, %v4589_v56  ;;  %v6787_v56 = vld [vmem:[%s7384_s21 + $0x330] ss:$8 sps:$4 sm:$0xff]  }
 0x650   : > { %v6869_v26 = vpop.eup %6868  ;;  %v4719_v41 = vmul.f32 %v6867_v35, %v8082_v29  ;;  %v4596_v29 = vrot.slane %v4595_v47, 1 }
 0x651   : > { %v4774_v43 = vmul.f32 %v4752_v14, %v4724_v37  ;;  %v4723_v44 = vmul.f32 %v6869_v26, %v8087_v31  ;;  %v4828_v45 = vmax.f32 %v4820_v27, 0.0  ;;  %v4613_v36 = vadd.f32 %v4612_v50, %v4611_v40  ;;  %v6775_v37 = vld [vmem:[%s7384_s21 + $0x310] ss:$8 sps:$4 sm:$0xff]   ;;  %v6783_v40 = vld [vmem:[%s7384_s21 + $0x324] ss:$8 sps:$4 sm:$0xff]  }
 0x652   : > { %v4769_v21 = vmul.f32 %v4732_v5, %v4719_v41  ;;  %v4620_v31 = vrot.slane %v4619_v54, 1  ;;  %v4597_v57 = vadd.f32 %v4596_v29, %v4595_v47  ;;  %v4625_v24 = vmul.f32 0.125, %v4591_v53  ;;  %v6778_v41 = vld [vmem:[%s7384_s21 + $0x120] ss:$8 sps:$4 sm:$0xff]   ;;  %v6801_v53 = vld [vmem:[%s7384_s21 + $0x354] ss:$8 sps:$4 sm:$0xff]  }
 0x653   : > { %v4824_v51 = vadd.f32 %v4802_v18, %v4774_v43  ;;  %v4773_v52 = vmul.f32 %v4748_v33, %v4723_v44  ;;  %v4836_v58 = vpack.c.bf16 %v4828_v45, %v4828_v45  ;;  %v4614_v1 = vrot.slane %v4613_v36, 1  ;;  %v6774_v18 = vld [vmem:[%s7384_s21 + $0x114] ss:$8 sps:$4 sm:$0xff]   ;;  %v6772_v33 = vld [vmem:[%s7384_s21 + $0x110] ss:$8 sps:$4 sm:$0xff]  }
 0x654   : > { %v4819_v59 = vadd.f32 %v4782_v32, %v4769_v21  ;;  %v4621_v8 = vadd.f32 %v4620_v31, %v4619_v54  ;;  %v4626_v46 = vmul.f32 0.125, %v4597_v57  ;;  %v8145_v35 = vsub.f32 %v8113_v20, %v4625_v24  ;;  %v6786_v43 = vld [vmem:[%s7384_s21 + $0x134] ss:$8 sps:$4 sm:$0xff]   ;;  %v6804_v24 = vld [vmem:[%s7384_s21 + $0x164] ss:$8 sps:$4 sm:$0xff]  }
 0x655   : > { %v4832_v60 = vmax.f32 %v4824_v51, 0.0  ;;  %v4823_v61 = vadd.f32 %v4798_v63, %v4773_v52  ;;  %5655 = vmatprep.mubr.bf16.mxu1 %v4836_v58  ;;  %v4615_v5 = vadd.f32 %v4614_v1, %v4613_v36  ;;  %v6784_v51 = vld [vmem:[%s7384_s21 + $0x130] ss:$8 sps:$4 sm:$0xff]   ;;  %v6792_v58 = vld [vmem:[%s7384_s21 + $0x144] ss:$8 sps:$4 sm:$0xff]  }
 0x656   : > { %v4827_v0 = vmax.f32 %v4819_v59, 0.0  ;;  %v4630_v13 = vmul.f32 0.125, %v4621_v8  ;;  %v8138_v30 = vsub.f32 %v8105_v11, %v4626_v46  ;;  %v4641_v20 = vmul.f32 %v8145_v35, %v8145_v35  ;;  %v6795_v36 = vld [vmem:[%s7384_s21 + $0x344] ss:$8 sps:$4 sm:$0xff]  }
 0x657   : > { %v4840_v7 = vpack.c.bf16 %v4832_v60, %v4832_v60  ;;  %v4831_v17 = vmax.f32 %v4823_v61, 0.0  ;;  %v4629_v32 = vmul.f32 0.125, %v4615_v5  ;;  %v6796_v5 = vld [vmem:[%s7384_s21 + $0x150] ss:$8 sps:$4 sm:$0xff]  }
 0x658   : > { %v4835_v14 = vpack.c.bf16 %v4827_v0, %v4827_v0  ;;  %v8142_v34 = vsub.f32 %v8111_v19, %v4630_v13  ;;  %v4642_v11 = vmul.f32 %v8138_v30, %v8138_v30  ;;  %v4659_v42 = vrot.slane %v4641_v20, 4  ;;  %v6790_v0 = vld [vmem:[%s7384_s21 + $0x140] ss:$8 sps:$4 sm:$0xff]  }
 0x659   : > { %5737 = vmatprep.mubr.bf16.mxu0 %v4840_v7  ;;  %v4839_v23 = vpack.c.bf16 %v4831_v17, %v4831_v17  ;;  %v8152_v39 = vsub.f32 %v8115_v49, %v4629_v32  ;;  %v6781_v49 = vld [vmem:[%s7384_s21 + $0x320] ss:$8 sps:$4 sm:$0xff]   ;;  %v6798_v7 = vld [vmem:[%s7384_s21 + $0x154] ss:$8 sps:$4 sm:$0xff]  }
 0x65a   : > { %5656 = vmatmul.mubr.bf16.vlgmr.msra.gmra.mrb[0].mxu1 %v4835_v14  ;;  %v4646_v19 = vmul.f32 %v8142_v34, %v8142_v34  ;;  %v4665_v26 = vrot.slane %v4642_v11, 4  ;;  %v4660_v21 = vadd.f32 %v4659_v42, %v4641_v20  ;;  %v6805_v20 = vld [vmem:[%s7384_s21 + $0x360] ss:$8 sps:$4 sm:$0xff]   ;;  %v6811_v42 = vld [vmem:[%s7384_s21 + $0x370] ss:$8 sps:$4 sm:$0xff]  }
 0x65b   : > { %5665 = vmatpush1.bf16.msra.mxu1 %v6766_v6  ;;  %5738 = vmatmul.mubr.bf16.vlgmr.msra.gmra.mrb[0].mxu0 %v4839_v23  ;;  %v4645_v27 = vmul.f32 %v8152_v39, %v8152_v39  ;;  %v6793_v6 = vld [vmem:[%s7384_s21 + $0x340] ss:$8 sps:$4 sm:$0xff]   ;;  %v6799_v23 = vld [vmem:[%s7384_s21 + $0x350] ss:$8 sps:$4 sm:$0xff]  }
 0x65c   : > { %5747 = vmatpush1.bf16.msra.mxu0 %v6769_v15  ;;  %5666 = vmatprep.subr.bf16.mxu1 %v6774_v18  ;;  %v4689_v63 = vrot.slane %v4646_v19, 4  ;;  %v4666_v44 = vadd.f32 %v4665_v26, %v4642_v11  ;;  %v4661_v54 = vrot.slane %v4660_v21, 2  ;;  %v6810_v26 = vld [vmem:[%s7384_s21 + $0x174] ss:$8 sps:$4 sm:$0xff]  }
 0x65d   : > { %5748 = vmatprep.subr.bf16.mxu0 %v6777_v22  ;;  %v4683_v25 = vrot.slane %v4645_v27, 4 }
 0x65e   : > { %v4690_v45 = vadd.f32 %v4689_v63, %v4646_v19  ;;  %v4667_v47 = vrot.slane %v4666_v44, 2  ;;  %v4662_v61 = vadd.f32 %v4661_v54, %v4660_v21  ;;  %v6802_v19 = vld [vmem:[%s7384_s21 + $0x160] ss:$8 sps:$4 sm:$0xff]   ;;  %v4743_v63 = vsub.s32 3, %v8017_v28 }
 0x65f   : > { %5667 = vmatpush1.bf16.msra.mxu1 %v6772_v33  ;;  %v4684_v50 = vadd.f32 %v4683_v25, %v4645_v27  ;;  %v6813_v27 = vld [vmem:[%s7384_s21 + $0x374] ss:$8 sps:$4 sm:$0xff]   ;;  %v6814_v25 = vld [vmem:[%s7384_s21 + $0x180] ss:$8 sps:$4 sm:$0xff]  }
 0x660   : > { %5749 = vmatpush1.bf16.msra.mxu0 %v6775_v37  ;;  %5668 = vmatprep.subr.bf16.mxu1 %v6780_v38  ;;  %v4691_v52 = vrot.slane %v4690_v45, 2  ;;  %v4668_v59 = vadd.f32 %v4667_v47, %v4666_v44  ;;  %v4663_v1 = vrot.slane %v4662_v61, 1  ;;  %v6807_v37 = vld [vmem:[%s7384_s21 + $0x364] ss:$8 sps:$4 sm:$0xff]   ;;  %v6817_v21 = vld [vmem:[%s7384_s21 + $0x380] ss:$8 sps:$4 sm:$0xff]   ;;  %v4794_v54 = vrot.slane %v8045_v4, %v4743_v63 }
 0x661   : > { %5750 = vmatprep.subr.bf16.mxu0 %v6783_v40  ;;  %v4685_v29 = vrot.slane %v4684_v50, 2  ;;  %v6819_v44 = vld [vmem:[%s7384_s21 + $0x384] ss:$8 sps:$4 sm:$0xff]   ;;  %v6822_v47 = vld [vmem:[%s7384_s21 + $0x194] ss:$8 sps:$4 sm:$0xff]  }
 0x662   : > { %v4692_v60 = vadd.f32 %v4691_v52, %v4690_v45  ;;  %v4669_v31 = vrot.slane %v4668_v59, 1  ;;  %v4664_v14 = vadd.f32 %v4663_v1, %v4662_v61  ;;  %v6825_v52 = vld [vmem:[%s7384_s21 + $0x394] ss:$8 sps:$4 sm:$0xff]   ;;  %v6823_v61 = vld [vmem:[%s7384_s21 + $0x390] ss:$8 sps:$4 sm:$0xff]  }
 0x663   : > { %5669 = vmatpush1.bf16.msra.mxu1 %v6778_v41  ;;  %v4686_v62 = vadd.f32 %v4685_v29, %v4684_v50  ;;  %v6808_v41 = vld [vmem:[%s7384_s21 + $0x170] ss:$8 sps:$4 sm:$0xff]  }
 0x664   : > { %5751 = vmatpush1.bf16.msra.mxu0 %v6781_v49  ;;  %5670 = vmatprep.subr.bf16.mxu1 %v6786_v43  ;;  %v4693_v57 = vrot.slane %v4692_v60, 1  ;;  %v4670_v17 = vadd.f32 %v4669_v31, %v4668_v59  ;;  %v4697_v13 = vmul.f32 0.125, %v4664_v14  ;;  %v6816_v49 = vld [vmem:[%s7384_s21 + $0x184] ss:$8 sps:$4 sm:$0xff]   ;;  %v4759_v43 = vsub.s32 7, %v8017_v28 }
 0x665   : > { %5752 = vmatprep.subr.bf16.mxu0 %v6789_v3  ;;  %v4687_v8 = vrot.slane %v4686_v62, 1  ;;  %v4744_v3 = vrot.slane %v8039_v12, %v4743_v63  ;;  %v6832_v14 = vld [vmem:[%s7384_s21 + $0x1b0] ss:$8 sps:$4 sm:$0xff]  }
 0x666   : > { %v4694_v15 = vadd.f32 %v4693_v57, %v4692_v60  ;;  %v4698_v18 = vmul.f32 0.125, %v4670_v17  ;;  %v4705_v11 = vadd.f32 1e-05, %v4697_v13  ;;  %v4760_v50 = vrot.slane %v8039_v12, %v4759_v43  ;;  %v6834_v17 = vld [vmem:[%s7384_s21 + $0x1b4] ss:$8 sps:$4 sm:$0xff]  }
 0x667   : > { %5671 = vmatpush1.bf16.msra.mxu1 %v6784_v51  ;;  %v4688_v46 = vadd.f32 %v4687_v8, %v4686_v62  ;;  %v4810_v59 = vrot.slane %v8045_v4, %v4759_v43  ;;  %v6844_v13 = vld [vmem:[%s7384_s21 + $0x1d0] ss:$8 sps:$4 sm:$0xff]  }
 0x668   : > { %5753 = vmatpush1.bf16.msra.mxu0 %v6787_v56  ;;  %5672 = vmatprep.subr.bf16.mxu1 %v6792_v58  ;;  %v4702_v22 = vmul.f32 0.125, %v4694_v15  ;;  %v4706_v32 = vadd.f32 1e-05, %v4698_v18  ;;  %v6840_v18 = vld [vmem:[%s7384_s21 + $0x1c4] ss:$8 sps:$4 sm:$0xff]  }
 0x669   : > { %5754 = vmatprep.subr.bf16.mxu0 %v6795_v36  ;;  %v4701_v33 = vmul.f32 0.125, %v4688_v46  ;;  %v6820_v36 = vld [vmem:[%s7384_s21 + $0x190] ss:$8 sps:$4 sm:$0xff]   ;;  %v6838_v46 = vld [vmem:[%s7384_s21 + $0x1c0] ss:$8 sps:$4 sm:$0xff]  }
 0x66a   : > { %v4710_v38 = vadd.f32 1e-05, %v4702_v22  ;;  %6870 = vrsqrt.f32 %v4706_v32  ;;  %v6849_v22 = vld [vmem:[%s7384_s21 + $0x3d4] ss:$8 sps:$4 sm:$0xff]   ;;  %v6852_v32 = vld [vmem:[%s7384_s21 + $0x1e4] ss:$8 sps:$4 sm:$0xff]  }
 0x66b   : > { %5673 = vmatpush1.bf16.msra.mxu1 %v6790_v0  ;;  %v4709_v40 = vadd.f32 1e-05, %v4701_v33  ;;  %v6855_v33 = vld [vmem:[%s7384_s21 + $0x3e4] ss:$8 sps:$4 sm:$0xff]  }
 0x66c   : > { %5755 = vmatpush1.bf16.msra.mxu0 %v6793_v6  ;;  %5674 = vmatprep.subr.bf16.mxu1 %v6798_v7  ;;  %6872 = vrsqrt.f32 %v4710_v38  ;;  %v6853_v38 = vld [vmem:[%s7384_s21 + $0x3e0] ss:$8 sps:$4 sm:$0xff]  }
 0x66d   : > { %5756 = vmatprep.subr.bf16.mxu0 %v6801_v53  ;;  %6874 = vrsqrt.f32 %v4705_v11  ;;  %v6858_v11 = vld [vmem:[%s7384_s21 + $0x1f4] ss:$8 sps:$4 sm:$0xff]  }
 0x66e   : > { %6876 = vrsqrt.f32 %v4709_v40  ;;  %v6861_v40 = vld [vmem:[%s7384_s21 + $0x3f4] ss:$8 sps:$4 sm:$0xff]  }
 0x66f   : > { %5675 = vmatpush1.bf16.msra.mxu1 %v6796_v5  ;;  %v6841_v5 = vld [vmem:[%s7384_s21 + $0x3c0] ss:$8 sps:$4 sm:$0xff]  }
 0x670   : > { %5757 = vmatpush1.bf16.msra.mxu0 %v6799_v23  ;;  %5676 = vmatprep.subr.bf16.mxu1 %v6804_v24  ;;  %v6846_v23 = vld [vmem:[%s7384_s21 + $0x1d4] ss:$8 sps:$4 sm:$0xff]   ;;  %v6847_v24 = vld [vmem:[%s7384_s21 + $0x3d0] ss:$8 sps:$4 sm:$0xff]  }
 0x671   : > { %5758 = vmatprep.subr.bf16.mxu0 %v6807_v37  ;;  %v6850_v37 = vld [vmem:[%s7384_s21 + $0x1e0] ss:$8 sps:$4 sm:$0xff]  }
 0x673   : > { %5677 = vmatpush1.bf16.msra.mxu1 %v6802_v19 }
 0x674   : > { %5759 = vmatpush1.bf16.msra.mxu0 %v6805_v20  ;;  %5678 = vmatprep.subr.bf16.mxu1 %v6810_v26  ;;  %v6871_v45 = vpop.eup %6870  ;;  %v6856_v20 = vld [vmem:[%s7384_s21 + $0x1f0] ss:$8 sps:$4 sm:$0xff]  }
 0x675   : > { %5760 = vmatprep.subr.bf16.mxu0 %v6813_v27  ;;  %v4722_v28 = vmul.f32 %v6871_v45, %v8138_v30  ;;  %v6828_v30 = vld [vmem:[%s7384_s21 + $0x1a4] ss:$8 sps:$4 sm:$0xff]   ;;  %v6859_v27 = vld [vmem:[%s7384_s21 + $0x3f0] ss:$8 sps:$4 sm:$0xff]  }
 0x676   : > { %v6873_v51 = vpop.eup %6872 }
 0x677   : > { %5679 = vmatpush1.bf16.msra.mxu1 %v6808_v41  ;;  %v6875_v56 = vpop.eup %6874  ;;  %v4726_v58 = vmul.f32 %v6873_v51, %v8142_v34  ;;  %v4772_v12 = vmul.f32 %v4744_v3, %v4722_v28  ;;  %v6831_v34 = vld [vmem:[%s7384_s21 + $0x3a4] ss:$8 sps:$4 sm:$0xff]  }
 0x678   : > { %5761 = vmatpush1.bf16.msra.mxu0 %v6811_v42  ;;  %5680 = vmatprep.subr.bf16.mxu1 %v6816_v49  ;;  %v6877_v29 = vpop.eup %6876  ;;  %v4721_v60 = vmul.f32 %v6875_v56, %v8145_v35  ;;  %v6826_v35 = vld [vmem:[%s7384_s21 + $0x1a0] ss:$8 sps:$4 sm:$0xff]  }
 0x679   : > { %5762 = vmatprep.subr.bf16.mxu0 %v6819_v44  ;;  %v4776_v31 = vmul.f32 %v4760_v50, %v4726_v58  ;;  %v4725_v62 = vmul.f32 %v6877_v29, %v8152_v39  ;;  %v4822_v4 = vadd.f32 %v4794_v54, %v4772_v12  ;;  %v6829_v39 = vld [vmem:[%s7384_s21 + $0x3a0] ss:$8 sps:$4 sm:$0xff]  }
 0x67a   : > { %v4771_v0 = vmul.f32 %v8049_v48, %v4721_v60  ;;  %v6837_v48 = vld [vmem:[%s7384_s21 + $0x3b4] ss:$8 sps:$4 sm:$0xff]   ;;  %v4971_v42 = vld [vmem:[%s7403_s14] sm:$0x3] }
 0x67b   : > { %5681 = vmatpush1.bf16.msra.mxu1 %v6814_v25  ;;  %v4826_v57 = vadd.f32 %v4810_v59, %v4776_v31  ;;  %v4775_v1 = vmul.f32 %v8056_v10, %v4725_v62  ;;  %v4830_v6 = vmax.f32 %v4822_v4, 0.0  ;;  %v4976_v49 = vrot.slane %v4971_v42, %v8098_v16 }
 0x67c   : > { %5763 = vmatpush1.bf16.msra.mxu0 %v6817_v21  ;;  %5682 = vmatprep.subr.bf16.mxu1 %v6822_v47  ;;  %v4821_v7 = vadd.f32 %v8053_v9, %v4771_v0  ;;  %v6835_v9 = vld [vmem:[%s7384_s21 + $0x3b0] ss:$8 sps:$4 sm:$0xff]   ;;  %v4980_v43 = vrot.slane %v4971_v42, %v8094_v2 }
 0x67d   : > { %5764 = vmatprep.subr.bf16.mxu0 %v6825_v52  ;;  %v4834_v8 = vmax.f32 %v4826_v57, 0.0  ;;  %v4825_v53 = vadd.f32 %v8059_v55, %v4775_v1  ;;  %v4838_v10 = vpack.c.bf16 %v4830_v6, %v4830_v6  ;;  %v6843_v55 = vld [vmem:[%s7384_s21 + $0x3c4] ss:$8 sps:$4 sm:$0xff]  }
 0x67e   : > { %v4829_v19 = vmax.f32 %v4821_v7, 0.0 }
 0x67f   : > { %5683 = vmatpush1.bf16.msra.mxu1 %v6820_v36  ;;  %v4842_v15 = vpack.c.bf16 %v4834_v8, %v4834_v8  ;;  %5696 = vmatprep.mubr.bf16.mxu1 %v4838_v10  ;;  %v4833_v26 = vmax.f32 %v4825_v53, 0.0 }
 0x680   : > { %5765 = vmatpush1.bf16.msra.mxu0 %v6823_v61  ;;  %5684 = vmatprep.subr.bf16.mxu1 %v6828_v30  ;;  %v4837_v41 = vpack.c.bf16 %v4829_v19, %v4829_v19 }
 0x681   : > { %5766 = vmatprep.subr.bf16.mxu0 %v6831_v34  ;;  %5778 = vmatprep.mubr.bf16.mxu0 %v4842_v15  ;;  %v4841_v63 = vpack.c.bf16 %v4833_v26, %v4833_v26 }
 0x683   : > { %5685 = vmatpush1.bf16.msra.mxu1 %v6826_v35 }
 0x684   : > { %5767 = vmatpush1.bf16.msra.mxu0 %v6829_v39  ;;  %5686 = vmatprep.subr.bf16.mxu1 %v6834_v17 }
 0x685   : > { %5768 = vmatprep.subr.bf16.mxu0 %v6837_v48 }
 0x687   : > { %5687 = vmatpush1.bf16.msra.mxu1 %v6832_v14 }
 0x688   : > { %5769 = vmatpush1.bf16.msra.mxu0 %v6835_v9  ;;  %5688 = vmatprep.subr.bf16.mxu1 %v6840_v18 }
 0x689   : > { %5770 = vmatprep.subr.bf16.mxu0 %v6843_v55 }
 0x68b   : > { %5689 = vmatpush1.bf16.msra.mxu1 %v6838_v46 }
 0x68c   : > { %5771 = vmatpush1.bf16.msra.mxu0 %v6841_v5  ;;  %5690 = vmatprep.subr.bf16.mxu1 %v6846_v23 }
 0x68d   : > { %5772 = vmatprep.subr.bf16.mxu0 %v6849_v22 }
 0x68f   : > { %5691 = vmatpush1.bf16.msra.mxu1 %v6844_v13 }
 0x690   : > { %5773 = vmatpush1.bf16.msra.mxu0 %v6847_v24  ;;  %5692 = vmatprep.subr.bf16.mxu1 %v6852_v32 }
 0x691   : > { %5774 = vmatprep.subr.bf16.mxu0 %v6855_v33 }
 0x693   : > { %5693 = vmatpush1.bf16.msra.mxu1 %v6850_v37 }
 0x694   : > { %5775 = vmatpush1.bf16.msra.mxu0 %v6853_v38  ;;  %5694 = vmatprep.subr.bf16.mxu1 %v6858_v11 }
 0x695   : > { %5776 = vmatprep.subr.bf16.mxu0 %v6861_v40 }
 0x697   : > { %5695 = vmatpush1.bf16.msra.mxu1 %v6856_v20 }
 0x698   : > { %5777 = vmatpush1.bf16.msra.mxu0 %v6859_v27 }
 0x69a   : > { %5697 = vmatmul.mubr.bf16.vlgmr.msra.gmra.mrb[0].mxu1 %v4837_v41 }
 0x69b   : > { %5779 = vmatmul.mubr.bf16.vlgmr.msra.gmra.mrb[0].mxu0 %v4841_v63 }
 0x76d   : > { %v5698_v44 = vpop.f32.mrb[0].mxu1 }
 0x76e   : > { %v6554_v25 = vadd.f32 %v5698_v44, %v4976_v49  ;;  %v5780_v3 = vpop.f32.mrb[0].mxu0  ;;  %v5700_v45 = vpop.f32.mrb[1].mxu1 }
 0x76f   : > { %v6556_v21 = vadd.f32 %v5700_v45, %v4980_v43  ;;  %v5782_v47 = vpop.f32.mrb[1].mxu0  ;;  %v5702_v50 = vpop.f32.mrb[2].mxu1 }
 0x770   : > { %v6555_v51 = vadd.f32 %v6554_v25, %v5780_v3  ;;  %v5784_v52 = vpop.f32.mrb[2].mxu0  ;;  %v5703_v28 = vpop.f32.mrb[3].mxu1 }
 0x771   : > { %v6557_v54 = vadd.f32 %v6556_v21, %v5782_v47  ;;  %v5785_v56 = vpop.f32.mrb[3].mxu0 }
 0x772   : > { %5787 = vst [vmem:[%s7396_s15] sm:$0xff] %v6555_v51 }
 0x773   : > { %5788 = vst [vmem:[%s7396_s15 + $0x8] sm:$0xff] %v6557_v54 }
 0x774 PF: > { %s8295_s30 = sld [smem:[#allocation21_spill]]  ;;  %s8296_s22 = sld [smem:[#allocation20_spill]] }
 0x775   : > { %s8297_s29 = sld [smem:[#allocation22_spill]]  ;;  %s8298_s27 = smov %s7064_s28 }
 0x77a   : > { %p24_p10 = scmp.ge.s32.totalorder %s8295_s30, 4   ;;  %s8299_s28 = smov %s8296_s22 }
 0x77c   :  { %26 = sbr.rel (!%p24_p10) target bundleno = 11 (0xb), region = 155 }
 0x783   :  { %5810 = vsyncpa [#allocation6], 1 }
 0x784   :  { %5812 = vsyncpa [#allocation6 + $0x1], 1 }
 0x785   :  { %5813 = vsyncpa [#allocation8], 1 }
 0x786   :  { %5815 = vsyncpa [#allocation8 + $0x1], 1 }
 0x787   :  { %5816 = vsyncpa [#allocation11], 1 }
 0x788   :  { %5818 = vsyncpa [#allocation11 + $0x1], 1 }
 0x789   :  { %5819 = vsyncmov [#allocation4] }
 0x78c   :  { %s5820_s17 = vpop.sfrf %5819 }
 0x78d   :  { %p6516_p7 = scmp.ne.s32.totalorder %s5820_s17, 0 }
 0x78f   :  { %5824 = shalt.err (%p6516_p7)  }

</bundles_post_ra>
